<compile_context>
chip_gen: v5e
topology: v5e:2x2
jax: 0.10.0
libtpu: 0.0.40
codegen_flags: <defaults>
</compile_context>

<pallas_src>
import functools

import jax
import jax.numpy as jnp
import numpy as np
from jax.experimental import pallas as pl
from jax.experimental.pallas import tpu as pltpu

EPS = 1e-5          # nn.InstanceNorm3d default eps
LEAKINESS = 0.01    # negative_slope


def _leaky_relu(x):
    return jnp.where(x >= 0, x, LEAKINESS * x)


def _encoding_kernel(x_ref, m_ref, g1_ref, b1_ref, w1_ref, cb1_ref,
                     g2_ref, b2_ref, w2_ref, cb2_ref,
                     out_ref, p_ref, *, H, W):
    """One grid step == one batch sample.

    x_ref   : (CP, S)  f32   sample; channels on sublanes, S=D*H*W on lanes
    m_ref   : (27, S)  f32   host-precomputed per-tap 0/1 boundary masks
    g*/b*   : (CP, 1)  f32   instance-norm affine gamma / beta
    w*_ref  : (CP, 27*CP) bf16  conv weight slab, column k*CP+ci = tap k, in-ch ci
    cb*     : (CP, 1)  f32   conv bias
    out_ref : (CP, S)  f32
    p_ref   : (27*CP, S) bf16  im2col patch matrix scratch
    """
    CP, S = x_ref.shape
    HW = H * W
    inv_S = 1.0 / S

    x = x_ref[...].astype(jnp.float32)                      # skip connection

    def instance_norm(h, g_ref, b_ref):
        # Fused single-pass statistics: E[x], E[x^2]; var = E[x^2] - mean^2.
        s1 = jnp.sum(h, axis=1, keepdims=True)
        s2 = jnp.sum(h * h, axis=1, keepdims=True)
        mean = s1 * inv_S
        var = s2 * inv_S - mean * mean                      # biased variance
        return (h - mean) * jax.lax.rsqrt(var + EPS) * g_ref[...] + b_ref[...]

    def conv3x3x3(h, w_ref, cb_ref):
        # Build the (27*CP, S) im2col patch matrix: one XLU roll + one masked
        # multiply + one aligned bf16 store per tap, then a single MXU matmul
        # against the packed weight slab.
        # NOTE: lanes that wrap around in the roll (or cross a D/H/W boundary)
        # are exactly the lanes the mask zeros -> multiply-by-mask is safe
        # (no uninitialized data is ever read).
        for kd in range(3):
            for kh in range(3):
                for kw in range(3):
                    k = (kd * 3 + kh) * 3 + kw
                    delta = (kd - 1) * HW + (kh - 1) * W + (kw - 1)
                    shift = (-delta) % S                     # non-negative
                    rolled = pltpu.roll(h, shift, axis=1) if shift else h
                    tap = rolled * m_ref[k:k + 1, :]         # (CP,S) * (1,S)
                    p_ref[k * CP:(k + 1) * CP, :] = tap.astype(jnp.bfloat16)
        return jnp.dot(w_ref[...], p_ref[...],
                       preferred_element_type=jnp.float32) + cb_ref[...]

    # --- bn_1 + leaky_relu + conv1 ---------------------------------------
    h = conv3x3x3(_leaky_relu(instance_norm(x, g1_ref, b1_ref)),
                  w1_ref, cb1_ref)

    # TODO(synk): Dropout3d(p) implemented as identity (inference mode);
    # training-mode channel dropout would need pltpu.prng_* per sample.

    # --- bn_2 + leaky_relu + conv2 ---------------------------------------
    h = conv3x3x3(_leaky_relu(instance_norm(h, g2_ref, b2_ref)),
                  w2_ref, cb2_ref)

    # --- residual (lane-dense store) --------------------------------------
    out_ref[...] = (h + x).astype(out_ref.dtype)


def encoding_module_forward(x_ncdhw, params):
    """Forward pass matching EncodingModule.forward.  x_ncdhw: (N, C, D, H, W)."""
    N, C, D, H, W = x_ncdhw.shape
    g1, bt1, w1, cb1, g2, bt2, w2, cb2 = params
    Cout = w1.shape[0]
    assert Cout == C, "EncodingModule requires in_channels == out_channels"

    S = D * H * W
    # NOTE: lane-padding S for general shapes would also require excluding the
    # padded lanes from the instance-norm statistics (and the conv masks).
    assert S % 128 == 0, "spatial size must be a multiple of 128 (lane axis)"
    CP = ((C + 7) // 8) * 8                       # channels padded to sublane tile

    # NCDHW order, spatial flattened onto the lane axis, channels zero-padded.
    # Padded channel rows provably stay zero through norm / conv / skip
    # (gamma=1, beta=0, zero weight rows/cols, zero bias rows).
    x = x_ncdhw.reshape(N, C, S).astype(jnp.float32)
    x = jnp.pad(x, ((0, 0), (0, CP - C), (0, 0)))

    # Host-precomputed per-tap boundary masks: (27, S) 0/1 f32.
    s_idx = jnp.arange(S, dtype=jnp.int32)
    d_idx = s_idx // (H * W)
    rem = s_idx % (H * W)
    h_idx = rem // W
    w_idx = rem % W
    rows = []
    for od in (-1, 0, 1):
        for oh in (-1, 0, 1):
            for ow in (-1, 0, 1):
                rows.append((d_idx + od >= 0) & (d_idx + od < D) &
                            (h_idx + oh >= 0) & (h_idx + oh < H) &
                            (w_idx + ow >= 0) & (w_idx + ow < W))
    masks = jnp.stack(rows).astype(jnp.float32)   # (27, S)

    def col(v, fill):
        out = jnp.full((CP, 1), fill, jnp.float32)
        return out.at[:v.shape[0], 0].set(v.astype(jnp.float32))

    def pack_w(w):
        # (Cout, Cin, 3,3,3) -> bf16 (CP, 27*CP); slab[o, k*CP+i] = w[o,i,kd,kh,kw]
        co, ci = w.shape[0], w.shape[1]
        wt = jnp.transpose(w.astype(jnp.float32), (2, 3, 4, 0, 1))   # (3,3,3,Co,Ci)
        full = jnp.zeros((3, 3, 3, CP, CP), jnp.float32).at[..., :co, :ci].set(wt)
        return jnp.transpose(full, (3, 0, 1, 2, 4)).reshape(CP, 27 * CP) \
                  .astype(jnp.bfloat16)

    args = (x, masks,
            col(g1, 1.0), col(bt1, 0.0), pack_w(w1), col(cb1, 0.0),
            col(g2, 1.0), col(bt2, 0.0), pack_w(w2), col(cb2, 0.0))

    def full_spec(a):
        nd = a.ndim
        return pl.BlockSpec(a.shape, lambda n, _nd=nd: (0,) * _nd)

    in_specs = [pl.BlockSpec((None, CP, S), lambda n: (n, 0, 0))]
    in_specs += [full_spec(a) for a in args[1:]]
    out_specs = pl.BlockSpec((None, CP, S), lambda n: (n, 0, 0))

    kernel = functools.partial(_encoding_kernel, H=H, W=W)

    out = pl.pallas_call(
        kernel,
        out_shape=jax.ShapeDtypeStruct((N, CP, S), jnp.float32),
        grid_spec=pltpu.PrefetchScalarGridSpec(
            num_scalar_prefetch=0,
            grid=(N,),
            in_specs=in_specs,
            out_specs=out_specs,
            scratch_shapes=[
                pltpu.VMEM((27 * CP, S), jnp.bfloat16),   # im2col patch matrix
            ],
        ),
        compiler_params=pltpu.CompilerParams(
            dimension_semantics=("parallel",)),   # batch axis -> both TCs on v7x
    )(*args)

    # drop channel padding, restore PyTorch NCDHW layout
    return out[:, :C, :].reshape(N, C, D, H, W).astype(x_ncdhw.dtype)


def ref_forward(x, params):
    """Pure-JAX reference of the PyTorch forward (eval-mode dropout)."""
    g1, bt1, w1, cb1, g2, bt2, w2, cb2 = params

    def inorm(h, g, b):
        m = h.mean(axis=(2, 3, 4), keepdims=True)
        v = ((h - m) ** 2).mean(axis=(2, 3, 4), keepdims=True)
        return (h - m) / jnp.sqrt(v + EPS) * g.reshape(1, -1, 1, 1, 1) \
            + b.reshape(1, -1, 1, 1, 1)

    def conv(h, w, b):
        y = jax.lax.conv_general_dilated(
            h, w, (1, 1, 1), "SAME",
            dimension_numbers=("NCDHW", "OIDHW", "NCDHW"))
        return y + b.reshape(1, -1, 1, 1, 1)

    skip = x
    h = conv(_leaky_relu(inorm(x, g1, bt1)), w1, cb1)
    h = conv(_leaky_relu(inorm(h, g2, bt2)), w2, cb2)
    return h + skip


if __name__ == "__main__":
    key = jax.random.PRNGKey(0)
    N, C, D, H, W = 2, 4, 8, 8, 8   # in_channels == out_channels == 4

    ks = jax.random.split(key, 9)
    x = jax.random.normal(ks[0], (N, C, D, H, W), jnp.float32)
    g1 = 1.0 + 0.1 * jax.random.normal(ks[1], (C,), jnp.float32)
    bt1 = 0.1 * jax.random.normal(ks[2], (C,), jnp.float32)
    w1 = 0.1 * jax.random.normal(ks[3], (C, C, 3, 3, 3), jnp.float32)
    cb1 = 0.1 * jax.random.normal(ks[4], (C,), jnp.float32)
    g2 = 1.0 + 0.1 * jax.random.normal(ks[5], (C,), jnp.float32)
    bt2 = 0.1 * jax.random.normal(ks[6], (C,), jnp.float32)
    w2 = 0.1 * jax.random.normal(ks[7], (C, C, 3, 3, 3), jnp.float32)
    cb2 = 0.1 * jax.random.normal(ks[8], (C,), jnp.float32)
    params = (g1, bt1, w1, cb1, g2, bt2, w2, cb2)

    out = encoding_module_forward(x, params)
    out = jax.block_until_ready(out)

    ref = ref_forward(x, params)
    # bf16 MXU operands (im2col + weight slabs) with f32 accumulation:
    # tolerance loosened from 2e-3 to ~1e-2 per the perf review.
    np.testing.assert_allclose(np.asarray(out), np.asarray(ref),
                               rtol=1e-2, atol=2e-2)
    print("KERNEL_OK")
</pallas_src>

<mosaic_0001>
module attributes {stable_mosaic.version = 11 : i64} {
  func.func @_encoding_kernel(%arg0: i32, %arg1: memref<1x8x512xf32, #tpu.memory_space<vmem>>, %arg2: memref<27x512xf32, #tpu.memory_space<vmem>>, %arg3: memref<8x1xf32, #tpu.memory_space<vmem>>, %arg4: memref<8x1xf32, #tpu.memory_space<vmem>>, %arg5: memref<8x216xbf16, #tpu.memory_space<vmem>>, %arg6: memref<8x1xf32, #tpu.memory_space<vmem>>, %arg7: memref<8x1xf32, #tpu.memory_space<vmem>>, %arg8: memref<8x1xf32, #tpu.memory_space<vmem>>, %arg9: memref<8x216xbf16, #tpu.memory_space<vmem>>, %arg10: memref<8x1xf32, #tpu.memory_space<vmem>>, %arg11: memref<1x8x512xf32, #tpu.memory_space<vmem>>, %arg12: memref<216x512xbf16, #tpu.memory_space<vmem>>) attributes {dimension_semantics = [#tpu.dimension_semantics<parallel>], iteration_bounds = array<i64: 2>, scalar_prefetch = 0 : i64, scratch_operands = 1 : i64, tpu.core_type = #tpu.core_type<tc>, window_params = [{transform_indices = @transform_0, window_bounds = array<i64: 1, 8, 512>}, {pipeline_mode = #tpu.pipeline_mode<synchronous>, transform_indices = @transform_1, window_bounds = array<i64: 27, 512>}, {pipeline_mode = #tpu.pipeline_mode<synchronous>, transform_indices = @transform_2, window_bounds = array<i64: 8, 1>}, {pipeline_mode = #tpu.pipeline_mode<synchronous>, transform_indices = @transform_3, window_bounds = array<i64: 8, 1>}, {pipeline_mode = #tpu.pipeline_mode<synchronous>, transform_indices = @transform_4, window_bounds = array<i64: 8, 216>}, {pipeline_mode = #tpu.pipeline_mode<synchronous>, transform_indices = @transform_5, window_bounds = array<i64: 8, 1>}, {pipeline_mode = #tpu.pipeline_mode<synchronous>, transform_indices = @transform_6, window_bounds = array<i64: 8, 1>}, {pipeline_mode = #tpu.pipeline_mode<synchronous>, transform_indices = @transform_7, window_bounds = array<i64: 8, 1>}, {pipeline_mode = #tpu.pipeline_mode<synchronous>, transform_indices = @transform_8, window_bounds = array<i64: 8, 216>}, {pipeline_mode = #tpu.pipeline_mode<synchronous>, transform_indices = @transform_9, window_bounds = array<i64: 8, 1>}, {transform_indices = @transform_10, window_bounds = array<i64: 1, 8, 512>}]} {
    %c0 = arith.constant 0 : index
    %c0_0 = arith.constant 0 : index
    %c0_1 = arith.constant 0 : index
    %0 = vector.load %arg1[%c0, %c0_0, %c0_1] : memref<1x8x512xf32, #tpu.memory_space<vmem>>, vector<1x8x512xf32>
    %1 = vector.shape_cast %0 : vector<1x8x512xf32> to vector<8x512xf32>
    %cst = arith.constant dense<0.000000e+00> : vector<8xf32>
    %2 = vector.multi_reduction <add>, %1, %cst [1] : vector<8x512xf32> to vector<8xf32>
    %3 = vector.shape_cast %2 : vector<8xf32> to vector<8x1xf32>
    %4 = arith.mulf %1, %1 : vector<8x512xf32>
    %cst_2 = arith.constant dense<0.000000e+00> : vector<8xf32>
    %5 = vector.multi_reduction <add>, %4, %cst_2 [1] : vector<8x512xf32> to vector<8xf32>
    %6 = vector.shape_cast %5 : vector<8xf32> to vector<8x1xf32>
    %cst_3 = arith.constant 0.001953125 : f32
    %7 = vector.broadcast %cst_3 : f32 to vector<8x1xf32>
    %8 = arith.mulf %3, %7 : vector<8x1xf32>
    %cst_4 = arith.constant 0.001953125 : f32
    %9 = vector.broadcast %cst_4 : f32 to vector<8x1xf32>
    %10 = arith.mulf %6, %9 : vector<8x1xf32>
    %11 = arith.mulf %8, %8 : vector<8x1xf32>
    %12 = arith.subf %10, %11 : vector<8x1xf32>
    %13 = vector.broadcast %8 : vector<8x1xf32> to vector<8x512xf32>
    %14 = arith.subf %1, %13 : vector<8x512xf32>
    %cst_5 = arith.constant 9.99999974E-6 : f32
    %15 = vector.broadcast %cst_5 : f32 to vector<8x1xf32>
    %16 = arith.addf %12, %15 : vector<8x1xf32>
    %17 = math.rsqrt %16 : vector<8x1xf32>
    %18 = vector.broadcast %17 : vector<8x1xf32> to vector<8x512xf32>
    %19 = arith.mulf %14, %18 : vector<8x512xf32>
    %c0_6 = arith.constant 0 : index
    %c0_7 = arith.constant 0 : index
    %20 = vector.load %arg3[%c0_6, %c0_7] : memref<8x1xf32, #tpu.memory_space<vmem>>, vector<8x1xf32>
    %21 = vector.broadcast %20 : vector<8x1xf32> to vector<8x512xf32>
    %22 = arith.mulf %19, %21 : vector<8x512xf32>
    %c0_8 = arith.constant 0 : index
    %c0_9 = arith.constant 0 : index
    %23 = vector.load %arg4[%c0_8, %c0_9] : memref<8x1xf32, #tpu.memory_space<vmem>>, vector<8x1xf32>
    %24 = vector.broadcast %23 : vector<8x1xf32> to vector<8x512xf32>
    %25 = arith.addf %22, %24 : vector<8x512xf32>
    %cst_10 = arith.constant 0.000000e+00 : f32
    %26 = vector.broadcast %cst_10 : f32 to vector<8x512xf32>
    %27 = arith.cmpf oge, %25, %26 : vector<8x512xf32>
    %cst_11 = arith.constant 0.00999999977 : f32
    %28 = vector.broadcast %cst_11 : f32 to vector<8x512xf32>
    %29 = arith.mulf %28, %25 : vector<8x512xf32>
    %30 = arith.select %27, %25, %29 : vector<8x512xi1>, vector<8x512xf32>
    %c73_i32 = arith.constant 73 : i32
    %31 = tpu.dynamic_rotate %30 by %c73_i32 dim 1 : vector<8x512xf32>, i32 -> vector<8x512xf32>
    %c0_12 = arith.constant 0 : index
    %c0_13 = arith.constant 0 : index
    %32 = vector.load %arg2[%c0_12, %c0_13] : memref<27x512xf32, #tpu.memory_space<vmem>>, vector<1x512xf32>
    %33 = vector.broadcast %32 : vector<1x512xf32> to vector<8x512xf32>
    %34 = arith.mulf %31, %33 : vector<8x512xf32>
    %35 = arith.truncf %34 : vector<8x512xf32> to vector<8x512xbf16>
    %c0_14 = arith.constant 0 : index
    %c0_15 = arith.constant 0 : index
    %36 = vector.load %arg12[%c0_14, %c0_15] : memref<216x512xbf16, #tpu.memory_space<vmem>>, vector<8x512xbf16>
    tpu.vector_store %arg12[%c0_14, %c0_15], %35 {strides = array<i32>} : memref<216x512xbf16, #tpu.memory_space<vmem>>, vector<8x512xbf16>,
    %c72_i32 = arith.constant 72 : i32
    %37 = tpu.dynamic_rotate %30 by %c72_i32 dim 1 : vector<8x512xf32>, i32 -> vector<8x512xf32>
    %c1 = arith.constant 1 : index
    %c0_16 = arith.constant 0 : index
    %38 = vector.load %arg2[%c1, %c0_16] : memref<27x512xf32, #tpu.memory_space<vmem>>, vector<1x512xf32>
    %39 = vector.broadcast %38 : vector<1x512xf32> to vector<8x512xf32>
    %40 = arith.mulf %37, %39 : vector<8x512xf32>
    %41 = arith.truncf %40 : vector<8x512xf32> to vector<8x512xbf16>
    %c8 = arith.constant 8 : index
    %c0_17 = arith.constant 0 : index
    %42 = vector.load %arg12[%c8, %c0_17] : memref<216x512xbf16, #tpu.memory_space<vmem>>, vector<8x512xbf16>
    tpu.vector_store %arg12[%c8, %c0_17], %41 {strides = array<i32>} : memref<216x512xbf16, #tpu.memory_space<vmem>>, vector<8x512xbf16>,
    %c71_i32 = arith.constant 71 : i32
    %43 = tpu.dynamic_rotate %30 by %c71_i32 dim 1 : vector<8x512xf32>, i32 -> vector<8x512xf32>
    %c2 = arith.constant 2 : index
    %c0_18 = arith.constant 0 : index
    %44 = vector.load %arg2[%c2, %c0_18] : memref<27x512xf32, #tpu.memory_space<vmem>>, vector<1x512xf32>
    %45 = vector.broadcast %44 : vector<1x512xf32> to vector<8x512xf32>
    %46 = arith.mulf %43, %45 : vector<8x512xf32>
    %47 = arith.truncf %46 : vector<8x512xf32> to vector<8x512xbf16>
    %c16 = arith.constant 16 : index
    %c0_19 = arith.constant 0 : index
    %48 = vector.load %arg12[%c16, %c0_19] : memref<216x512xbf16, #tpu.memory_space<vmem>>, vector<8x512xbf16>
    tpu.vector_store %arg12[%c16, %c0_19], %47 {strides = array<i32>} : memref<216x512xbf16, #tpu.memory_space<vmem>>, vector<8x512xbf16>,
    %c65_i32 = arith.constant 65 : i32
    %49 = tpu.dynamic_rotate %30 by %c65_i32 dim 1 : vector<8x512xf32>, i32 -> vector<8x512xf32>
    %c3 = arith.constant 3 : index
    %c0_20 = arith.constant 0 : index
    %50 = vector.load %arg2[%c3, %c0_20] : memref<27x512xf32, #tpu.memory_space<vmem>>, vector<1x512xf32>
    %51 = vector.broadcast %50 : vector<1x512xf32> to vector<8x512xf32>
    %52 = arith.mulf %49, %51 : vector<8x512xf32>
    %53 = arith.truncf %52 : vector<8x512xf32> to vector<8x512xbf16>
    %c24 = arith.constant 24 : index
    %c0_21 = arith.constant 0 : index
    %54 = vector.load %arg12[%c24, %c0_21] : memref<216x512xbf16, #tpu.memory_space<vmem>>, vector<8x512xbf16>
    tpu.vector_store %arg12[%c24, %c0_21], %53 {strides = array<i32>} : memref<216x512xbf16, #tpu.memory_space<vmem>>, vector<8x512xbf16>,
    %c64_i32 = arith.constant 64 : i32
    %55 = tpu.dynamic_rotate %30 by %c64_i32 dim 1 : vector<8x512xf32>, i32 -> vector<8x512xf32>
    %c4 = arith.constant 4 : index
    %c0_22 = arith.constant 0 : index
    %56 = vector.load %arg2[%c4, %c0_22] : memref<27x512xf32, #tpu.memory_space<vmem>>, vector<1x512xf32>
    %57 = vector.broadcast %56 : vector<1x512xf32> to vector<8x512xf32>
    %58 = arith.mulf %55, %57 : vector<8x512xf32>
    %59 = arith.truncf %58 : vector<8x512xf32> to vector<8x512xbf16>
    %c32 = arith.constant 32 : index
    %c0_23 = arith.constant 0 : index
    %60 = vector.load %arg12[%c32, %c0_23] : memref<216x512xbf16, #tpu.memory_space<vmem>>, vector<8x512xbf16>
    tpu.vector_store %arg12[%c32, %c0_23], %59 {strides = array<i32>} : memref<216x512xbf16, #tpu.memory_space<vmem>>, vector<8x512xbf16>,
    %c63_i32 = arith.constant 63 : i32
    %61 = tpu.dynamic_rotate %30 by %c63_i32 dim 1 : vector<8x512xf32>, i32 -> vector<8x512xf32>
    %c5 = arith.constant 5 : index
    %c0_24 = arith.constant 0 : index
    %62 = vector.load %arg2[%c5, %c0_24] : memref<27x512xf32, #tpu.memory_space<vmem>>, vector<1x512xf32>
    %63 = vector.broadcast %62 : vector<1x512xf32> to vector<8x512xf32>
    %64 = arith.mulf %61, %63 : vector<8x512xf32>
    %65 = arith.truncf %64 : vector<8x512xf32> to vector<8x512xbf16>
    %c40 = arith.constant 40 : index
    %c0_25 = arith.constant 0 : index
    %66 = vector.load %arg12[%c40, %c0_25] : memref<216x512xbf16, #tpu.memory_space<vmem>>, vector<8x512xbf16>
    tpu.vector_store %arg12[%c40, %c0_25], %65 {strides = array<i32>} : memref<216x512xbf16, #tpu.memory_space<vmem>>, vector<8x512xbf16>,
    %c57_i32 = arith.constant 57 : i32
    %67 = tpu.dynamic_rotate %30 by %c57_i32 dim 1 : vector<8x512xf32>, i32 -> vector<8x512xf32>
    %c6 = arith.constant 6 : index
    %c0_26 = arith.constant 0 : index
    %68 = vector.load %arg2[%c6, %c0_26] : memref<27x512xf32, #tpu.memory_space<vmem>>, vector<1x512xf32>
    %69 = vector.broadcast %68 : vector<1x512xf32> to vector<8x512xf32>
    %70 = arith.mulf %67, %69 : vector<8x512xf32>
    %71 = arith.truncf %70 : vector<8x512xf32> to vector<8x512xbf16>
    %c48 = arith.constant 48 : index
    %c0_27 = arith.constant 0 : index
    %72 = vector.load %arg12[%c48, %c0_27] : memref<216x512xbf16, #tpu.memory_space<vmem>>, vector<8x512xbf16>
    tpu.vector_store %arg12[%c48, %c0_27], %71 {strides = array<i32>} : memref<216x512xbf16, #tpu.memory_space<vmem>>, vector<8x512xbf16>,
    %c56_i32 = arith.constant 56 : i32
    %73 = tpu.dynamic_rotate %30 by %c56_i32 dim 1 : vector<8x512xf32>, i32 -> vector<8x512xf32>
    %c7 = arith.constant 7 : index
    %c0_28 = arith.constant 0 : index
    %74 = vector.load %arg2[%c7, %c0_28] : memref<27x512xf32, #tpu.memory_space<vmem>>, vector<1x512xf32>
    %75 = vector.broadcast %74 : vector<1x512xf32> to vector<8x512xf32>
    %76 = arith.mulf %73, %75 : vector<8x512xf32>
    %77 = arith.truncf %76 : vector<8x512xf32> to vector<8x512xbf16>
    %c56 = arith.constant 56 : index
    %c0_29 = arith.constant 0 : index
    %78 = vector.load %arg12[%c56, %c0_29] : memref<216x512xbf16, #tpu.memory_space<vmem>>, vector<8x512xbf16>
    tpu.vector_store %arg12[%c56, %c0_29], %77 {strides = array<i32>} : memref<216x512xbf16, #tpu.memory_space<vmem>>, vector<8x512xbf16>,
    %c55_i32 = arith.constant 55 : i32
    %79 = tpu.dynamic_rotate %30 by %c55_i32 dim 1 : vector<8x512xf32>, i32 -> vector<8x512xf32>
    %c8_30 = arith.constant 8 : index
    %c0_31 = arith.constant 0 : index
    %80 = vector.load %arg2[%c8_30, %c0_31] : memref<27x512xf32, #tpu.memory_space<vmem>>, vector<1x512xf32>
    %81 = vector.broadcast %80 : vector<1x512xf32> to vector<8x512xf32>
    %82 = arith.mulf %79, %81 : vector<8x512xf32>
    %83 = arith.truncf %82 : vector<8x512xf32> to vector<8x512xbf16>
    %c64 = arith.constant 64 : index
    %c0_32 = arith.constant 0 : index
    %84 = vector.load %arg12[%c64, %c0_32] : memref<216x512xbf16, #tpu.memory_space<vmem>>, vector<8x512xbf16>
    tpu.vector_store %arg12[%c64, %c0_32], %83 {strides = array<i32>} : memref<216x512xbf16, #tpu.memory_space<vmem>>, vector<8x512xbf16>,
    %c9_i32 = arith.constant 9 : i32
    %85 = tpu.dynamic_rotate %30 by %c9_i32 dim 1 : vector<8x512xf32>, i32 -> vector<8x512xf32>
    %c9 = arith.constant 9 : index
    %c0_33 = arith.constant 0 : index
    %86 = vector.load %arg2[%c9, %c0_33] : memref<27x512xf32, #tpu.memory_space<vmem>>, vector<1x512xf32>
    %87 = vector.broadcast %86 : vector<1x512xf32> to vector<8x512xf32>
    %88 = arith.mulf %85, %87 : vector<8x512xf32>
    %89 = arith.truncf %88 : vector<8x512xf32> to vector<8x512xbf16>
    %c72 = arith.constant 72 : index
    %c0_34 = arith.constant 0 : index
    %90 = vector.load %arg12[%c72, %c0_34] : memref<216x512xbf16, #tpu.memory_space<vmem>>, vector<8x512xbf16>
    tpu.vector_store %arg12[%c72, %c0_34], %89 {strides = array<i32>} : memref<216x512xbf16, #tpu.memory_space<vmem>>, vector<8x512xbf16>,
    %c8_i32 = arith.constant 8 : i32
    %91 = tpu.dynamic_rotate %30 by %c8_i32 dim 1 : vector<8x512xf32>, i32 -> vector<8x512xf32>
    %c10 = arith.constant 10 : index
    %c0_35 = arith.constant 0 : index
    %92 = vector.load %arg2[%c10, %c0_35] : memref<27x512xf32, #tpu.memory_space<vmem>>, vector<1x512xf32>
    %93 = vector.broadcast %92 : vector<1x512xf32> to vector<8x512xf32>
    %94 = arith.mulf %91, %93 : vector<8x512xf32>
    %95 = arith.truncf %94 : vector<8x512xf32> to vector<8x512xbf16>
    %c80 = arith.constant 80 : index
    %c0_36 = arith.constant 0 : index
    %96 = vector.load %arg12[%c80, %c0_36] : memref<216x512xbf16, #tpu.memory_space<vmem>>, vector<8x512xbf16>
    tpu.vector_store %arg12[%c80, %c0_36], %95 {strides = array<i32>} : memref<216x512xbf16, #tpu.memory_space<vmem>>, vector<8x512xbf16>,
    %c7_i32 = arith.constant 7 : i32
    %97 = tpu.dynamic_rotate %30 by %c7_i32 dim 1 : vector<8x512xf32>, i32 -> vector<8x512xf32>
    %c11 = arith.constant 11 : index
    %c0_37 = arith.constant 0 : index
    %98 = vector.load %arg2[%c11, %c0_37] : memref<27x512xf32, #tpu.memory_space<vmem>>, vector<1x512xf32>
    %99 = vector.broadcast %98 : vector<1x512xf32> to vector<8x512xf32>
    %100 = arith.mulf %97, %99 : vector<8x512xf32>
    %101 = arith.truncf %100 : vector<8x512xf32> to vector<8x512xbf16>
    %c88 = arith.constant 88 : index
    %c0_38 = arith.constant 0 : index
    %102 = vector.load %arg12[%c88, %c0_38] : memref<216x512xbf16, #tpu.memory_space<vmem>>, vector<8x512xbf16>
    tpu.vector_store %arg12[%c88, %c0_38], %101 {strides = array<i32>} : memref<216x512xbf16, #tpu.memory_space<vmem>>, vector<8x512xbf16>,
    %c1_i32 = arith.constant 1 : i32
    %103 = tpu.dynamic_rotate %30 by %c1_i32 dim 1 : vector<8x512xf32>, i32 -> vector<8x512xf32>
    %c12 = arith.constant 12 : index
    %c0_39 = arith.constant 0 : index
    %104 = vector.load %arg2[%c12, %c0_39] : memref<27x512xf32, #tpu.memory_space<vmem>>, vector<1x512xf32>
    %105 = vector.broadcast %104 : vector<1x512xf32> to vector<8x512xf32>
    %106 = arith.mulf %103, %105 : vector<8x512xf32>
    %107 = arith.truncf %106 : vector<8x512xf32> to vector<8x512xbf16>
    %c96 = arith.constant 96 : index
    %c0_40 = arith.constant 0 : index
    %108 = vector.load %arg12[%c96, %c0_40] : memref<216x512xbf16, #tpu.memory_space<vmem>>, vector<8x512xbf16>
    tpu.vector_store %arg12[%c96, %c0_40], %107 {strides = array<i32>} : memref<216x512xbf16, #tpu.memory_space<vmem>>, vector<8x512xbf16>,
    %c13 = arith.constant 13 : index
    %c0_41 = arith.constant 0 : index
    %109 = vector.load %arg2[%c13, %c0_41] : memref<27x512xf32, #tpu.memory_space<vmem>>, vector<1x512xf32>
    %110 = vector.broadcast %109 : vector<1x512xf32> to vector<8x512xf32>
    %111 = arith.mulf %30, %110 : vector<8x512xf32>
    %112 = arith.truncf %111 : vector<8x512xf32> to vector<8x512xbf16>
    %c104 = arith.constant 104 : index
    %c0_42 = arith.constant 0 : index
    %113 = vector.load %arg12[%c104, %c0_42] : memref<216x512xbf16, #tpu.memory_space<vmem>>, vector<8x512xbf16>
    tpu.vector_store %arg12[%c104, %c0_42], %112 {strides = array<i32>} : memref<216x512xbf16, #tpu.memory_space<vmem>>, vector<8x512xbf16>,
    %c511_i32 = arith.constant 511 : i32
    %114 = tpu.dynamic_rotate %30 by %c511_i32 dim 1 : vector<8x512xf32>, i32 -> vector<8x512xf32>
    %c14 = arith.constant 14 : index
    %c0_43 = arith.constant 0 : index
    %115 = vector.load %arg2[%c14, %c0_43] : memref<27x512xf32, #tpu.memory_space<vmem>>, vector<1x512xf32>
    %116 = vector.broadcast %115 : vector<1x512xf32> to vector<8x512xf32>
    %117 = arith.mulf %114, %116 : vector<8x512xf32>
    %118 = arith.truncf %117 : vector<8x512xf32> to vector<8x512xbf16>
    %c112 = arith.constant 112 : index
    %c0_44 = arith.constant 0 : index
    %119 = vector.load %arg12[%c112, %c0_44] : memref<216x512xbf16, #tpu.memory_space<vmem>>, vector<8x512xbf16>
    tpu.vector_store %arg12[%c112, %c0_44], %118 {strides = array<i32>} : memref<216x512xbf16, #tpu.memory_space<vmem>>, vector<8x512xbf16>,
    %c505_i32 = arith.constant 505 : i32
    %120 = tpu.dynamic_rotate %30 by %c505_i32 dim 1 : vector<8x512xf32>, i32 -> vector<8x512xf32>
    %c15 = arith.constant 15 : index
    %c0_45 = arith.constant 0 : index
    %121 = vector.load %arg2[%c15, %c0_45] : memref<27x512xf32, #tpu.memory_space<vmem>>, vector<1x512xf32>
    %122 = vector.broadcast %121 : vector<1x512xf32> to vector<8x512xf32>
    %123 = arith.mulf %120, %122 : vector<8x512xf32>
    %124 = arith.truncf %123 : vector<8x512xf32> to vector<8x512xbf16>
    %c120 = arith.constant 120 : index
    %c0_46 = arith.constant 0 : index
    %125 = vector.load %arg12[%c120, %c0_46] : memref<216x512xbf16, #tpu.memory_space<vmem>>, vector<8x512xbf16>
    tpu.vector_store %arg12[%c120, %c0_46], %124 {strides = array<i32>} : memref<216x512xbf16, #tpu.memory_space<vmem>>, vector<8x512xbf16>,
    %c504_i32 = arith.constant 504 : i32
    %126 = tpu.dynamic_rotate %30 by %c504_i32 dim 1 : vector<8x512xf32>, i32 -> vector<8x512xf32>
    %c16_47 = arith.constant 16 : index
    %c0_48 = arith.constant 0 : index
    %127 = vector.load %arg2[%c16_47, %c0_48] : memref<27x512xf32, #tpu.memory_space<vmem>>, vector<1x512xf32>
    %128 = vector.broadcast %127 : vector<1x512xf32> to vector<8x512xf32>
    %129 = arith.mulf %126, %128 : vector<8x512xf32>
    %130 = arith.truncf %129 : vector<8x512xf32> to vector<8x512xbf16>
    %c128 = arith.constant 128 : index
    %c0_49 = arith.constant 0 : index
    %131 = vector.load %arg12[%c128, %c0_49] : memref<216x512xbf16, #tpu.memory_space<vmem>>, vector<8x512xbf16>
    tpu.vector_store %arg12[%c128, %c0_49], %130 {strides = array<i32>} : memref<216x512xbf16, #tpu.memory_space<vmem>>, vector<8x512xbf16>,
    %c503_i32 = arith.constant 503 : i32
    %132 = tpu.dynamic_rotate %30 by %c503_i32 dim 1 : vector<8x512xf32>, i32 -> vector<8x512xf32>
    %c17 = arith.constant 17 : index
    %c0_50 = arith.constant 0 : index
    %133 = vector.load %arg2[%c17, %c0_50] : memref<27x512xf32, #tpu.memory_space<vmem>>, vector<1x512xf32>
    %134 = vector.broadcast %133 : vector<1x512xf32> to vector<8x512xf32>
    %135 = arith.mulf %132, %134 : vector<8x512xf32>
    %136 = arith.truncf %135 : vector<8x512xf32> to vector<8x512xbf16>
    %c136 = arith.constant 136 : index
    %c0_51 = arith.constant 0 : index
    %137 = vector.load %arg12[%c136, %c0_51] : memref<216x512xbf16, #tpu.memory_space<vmem>>, vector<8x512xbf16>
    tpu.vector_store %arg12[%c136, %c0_51], %136 {strides = array<i32>} : memref<216x512xbf16, #tpu.memory_space<vmem>>, vector<8x512xbf16>,
    %c457_i32 = arith.constant 457 : i32
    %138 = tpu.dynamic_rotate %30 by %c457_i32 dim 1 : vector<8x512xf32>, i32 -> vector<8x512xf32>
    %c18 = arith.constant 18 : index
    %c0_52 = arith.constant 0 : index
    %139 = vector.load %arg2[%c18, %c0_52] : memref<27x512xf32, #tpu.memory_space<vmem>>, vector<1x512xf32>
    %140 = vector.broadcast %139 : vector<1x512xf32> to vector<8x512xf32>
    %141 = arith.mulf %138, %140 : vector<8x512xf32>
    %142 = arith.truncf %141 : vector<8x512xf32> to vector<8x512xbf16>
    %c144 = arith.constant 144 : index
    %c0_53 = arith.constant 0 : index
    %143 = vector.load %arg12[%c144, %c0_53] : memref<216x512xbf16, #tpu.memory_space<vmem>>, vector<8x512xbf16>
    tpu.vector_store %arg12[%c144, %c0_53], %142 {strides = array<i32>} : memref<216x512xbf16, #tpu.memory_space<vmem>>, vector<8x512xbf16>,
    %c456_i32 = arith.constant 456 : i32
    %144 = tpu.dynamic_rotate %30 by %c456_i32 dim 1 : vector<8x512xf32>, i32 -> vector<8x512xf32>
    %c19 = arith.constant 19 : index
    %c0_54 = arith.constant 0 : index
    %145 = vector.load %arg2[%c19, %c0_54] : memref<27x512xf32, #tpu.memory_space<vmem>>, vector<1x512xf32>
    %146 = vector.broadcast %145 : vector<1x512xf32> to vector<8x512xf32>
    %147 = arith.mulf %144, %146 : vector<8x512xf32>
    %148 = arith.truncf %147 : vector<8x512xf32> to vector<8x512xbf16>
    %c152 = arith.constant 152 : index
    %c0_55 = arith.constant 0 : index
    %149 = vector.load %arg12[%c152, %c0_55] : memref<216x512xbf16, #tpu.memory_space<vmem>>, vector<8x512xbf16>
    tpu.vector_store %arg12[%c152, %c0_55], %148 {strides = array<i32>} : memref<216x512xbf16, #tpu.memory_space<vmem>>, vector<8x512xbf16>,
    %c455_i32 = arith.constant 455 : i32
    %150 = tpu.dynamic_rotate %30 by %c455_i32 dim 1 : vector<8x512xf32>, i32 -> vector<8x512xf32>
    %c20 = arith.constant 20 : index
    %c0_56 = arith.constant 0 : index
    %151 = vector.load %arg2[%c20, %c0_56] : memref<27x512xf32, #tpu.memory_space<vmem>>, vector<1x512xf32>
    %152 = vector.broadcast %151 : vector<1x512xf32> to vector<8x512xf32>
    %153 = arith.mulf %150, %152 : vector<8x512xf32>
    %154 = arith.truncf %153 : vector<8x512xf32> to vector<8x512xbf16>
    %c160 = arith.constant 160 : index
    %c0_57 = arith.constant 0 : index
    %155 = vector.load %arg12[%c160, %c0_57] : memref<216x512xbf16, #tpu.memory_space<vmem>>, vector<8x512xbf16>
    tpu.vector_store %arg12[%c160, %c0_57], %154 {strides = array<i32>} : memref<216x512xbf16, #tpu.memory_space<vmem>>, vector<8x512xbf16>,
    %c449_i32 = arith.constant 449 : i32
    %156 = tpu.dynamic_rotate %30 by %c449_i32 dim 1 : vector<8x512xf32>, i32 -> vector<8x512xf32>
    %c21 = arith.constant 21 : index
    %c0_58 = arith.constant 0 : index
    %157 = vector.load %arg2[%c21, %c0_58] : memref<27x512xf32, #tpu.memory_space<vmem>>, vector<1x512xf32>
    %158 = vector.broadcast %157 : vector<1x512xf32> to vector<8x512xf32>
    %159 = arith.mulf %156, %158 : vector<8x512xf32>
    %160 = arith.truncf %159 : vector<8x512xf32> to vector<8x512xbf16>
    %c168 = arith.constant 168 : index
    %c0_59 = arith.constant 0 : index
    %161 = vector.load %arg12[%c168, %c0_59] : memref<216x512xbf16, #tpu.memory_space<vmem>>, vector<8x512xbf16>
    tpu.vector_store %arg12[%c168, %c0_59], %160 {strides = array<i32>} : memref<216x512xbf16, #tpu.memory_space<vmem>>, vector<8x512xbf16>,
    %c448_i32 = arith.constant 448 : i32
    %162 = tpu.dynamic_rotate %30 by %c448_i32 dim 1 : vector<8x512xf32>, i32 -> vector<8x512xf32>
    %c22 = arith.constant 22 : index
    %c0_60 = arith.constant 0 : index
    %163 = vector.load %arg2[%c22, %c0_60] : memref<27x512xf32, #tpu.memory_space<vmem>>, vector<1x512xf32>
    %164 = vector.broadcast %163 : vector<1x512xf32> to vector<8x512xf32>
    %165 = arith.mulf %162, %164 : vector<8x512xf32>
    %166 = arith.truncf %165 : vector<8x512xf32> to vector<8x512xbf16>
    %c176 = arith.constant 176 : index
    %c0_61 = arith.constant 0 : index
    %167 = vector.load %arg12[%c176, %c0_61] : memref<216x512xbf16, #tpu.memory_space<vmem>>, vector<8x512xbf16>
    tpu.vector_store %arg12[%c176, %c0_61], %166 {strides = array<i32>} : memref<216x512xbf16, #tpu.memory_space<vmem>>, vector<8x512xbf16>,
    %c447_i32 = arith.constant 447 : i32
    %168 = tpu.dynamic_rotate %30 by %c447_i32 dim 1 : vector<8x512xf32>, i32 -> vector<8x512xf32>
    %c23 = arith.constant 23 : index
    %c0_62 = arith.constant 0 : index
    %169 = vector.load %arg2[%c23, %c0_62] : memref<27x512xf32, #tpu.memory_space<vmem>>, vector<1x512xf32>
    %170 = vector.broadcast %169 : vector<1x512xf32> to vector<8x512xf32>
    %171 = arith.mulf %168, %170 : vector<8x512xf32>
    %172 = arith.truncf %171 : vector<8x512xf32> to vector<8x512xbf16>
    %c184 = arith.constant 184 : index
    %c0_63 = arith.constant 0 : index
    %173 = vector.load %arg12[%c184, %c0_63] : memref<216x512xbf16, #tpu.memory_space<vmem>>, vector<8x512xbf16>
    tpu.vector_store %arg12[%c184, %c0_63], %172 {strides = array<i32>} : memref<216x512xbf16, #tpu.memory_space<vmem>>, vector<8x512xbf16>,
    %c441_i32 = arith.constant 441 : i32
    %174 = tpu.dynamic_rotate %30 by %c441_i32 dim 1 : vector<8x512xf32>, i32 -> vector<8x512xf32>
    %c24_64 = arith.constant 24 : index
    %c0_65 = arith.constant 0 : index
    %175 = vector.load %arg2[%c24_64, %c0_65] : memref<27x512xf32, #tpu.memory_space<vmem>>, vector<1x512xf32>
    %176 = vector.broadcast %175 : vector<1x512xf32> to vector<8x512xf32>
    %177 = arith.mulf %174, %176 : vector<8x512xf32>
    %178 = arith.truncf %177 : vector<8x512xf32> to vector<8x512xbf16>
    %c192 = arith.constant 192 : index
    %c0_66 = arith.constant 0 : index
    %179 = vector.load %arg12[%c192, %c0_66] : memref<216x512xbf16, #tpu.memory_space<vmem>>, vector<8x512xbf16>
    tpu.vector_store %arg12[%c192, %c0_66], %178 {strides = array<i32>} : memref<216x512xbf16, #tpu.memory_space<vmem>>, vector<8x512xbf16>,
    %c440_i32 = arith.constant 440 : i32
    %180 = tpu.dynamic_rotate %30 by %c440_i32 dim 1 : vector<8x512xf32>, i32 -> vector<8x512xf32>
    %c25 = arith.constant 25 : index
    %c0_67 = arith.constant 0 : index
    %181 = vector.load %arg2[%c25, %c0_67] : memref<27x512xf32, #tpu.memory_space<vmem>>, vector<1x512xf32>
    %182 = vector.broadcast %181 : vector<1x512xf32> to vector<8x512xf32>
    %183 = arith.mulf %180, %182 : vector<8x512xf32>
    %184 = arith.truncf %183 : vector<8x512xf32> to vector<8x512xbf16>
    %c200 = arith.constant 200 : index
    %c0_68 = arith.constant 0 : index
    %185 = vector.load %arg12[%c200, %c0_68] : memref<216x512xbf16, #tpu.memory_space<vmem>>, vector<8x512xbf16>
    tpu.vector_store %arg12[%c200, %c0_68], %184 {strides = array<i32>} : memref<216x512xbf16, #tpu.memory_space<vmem>>, vector<8x512xbf16>,
    %c439_i32 = arith.constant 439 : i32
    %186 = tpu.dynamic_rotate %30 by %c439_i32 dim 1 : vector<8x512xf32>, i32 -> vector<8x512xf32>
    %c26 = arith.constant 26 : index
    %c0_69 = arith.constant 0 : index
    %187 = vector.load %arg2[%c26, %c0_69] : memref<27x512xf32, #tpu.memory_space<vmem>>, vector<1x512xf32>
    %188 = vector.broadcast %187 : vector<1x512xf32> to vector<8x512xf32>
    %189 = arith.mulf %186, %188 : vector<8x512xf32>
    %190 = arith.truncf %189 : vector<8x512xf32> to vector<8x512xbf16>
    %c208 = arith.constant 208 : index
    %c0_70 = arith.constant 0 : index
    %191 = vector.load %arg12[%c208, %c0_70] : memref<216x512xbf16, #tpu.memory_space<vmem>>, vector<8x512xbf16>
    tpu.vector_store %arg12[%c208, %c0_70], %190 {strides = array<i32>} : memref<216x512xbf16, #tpu.memory_space<vmem>>, vector<8x512xbf16>,
    %c0_71 = arith.constant 0 : index
    %c0_72 = arith.constant 0 : index
    %192 = vector.load %arg5[%c0_71, %c0_72] : memref<8x216xbf16, #tpu.memory_space<vmem>>, vector<8x216xbf16>
    %c0_73 = arith.constant 0 : index
    %c0_74 = arith.constant 0 : index
    %193 = vector.load %arg12[%c0_73, %c0_74] : memref<216x512xbf16, #tpu.memory_space<vmem>>, vector<216x512xbf16>
    %cst_75 = arith.constant dense<0.000000e+00> : vector<8x512xf32>
    %194 = tpu.matmul %192, %193, %cst_75 {dimension_numbers = #tpu.dot_dimension_numbers<[1], [0], [0], [1], [0, 0, 1, 1], [], []>} : vector<8x216xbf16>, vector<216x512xbf16>, vector<8x512xf32> -> vector<8x512xf32>
    %c0_76 = arith.constant 0 : index
    %c0_77 = arith.constant 0 : index
    %195 = vector.load %arg6[%c0_76, %c0_77] : memref<8x1xf32, #tpu.memory_space<vmem>>, vector<8x1xf32>
    %196 = vector.broadcast %195 : vector<8x1xf32> to vector<8x512xf32>
    %197 = arith.addf %194, %196 : vector<8x512xf32>
    %cst_78 = arith.constant dense<0.000000e+00> : vector<8xf32>
    %198 = vector.multi_reduction <add>, %197, %cst_78 [1] : vector<8x512xf32> to vector<8xf32>
    %199 = vector.shape_cast %198 : vector<8xf32> to vector<8x1xf32>
    %200 = arith.mulf %197, %197 : vector<8x512xf32>
    %cst_79 = arith.constant dense<0.000000e+00> : vector<8xf32>
    %201 = vector.multi_reduction <add>, %200, %cst_79 [1] : vector<8x512xf32> to vector<8xf32>
    %202 = vector.shape_cast %201 : vector<8xf32> to vector<8x1xf32>
    %cst_80 = arith.constant 0.001953125 : f32
    %203 = vector.broadcast %cst_80 : f32 to vector<8x1xf32>
    %204 = arith.mulf %199, %203 : vector<8x1xf32>
    %cst_81 = arith.constant 0.001953125 : f32
    %205 = vector.broadcast %cst_81 : f32 to vector<8x1xf32>
    %206 = arith.mulf %202, %205 : vector<8x1xf32>
    %207 = arith.mulf %204, %204 : vector<8x1xf32>
    %208 = arith.subf %206, %207 : vector<8x1xf32>
    %209 = vector.broadcast %204 : vector<8x1xf32> to vector<8x512xf32>
    %210 = arith.subf %197, %209 : vector<8x512xf32>
    %cst_82 = arith.constant 9.99999974E-6 : f32
    %211 = vector.broadcast %cst_82 : f32 to vector<8x1xf32>
    %212 = arith.addf %208, %211 : vector<8x1xf32>
    %213 = math.rsqrt %212 : vector<8x1xf32>
    %214 = vector.broadcast %213 : vector<8x1xf32> to vector<8x512xf32>
    %215 = arith.mulf %210, %214 : vector<8x512xf32>
    %c0_83 = arith.constant 0 : index
    %c0_84 = arith.constant 0 : index
    %216 = vector.load %arg7[%c0_83, %c0_84] : memref<8x1xf32, #tpu.memory_space<vmem>>, vector<8x1xf32>
    %217 = vector.broadcast %216 : vector<8x1xf32> to vector<8x512xf32>
    %218 = arith.mulf %215, %217 : vector<8x512xf32>
    %c0_85 = arith.constant 0 : index
    %c0_86 = arith.constant 0 : index
    %219 = vector.load %arg8[%c0_85, %c0_86] : memref<8x1xf32, #tpu.memory_space<vmem>>, vector<8x1xf32>
    %220 = vector.broadcast %219 : vector<8x1xf32> to vector<8x512xf32>
    %221 = arith.addf %218, %220 : vector<8x512xf32>
    %cst_87 = arith.constant 0.000000e+00 : f32
    %222 = vector.broadcast %cst_87 : f32 to vector<8x512xf32>
    %223 = arith.cmpf oge, %221, %222 : vector<8x512xf32>
    %cst_88 = arith.constant 0.00999999977 : f32
    %224 = vector.broadcast %cst_88 : f32 to vector<8x512xf32>
    %225 = arith.mulf %224, %221 : vector<8x512xf32>
    %226 = arith.select %223, %221, %225 : vector<8x512xi1>, vector<8x512xf32>
    %c73_i32_89 = arith.constant 73 : i32
    %227 = tpu.dynamic_rotate %226 by %c73_i32_89 dim 1 : vector<8x512xf32>, i32 -> vector<8x512xf32>
    %c0_90 = arith.constant 0 : index
    %c0_91 = arith.constant 0 : index
    %228 = vector.load %arg2[%c0_90, %c0_91] : memref<27x512xf32, #tpu.memory_space<vmem>>, vector<1x512xf32>
    %229 = vector.broadcast %228 : vector<1x512xf32> to vector<8x512xf32>
    %230 = arith.mulf %227, %229 : vector<8x512xf32>
    %231 = arith.truncf %230 : vector<8x512xf32> to vector<8x512xbf16>
    %c0_92 = arith.constant 0 : index
    %c0_93 = arith.constant 0 : index
    %232 = vector.load %arg12[%c0_92, %c0_93] : memref<216x512xbf16, #tpu.memory_space<vmem>>, vector<8x512xbf16>
    tpu.vector_store %arg12[%c0_92, %c0_93], %231 {strides = array<i32>} : memref<216x512xbf16, #tpu.memory_space<vmem>>, vector<8x512xbf16>,
    %c72_i32_94 = arith.constant 72 : i32
    %233 = tpu.dynamic_rotate %226 by %c72_i32_94 dim 1 : vector<8x512xf32>, i32 -> vector<8x512xf32>
    %c1_95 = arith.constant 1 : index
    %c0_96 = arith.constant 0 : index
    %234 = vector.load %arg2[%c1_95, %c0_96] : memref<27x512xf32, #tpu.memory_space<vmem>>, vector<1x512xf32>
    %235 = vector.broadcast %234 : vector<1x512xf32> to vector<8x512xf32>
    %236 = arith.mulf %233, %235 : vector<8x512xf32>
    %237 = arith.truncf %236 : vector<8x512xf32> to vector<8x512xbf16>
    %c8_97 = arith.constant 8 : index
    %c0_98 = arith.constant 0 : index
    %238 = vector.load %arg12[%c8_97, %c0_98] : memref<216x512xbf16, #tpu.memory_space<vmem>>, vector<8x512xbf16>
    tpu.vector_store %arg12[%c8_97, %c0_98], %237 {strides = array<i32>} : memref<216x512xbf16, #tpu.memory_space<vmem>>, vector<8x512xbf16>,
    %c71_i32_99 = arith.constant 71 : i32
    %239 = tpu.dynamic_rotate %226 by %c71_i32_99 dim 1 : vector<8x512xf32>, i32 -> vector<8x512xf32>
    %c2_100 = arith.constant 2 : index
    %c0_101 = arith.constant 0 : index
    %240 = vector.load %arg2[%c2_100, %c0_101] : memref<27x512xf32, #tpu.memory_space<vmem>>, vector<1x512xf32>
    %241 = vector.broadcast %240 : vector<1x512xf32> to vector<8x512xf32>
    %242 = arith.mulf %239, %241 : vector<8x512xf32>
    %243 = arith.truncf %242 : vector<8x512xf32> to vector<8x512xbf16>
    %c16_102 = arith.constant 16 : index
    %c0_103 = arith.constant 0 : index
    %244 = vector.load %arg12[%c16_102, %c0_103] : memref<216x512xbf16, #tpu.memory_space<vmem>>, vector<8x512xbf16>
    tpu.vector_store %arg12[%c16_102, %c0_103], %243 {strides = array<i32>} : memref<216x512xbf16, #tpu.memory_space<vmem>>, vector<8x512xbf16>,
    %c65_i32_104 = arith.constant 65 : i32
    %245 = tpu.dynamic_rotate %226 by %c65_i32_104 dim 1 : vector<8x512xf32>, i32 -> vector<8x512xf32>
    %c3_105 = arith.constant 3 : index
    %c0_106 = arith.constant 0 : index
    %246 = vector.load %arg2[%c3_105, %c0_106] : memref<27x512xf32, #tpu.memory_space<vmem>>, vector<1x512xf32>
    %247 = vector.broadcast %246 : vector<1x512xf32> to vector<8x512xf32>
    %248 = arith.mulf %245, %247 : vector<8x512xf32>
    %249 = arith.truncf %248 : vector<8x512xf32> to vector<8x512xbf16>
    %c24_107 = arith.constant 24 : index
    %c0_108 = arith.constant 0 : index
    %250 = vector.load %arg12[%c24_107, %c0_108] : memref<216x512xbf16, #tpu.memory_space<vmem>>, vector<8x512xbf16>
    tpu.vector_store %arg12[%c24_107, %c0_108], %249 {strides = array<i32>} : memref<216x512xbf16, #tpu.memory_space<vmem>>, vector<8x512xbf16>,
    %c64_i32_109 = arith.constant 64 : i32
    %251 = tpu.dynamic_rotate %226 by %c64_i32_109 dim 1 : vector<8x512xf32>, i32 -> vector<8x512xf32>
    %c4_110 = arith.constant 4 : index
    %c0_111 = arith.constant 0 : index
    %252 = vector.load %arg2[%c4_110, %c0_111] : memref<27x512xf32, #tpu.memory_space<vmem>>, vector<1x512xf32>
    %253 = vector.broadcast %252 : vector<1x512xf32> to vector<8x512xf32>
    %254 = arith.mulf %251, %253 : vector<8x512xf32>
    %255 = arith.truncf %254 : vector<8x512xf32> to vector<8x512xbf16>
    %c32_112 = arith.constant 32 : index
    %c0_113 = arith.constant 0 : index
    %256 = vector.load %arg12[%c32_112, %c0_113] : memref<216x512xbf16, #tpu.memory_space<vmem>>, vector<8x512xbf16>
    tpu.vector_store %arg12[%c32_112, %c0_113], %255 {strides = array<i32>} : memref<216x512xbf16, #tpu.memory_space<vmem>>, vector<8x512xbf16>,
    %c63_i32_114 = arith.constant 63 : i32
    %257 = tpu.dynamic_rotate %226 by %c63_i32_114 dim 1 : vector<8x512xf32>, i32 -> vector<8x512xf32>
    %c5_115 = arith.constant 5 : index
    %c0_116 = arith.constant 0 : index
    %258 = vector.load %arg2[%c5_115, %c0_116] : memref<27x512xf32, #tpu.memory_space<vmem>>, vector<1x512xf32>
    %259 = vector.broadcast %258 : vector<1x512xf32> to vector<8x512xf32>
    %260 = arith.mulf %257, %259 : vector<8x512xf32>
    %261 = arith.truncf %260 : vector<8x512xf32> to vector<8x512xbf16>
    %c40_117 = arith.constant 40 : index
    %c0_118 = arith.constant 0 : index
    %262 = vector.load %arg12[%c40_117, %c0_118] : memref<216x512xbf16, #tpu.memory_space<vmem>>, vector<8x512xbf16>
    tpu.vector_store %arg12[%c40_117, %c0_118], %261 {strides = array<i32>} : memref<216x512xbf16, #tpu.memory_space<vmem>>, vector<8x512xbf16>,
    %c57_i32_119 = arith.constant 57 : i32
    %263 = tpu.dynamic_rotate %226 by %c57_i32_119 dim 1 : vector<8x512xf32>, i32 -> vector<8x512xf32>
    %c6_120 = arith.constant 6 : index
    %c0_121 = arith.constant 0 : index
    %264 = vector.load %arg2[%c6_120, %c0_121] : memref<27x512xf32, #tpu.memory_space<vmem>>, vector<1x512xf32>
    %265 = vector.broadcast %264 : vector<1x512xf32> to vector<8x512xf32>
    %266 = arith.mulf %263, %265 : vector<8x512xf32>
    %267 = arith.truncf %266 : vector<8x512xf32> to vector<8x512xbf16>
    %c48_122 = arith.constant 48 : index
    %c0_123 = arith.constant 0 : index
    %268 = vector.load %arg12[%c48_122, %c0_123] : memref<216x512xbf16, #tpu.memory_space<vmem>>, vector<8x512xbf16>
    tpu.vector_store %arg12[%c48_122, %c0_123], %267 {strides = array<i32>} : memref<216x512xbf16, #tpu.memory_space<vmem>>, vector<8x512xbf16>,
    %c56_i32_124 = arith.constant 56 : i32
    %269 = tpu.dynamic_rotate %226 by %c56_i32_124 dim 1 : vector<8x512xf32>, i32 -> vector<8x512xf32>
    %c7_125 = arith.constant 7 : index
    %c0_126 = arith.constant 0 : index
    %270 = vector.load %arg2[%c7_125, %c0_126] : memref<27x512xf32, #tpu.memory_space<vmem>>, vector<1x512xf32>
    %271 = vector.broadcast %270 : vector<1x512xf32> to vector<8x512xf32>
    %272 = arith.mulf %269, %271 : vector<8x512xf32>
    %273 = arith.truncf %272 : vector<8x512xf32> to vector<8x512xbf16>
    %c56_127 = arith.constant 56 : index
    %c0_128 = arith.constant 0 : index
    %274 = vector.load %arg12[%c56_127, %c0_128] : memref<216x512xbf16, #tpu.memory_space<vmem>>, vector<8x512xbf16>
    tpu.vector_store %arg12[%c56_127, %c0_128], %273 {strides = array<i32>} : memref<216x512xbf16, #tpu.memory_space<vmem>>, vector<8x512xbf16>,
    %c55_i32_129 = arith.constant 55 : i32
    %275 = tpu.dynamic_rotate %226 by %c55_i32_129 dim 1 : vector<8x512xf32>, i32 -> vector<8x512xf32>
    %c8_130 = arith.constant 8 : index
    %c0_131 = arith.constant 0 : index
    %276 = vector.load %arg2[%c8_130, %c0_131] : memref<27x512xf32, #tpu.memory_space<vmem>>, vector<1x512xf32>
    %277 = vector.broadcast %276 : vector<1x512xf32> to vector<8x512xf32>
    %278 = arith.mulf %275, %277 : vector<8x512xf32>
    %279 = arith.truncf %278 : vector<8x512xf32> to vector<8x512xbf16>
    %c64_132 = arith.constant 64 : index
    %c0_133 = arith.constant 0 : index
    %280 = vector.load %arg12[%c64_132, %c0_133] : memref<216x512xbf16, #tpu.memory_space<vmem>>, vector<8x512xbf16>
    tpu.vector_store %arg12[%c64_132, %c0_133], %279 {strides = array<i32>} : memref<216x512xbf16, #tpu.memory_space<vmem>>, vector<8x512xbf16>,
    %c9_i32_134 = arith.constant 9 : i32
    %281 = tpu.dynamic_rotate %226 by %c9_i32_134 dim 1 : vector<8x512xf32>, i32 -> vector<8x512xf32>
    %c9_135 = arith.constant 9 : index
    %c0_136 = arith.constant 0 : index
    %282 = vector.load %arg2[%c9_135, %c0_136] : memref<27x512xf32, #tpu.memory_space<vmem>>, vector<1x512xf32>
    %283 = vector.broadcast %282 : vector<1x512xf32> to vector<8x512xf32>
    %284 = arith.mulf %281, %283 : vector<8x512xf32>
    %285 = arith.truncf %284 : vector<8x512xf32> to vector<8x512xbf16>
    %c72_137 = arith.constant 72 : index
    %c0_138 = arith.constant 0 : index
    %286 = vector.load %arg12[%c72_137, %c0_138] : memref<216x512xbf16, #tpu.memory_space<vmem>>, vector<8x512xbf16>
    tpu.vector_store %arg12[%c72_137, %c0_138], %285 {strides = array<i32>} : memref<216x512xbf16, #tpu.memory_space<vmem>>, vector<8x512xbf16>,
    %c8_i32_139 = arith.constant 8 : i32
    %287 = tpu.dynamic_rotate %226 by %c8_i32_139 dim 1 : vector<8x512xf32>, i32 -> vector<8x512xf32>
    %c10_140 = arith.constant 10 : index
    %c0_141 = arith.constant 0 : index
    %288 = vector.load %arg2[%c10_140, %c0_141] : memref<27x512xf32, #tpu.memory_space<vmem>>, vector<1x512xf32>
    %289 = vector.broadcast %288 : vector<1x512xf32> to vector<8x512xf32>
    %290 = arith.mulf %287, %289 : vector<8x512xf32>
    %291 = arith.truncf %290 : vector<8x512xf32> to vector<8x512xbf16>
    %c80_142 = arith.constant 80 : index
    %c0_143 = arith.constant 0 : index
    %292 = vector.load %arg12[%c80_142, %c0_143] : memref<216x512xbf16, #tpu.memory_space<vmem>>, vector<8x512xbf16>
    tpu.vector_store %arg12[%c80_142, %c0_143], %291 {strides = array<i32>} : memref<216x512xbf16, #tpu.memory_space<vmem>>, vector<8x512xbf16>,
    %c7_i32_144 = arith.constant 7 : i32
    %293 = tpu.dynamic_rotate %226 by %c7_i32_144 dim 1 : vector<8x512xf32>, i32 -> vector<8x512xf32>
    %c11_145 = arith.constant 11 : index
    %c0_146 = arith.constant 0 : index
    %294 = vector.load %arg2[%c11_145, %c0_146] : memref<27x512xf32, #tpu.memory_space<vmem>>, vector<1x512xf32>
    %295 = vector.broadcast %294 : vector<1x512xf32> to vector<8x512xf32>
    %296 = arith.mulf %293, %295 : vector<8x512xf32>
    %297 = arith.truncf %296 : vector<8x512xf32> to vector<8x512xbf16>
    %c88_147 = arith.constant 88 : index
    %c0_148 = arith.constant 0 : index
    %298 = vector.load %arg12[%c88_147, %c0_148] : memref<216x512xbf16, #tpu.memory_space<vmem>>, vector<8x512xbf16>
    tpu.vector_store %arg12[%c88_147, %c0_148], %297 {strides = array<i32>} : memref<216x512xbf16, #tpu.memory_space<vmem>>, vector<8x512xbf16>,
    %c1_i32_149 = arith.constant 1 : i32
    %299 = tpu.dynamic_rotate %226 by %c1_i32_149 dim 1 : vector<8x512xf32>, i32 -> vector<8x512xf32>
    %c12_150 = arith.constant 12 : index
    %c0_151 = arith.constant 0 : index
    %300 = vector.load %arg2[%c12_150, %c0_151] : memref<27x512xf32, #tpu.memory_space<vmem>>, vector<1x512xf32>
    %301 = vector.broadcast %300 : vector<1x512xf32> to vector<8x512xf32>
    %302 = arith.mulf %299, %301 : vector<8x512xf32>
    %303 = arith.truncf %302 : vector<8x512xf32> to vector<8x512xbf16>
    %c96_152 = arith.constant 96 : index
    %c0_153 = arith.constant 0 : index
    %304 = vector.load %arg12[%c96_152, %c0_153] : memref<216x512xbf16, #tpu.memory_space<vmem>>, vector<8x512xbf16>
    tpu.vector_store %arg12[%c96_152, %c0_153], %303 {strides = array<i32>} : memref<216x512xbf16, #tpu.memory_space<vmem>>, vector<8x512xbf16>,
    %c13_154 = arith.constant 13 : index
    %c0_155 = arith.constant 0 : index
    %305 = vector.load %arg2[%c13_154, %c0_155] : memref<27x512xf32, #tpu.memory_space<vmem>>, vector<1x512xf32>
    %306 = vector.broadcast %305 : vector<1x512xf32> to vector<8x512xf32>
    %307 = arith.mulf %226, %306 : vector<8x512xf32>
    %308 = arith.truncf %307 : vector<8x512xf32> to vector<8x512xbf16>
    %c104_156 = arith.constant 104 : index
    %c0_157 = arith.constant 0 : index
    %309 = vector.load %arg12[%c104_156, %c0_157] : memref<216x512xbf16, #tpu.memory_space<vmem>>, vector<8x512xbf16>
    tpu.vector_store %arg12[%c104_156, %c0_157], %308 {strides = array<i32>} : memref<216x512xbf16, #tpu.memory_space<vmem>>, vector<8x512xbf16>,
    %c511_i32_158 = arith.constant 511 : i32
    %310 = tpu.dynamic_rotate %226 by %c511_i32_158 dim 1 : vector<8x512xf32>, i32 -> vector<8x512xf32>
    %c14_159 = arith.constant 14 : index
    %c0_160 = arith.constant 0 : index
    %311 = vector.load %arg2[%c14_159, %c0_160] : memref<27x512xf32, #tpu.memory_space<vmem>>, vector<1x512xf32>
    %312 = vector.broadcast %311 : vector<1x512xf32> to vector<8x512xf32>
    %313 = arith.mulf %310, %312 : vector<8x512xf32>
    %314 = arith.truncf %313 : vector<8x512xf32> to vector<8x512xbf16>
    %c112_161 = arith.constant 112 : index
    %c0_162 = arith.constant 0 : index
    %315 = vector.load %arg12[%c112_161, %c0_162] : memref<216x512xbf16, #tpu.memory_space<vmem>>, vector<8x512xbf16>
    tpu.vector_store %arg12[%c112_161, %c0_162], %314 {strides = array<i32>} : memref<216x512xbf16, #tpu.memory_space<vmem>>, vector<8x512xbf16>,
    %c505_i32_163 = arith.constant 505 : i32
    %316 = tpu.dynamic_rotate %226 by %c505_i32_163 dim 1 : vector<8x512xf32>, i32 -> vector<8x512xf32>
    %c15_164 = arith.constant 15 : index
    %c0_165 = arith.constant 0 : index
    %317 = vector.load %arg2[%c15_164, %c0_165] : memref<27x512xf32, #tpu.memory_space<vmem>>, vector<1x512xf32>
    %318 = vector.broadcast %317 : vector<1x512xf32> to vector<8x512xf32>
    %319 = arith.mulf %316, %318 : vector<8x512xf32>
    %320 = arith.truncf %319 : vector<8x512xf32> to vector<8x512xbf16>
    %c120_166 = arith.constant 120 : index
    %c0_167 = arith.constant 0 : index
    %321 = vector.load %arg12[%c120_166, %c0_167] : memref<216x512xbf16, #tpu.memory_space<vmem>>, vector<8x512xbf16>
    tpu.vector_store %arg12[%c120_166, %c0_167], %320 {strides = array<i32>} : memref<216x512xbf16, #tpu.memory_space<vmem>>, vector<8x512xbf16>,
    %c504_i32_168 = arith.constant 504 : i32
    %322 = tpu.dynamic_rotate %226 by %c504_i32_168 dim 1 : vector<8x512xf32>, i32 -> vector<8x512xf32>
    %c16_169 = arith.constant 16 : index
    %c0_170 = arith.constant 0 : index
    %323 = vector.load %arg2[%c16_169, %c0_170] : memref<27x512xf32, #tpu.memory_space<vmem>>, vector<1x512xf32>
    %324 = vector.broadcast %323 : vector<1x512xf32> to vector<8x512xf32>
    %325 = arith.mulf %322, %324 : vector<8x512xf32>
    %326 = arith.truncf %325 : vector<8x512xf32> to vector<8x512xbf16>
    %c128_171 = arith.constant 128 : index
    %c0_172 = arith.constant 0 : index
    %327 = vector.load %arg12[%c128_171, %c0_172] : memref<216x512xbf16, #tpu.memory_space<vmem>>, vector<8x512xbf16>
    tpu.vector_store %arg12[%c128_171, %c0_172], %326 {strides = array<i32>} : memref<216x512xbf16, #tpu.memory_space<vmem>>, vector<8x512xbf16>,
    %c503_i32_173 = arith.constant 503 : i32
    %328 = tpu.dynamic_rotate %226 by %c503_i32_173 dim 1 : vector<8x512xf32>, i32 -> vector<8x512xf32>
    %c17_174 = arith.constant 17 : index
    %c0_175 = arith.constant 0 : index
    %329 = vector.load %arg2[%c17_174, %c0_175] : memref<27x512xf32, #tpu.memory_space<vmem>>, vector<1x512xf32>
    %330 = vector.broadcast %329 : vector<1x512xf32> to vector<8x512xf32>
    %331 = arith.mulf %328, %330 : vector<8x512xf32>
    %332 = arith.truncf %331 : vector<8x512xf32> to vector<8x512xbf16>
    %c136_176 = arith.constant 136 : index
    %c0_177 = arith.constant 0 : index
    %333 = vector.load %arg12[%c136_176, %c0_177] : memref<216x512xbf16, #tpu.memory_space<vmem>>, vector<8x512xbf16>
    tpu.vector_store %arg12[%c136_176, %c0_177], %332 {strides = array<i32>} : memref<216x512xbf16, #tpu.memory_space<vmem>>, vector<8x512xbf16>,
    %c457_i32_178 = arith.constant 457 : i32
    %334 = tpu.dynamic_rotate %226 by %c457_i32_178 dim 1 : vector<8x512xf32>, i32 -> vector<8x512xf32>
    %c18_179 = arith.constant 18 : index
    %c0_180 = arith.constant 0 : index
    %335 = vector.load %arg2[%c18_179, %c0_180] : memref<27x512xf32, #tpu.memory_space<vmem>>, vector<1x512xf32>
    %336 = vector.broadcast %335 : vector<1x512xf32> to vector<8x512xf32>
    %337 = arith.mulf %334, %336 : vector<8x512xf32>
    %338 = arith.truncf %337 : vector<8x512xf32> to vector<8x512xbf16>
    %c144_181 = arith.constant 144 : index
    %c0_182 = arith.constant 0 : index
    %339 = vector.load %arg12[%c144_181, %c0_182] : memref<216x512xbf16, #tpu.memory_space<vmem>>, vector<8x512xbf16>
    tpu.vector_store %arg12[%c144_181, %c0_182], %338 {strides = array<i32>} : memref<216x512xbf16, #tpu.memory_space<vmem>>, vector<8x512xbf16>,
    %c456_i32_183 = arith.constant 456 : i32
    %340 = tpu.dynamic_rotate %226 by %c456_i32_183 dim 1 : vector<8x512xf32>, i32 -> vector<8x512xf32>
    %c19_184 = arith.constant 19 : index
    %c0_185 = arith.constant 0 : index
    %341 = vector.load %arg2[%c19_184, %c0_185] : memref<27x512xf32, #tpu.memory_space<vmem>>, vector<1x512xf32>
    %342 = vector.broadcast %341 : vector<1x512xf32> to vector<8x512xf32>
    %343 = arith.mulf %340, %342 : vector<8x512xf32>
    %344 = arith.truncf %343 : vector<8x512xf32> to vector<8x512xbf16>
    %c152_186 = arith.constant 152 : index
    %c0_187 = arith.constant 0 : index
    %345 = vector.load %arg12[%c152_186, %c0_187] : memref<216x512xbf16, #tpu.memory_space<vmem>>, vector<8x512xbf16>
    tpu.vector_store %arg12[%c152_186, %c0_187], %344 {strides = array<i32>} : memref<216x512xbf16, #tpu.memory_space<vmem>>, vector<8x512xbf16>,
    %c455_i32_188 = arith.constant 455 : i32
    %346 = tpu.dynamic_rotate %226 by %c455_i32_188 dim 1 : vector<8x512xf32>, i32 -> vector<8x512xf32>
    %c20_189 = arith.constant 20 : index
    %c0_190 = arith.constant 0 : index
    %347 = vector.load %arg2[%c20_189, %c0_190] : memref<27x512xf32, #tpu.memory_space<vmem>>, vector<1x512xf32>
    %348 = vector.broadcast %347 : vector<1x512xf32> to vector<8x512xf32>
    %349 = arith.mulf %346, %348 : vector<8x512xf32>
    %350 = arith.truncf %349 : vector<8x512xf32> to vector<8x512xbf16>
    %c160_191 = arith.constant 160 : index
    %c0_192 = arith.constant 0 : index
    %351 = vector.load %arg12[%c160_191, %c0_192] : memref<216x512xbf16, #tpu.memory_space<vmem>>, vector<8x512xbf16>
    tpu.vector_store %arg12[%c160_191, %c0_192], %350 {strides = array<i32>} : memref<216x512xbf16, #tpu.memory_space<vmem>>, vector<8x512xbf16>,
    %c449_i32_193 = arith.constant 449 : i32
    %352 = tpu.dynamic_rotate %226 by %c449_i32_193 dim 1 : vector<8x512xf32>, i32 -> vector<8x512xf32>
    %c21_194 = arith.constant 21 : index
    %c0_195 = arith.constant 0 : index
    %353 = vector.load %arg2[%c21_194, %c0_195] : memref<27x512xf32, #tpu.memory_space<vmem>>, vector<1x512xf32>
    %354 = vector.broadcast %353 : vector<1x512xf32> to vector<8x512xf32>
    %355 = arith.mulf %352, %354 : vector<8x512xf32>
    %356 = arith.truncf %355 : vector<8x512xf32> to vector<8x512xbf16>
    %c168_196 = arith.constant 168 : index
    %c0_197 = arith.constant 0 : index
    %357 = vector.load %arg12[%c168_196, %c0_197] : memref<216x512xbf16, #tpu.memory_space<vmem>>, vector<8x512xbf16>
    tpu.vector_store %arg12[%c168_196, %c0_197], %356 {strides = array<i32>} : memref<216x512xbf16, #tpu.memory_space<vmem>>, vector<8x512xbf16>,
    %c448_i32_198 = arith.constant 448 : i32
    %358 = tpu.dynamic_rotate %226 by %c448_i32_198 dim 1 : vector<8x512xf32>, i32 -> vector<8x512xf32>
    %c22_199 = arith.constant 22 : index
    %c0_200 = arith.constant 0 : index
    %359 = vector.load %arg2[%c22_199, %c0_200] : memref<27x512xf32, #tpu.memory_space<vmem>>, vector<1x512xf32>
    %360 = vector.broadcast %359 : vector<1x512xf32> to vector<8x512xf32>
    %361 = arith.mulf %358, %360 : vector<8x512xf32>
    %362 = arith.truncf %361 : vector<8x512xf32> to vector<8x512xbf16>
    %c176_201 = arith.constant 176 : index
    %c0_202 = arith.constant 0 : index
    %363 = vector.load %arg12[%c176_201, %c0_202] : memref<216x512xbf16, #tpu.memory_space<vmem>>, vector<8x512xbf16>
    tpu.vector_store %arg12[%c176_201, %c0_202], %362 {strides = array<i32>} : memref<216x512xbf16, #tpu.memory_space<vmem>>, vector<8x512xbf16>,
    %c447_i32_203 = arith.constant 447 : i32
    %364 = tpu.dynamic_rotate %226 by %c447_i32_203 dim 1 : vector<8x512xf32>, i32 -> vector<8x512xf32>
    %c23_204 = arith.constant 23 : index
    %c0_205 = arith.constant 0 : index
    %365 = vector.load %arg2[%c23_204, %c0_205] : memref<27x512xf32, #tpu.memory_space<vmem>>, vector<1x512xf32>
    %366 = vector.broadcast %365 : vector<1x512xf32> to vector<8x512xf32>
    %367 = arith.mulf %364, %366 : vector<8x512xf32>
    %368 = arith.truncf %367 : vector<8x512xf32> to vector<8x512xbf16>
    %c184_206 = arith.constant 184 : index
    %c0_207 = arith.constant 0 : index
    %369 = vector.load %arg12[%c184_206, %c0_207] : memref<216x512xbf16, #tpu.memory_space<vmem>>, vector<8x512xbf16>
    tpu.vector_store %arg12[%c184_206, %c0_207], %368 {strides = array<i32>} : memref<216x512xbf16, #tpu.memory_space<vmem>>, vector<8x512xbf16>,
    %c441_i32_208 = arith.constant 441 : i32
    %370 = tpu.dynamic_rotate %226 by %c441_i32_208 dim 1 : vector<8x512xf32>, i32 -> vector<8x512xf32>
    %c24_209 = arith.constant 24 : index
    %c0_210 = arith.constant 0 : index
    %371 = vector.load %arg2[%c24_209, %c0_210] : memref<27x512xf32, #tpu.memory_space<vmem>>, vector<1x512xf32>
    %372 = vector.broadcast %371 : vector<1x512xf32> to vector<8x512xf32>
    %373 = arith.mulf %370, %372 : vector<8x512xf32>
    %374 = arith.truncf %373 : vector<8x512xf32> to vector<8x512xbf16>
    %c192_211 = arith.constant 192 : index
    %c0_212 = arith.constant 0 : index
    %375 = vector.load %arg12[%c192_211, %c0_212] : memref<216x512xbf16, #tpu.memory_space<vmem>>, vector<8x512xbf16>
    tpu.vector_store %arg12[%c192_211, %c0_212], %374 {strides = array<i32>} : memref<216x512xbf16, #tpu.memory_space<vmem>>, vector<8x512xbf16>,
    %c440_i32_213 = arith.constant 440 : i32
    %376 = tpu.dynamic_rotate %226 by %c440_i32_213 dim 1 : vector<8x512xf32>, i32 -> vector<8x512xf32>
    %c25_214 = arith.constant 25 : index
    %c0_215 = arith.constant 0 : index
    %377 = vector.load %arg2[%c25_214, %c0_215] : memref<27x512xf32, #tpu.memory_space<vmem>>, vector<1x512xf32>
    %378 = vector.broadcast %377 : vector<1x512xf32> to vector<8x512xf32>
    %379 = arith.mulf %376, %378 : vector<8x512xf32>
    %380 = arith.truncf %379 : vector<8x512xf32> to vector<8x512xbf16>
    %c200_216 = arith.constant 200 : index
    %c0_217 = arith.constant 0 : index
    %381 = vector.load %arg12[%c200_216, %c0_217] : memref<216x512xbf16, #tpu.memory_space<vmem>>, vector<8x512xbf16>
    tpu.vector_store %arg12[%c200_216, %c0_217], %380 {strides = array<i32>} : memref<216x512xbf16, #tpu.memory_space<vmem>>, vector<8x512xbf16>,
    %c439_i32_218 = arith.constant 439 : i32
    %382 = tpu.dynamic_rotate %226 by %c439_i32_218 dim 1 : vector<8x512xf32>, i32 -> vector<8x512xf32>
    %c26_219 = arith.constant 26 : index
    %c0_220 = arith.constant 0 : index
    %383 = vector.load %arg2[%c26_219, %c0_220] : memref<27x512xf32, #tpu.memory_space<vmem>>, vector<1x512xf32>
    %384 = vector.broadcast %383 : vector<1x512xf32> to vector<8x512xf32>
    %385 = arith.mulf %382, %384 : vector<8x512xf32>
    %386 = arith.truncf %385 : vector<8x512xf32> to vector<8x512xbf16>
    %c208_221 = arith.constant 208 : index
    %c0_222 = arith.constant 0 : index
    %387 = vector.load %arg12[%c208_221, %c0_222] : memref<216x512xbf16, #tpu.memory_space<vmem>>, vector<8x512xbf16>
    tpu.vector_store %arg12[%c208_221, %c0_222], %386 {strides = array<i32>} : memref<216x512xbf16, #tpu.memory_space<vmem>>, vector<8x512xbf16>,
    %c0_223 = arith.constant 0 : index
    %c0_224 = arith.constant 0 : index
    %388 = vector.load %arg9[%c0_223, %c0_224] : memref<8x216xbf16, #tpu.memory_space<vmem>>, vector<8x216xbf16>
    %c0_225 = arith.constant 0 : index
    %c0_226 = arith.constant 0 : index
    %389 = vector.load %arg12[%c0_225, %c0_226] : memref<216x512xbf16, #tpu.memory_space<vmem>>, vector<216x512xbf16>
    %cst_227 = arith.constant dense<0.000000e+00> : vector<8x512xf32>
    %390 = tpu.matmul %388, %389, %cst_227 {dimension_numbers = #tpu.dot_dimension_numbers<[1], [0], [0], [1], [0, 0, 1, 1], [], []>} : vector<8x216xbf16>, vector<216x512xbf16>, vector<8x512xf32> -> vector<8x512xf32>
    %c0_228 = arith.constant 0 : index
    %c0_229 = arith.constant 0 : index
    %391 = vector.load %arg10[%c0_228, %c0_229] : memref<8x1xf32, #tpu.memory_space<vmem>>, vector<8x1xf32>
    %392 = vector.broadcast %391 : vector<8x1xf32> to vector<8x512xf32>
    %393 = arith.addf %390, %392 : vector<8x512xf32>
    %394 = arith.addf %393, %1 : vector<8x512xf32>
    %c0_230 = arith.constant 0 : index
    %c0_231 = arith.constant 0 : index
    %c0_232 = arith.constant 0 : index
    %395 = vector.load %arg11[%c0_230, %c0_231, %c0_232] : memref<1x8x512xf32, #tpu.memory_space<vmem>>, vector<1x8x512xf32>
    %396 = vector.shape_cast %395 : vector<1x8x512xf32> to vector<8x512xf32>
    %397 = vector.shape_cast %394 : vector<8x512xf32> to vector<1x8x512xf32>
    tpu.vector_store %arg11[%c0_230, %c0_231, %c0_232], %397 {strides = array<i32>} : memref<1x8x512xf32, #tpu.memory_space<vmem>>, vector<1x8x512xf32>,
    return
  }
  func.func @transform_0(%arg0: i32) -> (i32, i32, i32) {
    %c0_i32 = arith.constant 0 : i32
    %c0_i32_0 = arith.constant 0 : i32
    %c0_i32_1 = arith.constant 0 : i32
    return %arg0, %c0_i32, %c0_i32_0 : i32, i32, i32
  }
  func.func @transform_1(%arg0: i32) -> (i32, i32) {
    %c0_i32 = arith.constant 0 : i32
    %c0_i32_0 = arith.constant 0 : i32
    %c0_i32_1 = arith.constant 0 : i32
    return %c0_i32, %c0_i32_0 : i32, i32
  }
  func.func @transform_2(%arg0: i32) -> (i32, i32) {
    %c0_i32 = arith.constant 0 : i32
    %c0_i32_0 = arith.constant 0 : i32
    %c0_i32_1 = arith.constant 0 : i32
    return %c0_i32, %c0_i32_0 : i32, i32
  }
  func.func @transform_3(%arg0: i32) -> (i32, i32) {
    %c0_i32 = arith.constant 0 : i32
    %c0_i32_0 = arith.constant 0 : i32
    %c0_i32_1 = arith.constant 0 : i32
    return %c0_i32, %c0_i32_0 : i32, i32
  }
  func.func @transform_4(%arg0: i32) -> (i32, i32) {
    %c0_i32 = arith.constant 0 : i32
    %c0_i32_0 = arith.constant 0 : i32
    %c0_i32_1 = arith.constant 0 : i32
    return %c0_i32, %c0_i32_0 : i32, i32
  }
  func.func @transform_5(%arg0: i32) -> (i32, i32) {
    %c0_i32 = arith.constant 0 : i32
    %c0_i32_0 = arith.constant 0 : i32
    %c0_i32_1 = arith.constant 0 : i32
    return %c0_i32, %c0_i32_0 : i32, i32
  }
  func.func @transform_6(%arg0: i32) -> (i32, i32) {
    %c0_i32 = arith.constant 0 : i32
    %c0_i32_0 = arith.constant 0 : i32
    %c0_i32_1 = arith.constant 0 : i32
    return %c0_i32, %c0_i32_0 : i32, i32
  }
  func.func @transform_7(%arg0: i32) -> (i32, i32) {
    %c0_i32 = arith.constant 0 : i32
    %c0_i32_0 = arith.constant 0 : i32
    %c0_i32_1 = arith.constant 0 : i32
    return %c0_i32, %c0_i32_0 : i32, i32
  }
  func.func @transform_8(%arg0: i32) -> (i32, i32) {
    %c0_i32 = arith.constant 0 : i32
    %c0_i32_0 = arith.constant 0 : i32
    %c0_i32_1 = arith.constant 0 : i32
    return %c0_i32, %c0_i32_0 : i32, i32
  }
  func.func @transform_9(%arg0: i32) -> (i32, i32) {
    %c0_i32 = arith.constant 0 : i32
    %c0_i32_0 = arith.constant 0 : i32
    %c0_i32_1 = arith.constant 0 : i32
    return %c0_i32, %c0_i32_0 : i32, i32
  }
  func.func @transform_10(%arg0: i32) -> (i32, i32, i32) {
    %c0_i32 = arith.constant 0 : i32
    %c0_i32_0 = arith.constant 0 : i32
    %c0_i32_1 = arith.constant 0 : i32
    return %arg0, %c0_i32, %c0_i32_0 : i32, i32, i32
  }
}

</mosaic_0001>

<bundles_post_ra>
// kernel: tpu_custom_call.1
= control target key start
LH: loop header
LB: loop body
LE: loop exit
PB: predicated region body
PF: predicated region fallthrough
CT: control target
= control target key end

     0   :  { %s5163_s0 = inlined_call_operand.hbm [shape: f32[2,8,512], index: 0, kind: input, shape index: {}]   ;;  %s5164_s1 = inlined_call_operand.hbm [shape: f32[27,512], index: 1, kind: input, shape index: {}]   ;;  %s5165_s2 = inlined_call_operand.vmem [shape: f32[8,1], index: 2, kind: input, shape index: {}]   ;;  %s5166_s3 = inlined_call_operand.vmem [shape: f32[8,1], index: 3, kind: input, shape index: {}]   ;;  %s5167_s4 = inlined_call_operand.vmem [shape: bf16[8,216], index: 4, kind: input, shape index: {}]   ;;  %s5168_s5 = inlined_call_operand.vmem [shape: f32[8,1], index: 5, kind: input, shape index: {}]   ;;  %s5169_s6 = inlined_call_operand.vmem [shape: f32[8,1], index: 6, kind: input, shape index: {}]   ;;  %s5170_s7 = inlined_call_operand.vmem [shape: f32[8,1], index: 7, kind: input, shape index: {}]   ;;  %s5171_s8 = inlined_call_operand.vmem [shape: bf16[8,216], index: 8, kind: input, shape index: {}]   ;;  %s5172_s9 = inlined_call_operand.vmem [shape: f32[8,1], index: 9, kind: input, shape index: {}]   ;;  %s5173_s10 = inlined_call_operand.hbm [shape: f32[2,8,512], index: 10, kind: output, shape index: {}]  }
   0x1   :  { %5198 = sst [smem:[#allocation15_spill]] %s5164_s1 }
   0x2   :  { %15 = vsyncpa [#allocation4], 0 }
   0x3   :  { %17 = vsyncpa [#allocation4 + $0x1], 0 }
   0x4   :  { %18 = vsyncpa [#allocation7], 0 }
   0x5   :  { %19 = vsyncpa [#allocation5], 0 }
   0x6   :  { %21 = vsyncpa [#allocation5 + $0x1], 0  ;;  %s3824_s13 = smov 0   ;;  %s3826_s14 = smov 0  }
   0x7   :  { %s3828_s15 = smov 0   ;;  %s3830_s16 = smov 0  }
   0x8 LB: > { %5199 = sst [smem:[#allocation12_spill]] %s3742_s15  ;;  %s3848_s20 = sadd.s32 4294967295, %s3746_s16   ;;  %s3746_s16 = sphi %s3830_s16, %s5245_s16   ;;  %s3742_s15 = sphi %s3828_s15, %s5247_s15   ;;  %s3738_s14 = sphi %s3826_s14, %s5249_s14   ;;  %s3734_s13 = sphi %s3824_s13, %s5248_s13  }
   0x9   : > { %s5200_s1 = sld [smem:[#allocation15_spill]]  ;;  %p2983_p0 = scmp.ge.s32.totalorder %s3746_s16, 1 }
   0xa   : > { %p48_p1 = scmp.eq.s32.totalorder %s3848_s20, 0  ;;  %p273_p2 = scmp.lt.s32.totalorder %s3746_s16, 3 }
   0xb   : > { %s3748_s22 = smov [#allocation6]   ;;  %s3749_s24 = smov 512  }
   0xc   : > { %p3853_p3 = pnand %p2983_p0, %p273_p2  ;;  %s286_s23 = sshll.u32 %s3748_s22, 4  ;;  %s287_s23 = int_to_ptr.vmem [resolvable:$true] %s286_s23 }
   0xd   : > { %s3750_s25 = smov 32   ;;  %s2982_s26 = sadd.s32 4294967294, %s3746_s16  }
   0xe   : > { %p3536_p4 = pneg %p3853_p3  ;;  %s3864_s27 = sadd.s32 1, %s3746_s16  }
   0xf   : > { %s284_s19 = sshll.u32 %s5200_s1, 4  ;;  %5202 = sst [smem:[#allocation13_spill]] %s3864_s27  ;;  %s285_s19 = int_to_ptr.hbm [resolvable:$true] %s284_s19 }
  0x10   : > { %p3537_p6 = pnand %p3536_p4, %p48_p1  ;;  %s34_s28 = sadd.s32 1, %s3742_s15 }
  0x11   : > { %s31_s29 = ssub.s32 %s3746_s16, %s3864_s27  ;;  %p41_p7 = scmp.ne.s32.totalorder %s3742_s15, %s3738_s14 }
  0x12   : > { %3539 = dma.hbm_to_vmem [thread:$0]  (!%p3537_p6), %s285_s19, 2048, %s287_s23, [#allocation7], %s3749_s24, %s3749_s24, %s3750_s25  }
  0x13   : > { %p32_p8 = scmp.eq.s32.totalorder %s31_s29, 0  ;;  %p42_p9 = scmp.eq.s32.totalorder %s3746_s16, 0 }
  0x14   : > { %p47_p10 = scmp.ne.s32.totalorder %s3738_s14, %s3734_s13  ;;  %p260_p11 = scmp.eq.s32.totalorder %s3848_s20, 1 }
  0x15   : > { %s3876_s30 = scalar_select %p32_p8, %s3742_s15, %s34_s28  }
  0x16   : > { %p3880_p12 = por %p48_p1, %p47_p10  ;;  %p3884_p13 = por %p260_p11, %p41_p7 }
  0x17   : > { %5203 = sst [smem:[#allocation14_spill]] %s3876_s30  ;;  %p266_p0 = scmp.eq.s32.totalorder %s2982_s26, 1 }
  0x18   : > { %p43_p2 = por %p42_p9, %p41_p7  ;;  %s324_s17 = sand.u32 1, %s3742_s15  }
  0x19   : > { %p3889_p4 = por %p266_p0, %p47_p10  ;;  %p3549_p6 = scmp.lt.s32.totalorder %s3746_s16, 2 }
  0x1a   : > { %s2986_s19 = sshll.u32 %s324_s17, 5  ;;  %s3422_s22 = sshll.u32 %s3746_s16, 5 }
  0x1b   : > { %s333_s25 = scalar_lea.hbm %s5163_s0, %s3422_s22  ;;  %s328_s29 = scalar_lea.vmem [#allocation3], %s2986_s19 }
  0x1c   : > { %s335_s28 = sshll.u32 %s333_s25, 4  ;;  %s337_s1 = sshll.u32 %s328_s29, 4  ;;  %s336_s28 = int_to_ptr.hbm [resolvable:$true] %s335_s28  ;;  %s338_s1 = int_to_ptr.vmem [resolvable:$true] %s337_s1 }
  0x1d   : > { %p3898_p8 = pnand %p3549_p6, %p43_p2  ;;  %s325_s30 = scalar_lea.sflag [#allocation4], %s324_s17 }
  0x1e   : > { %s3646_s15 = sshra.s32 %s336_s28, 4  ;;  %s3653_s19 = scalar_lea.hbm %s5163_s0, 64  ;;  %s3647_s15 = int_to_ptr.hbm [resolvable:$true] %s3646_s15 }
  0x1f   : > { %s3648_s27 = scalar_lea.hbm %s3647_s15, 32  ;;  %p3650_p9 = pneg %p3898_p8 }
  0x20   : > { %p3649_p7 = scmp.ne.s32.totalorder %s3647_s15, %s3648_s27  ;;  %p3654_p0 = scmp.lt.s32.totalorder %s3647_s15, %s5163_s0 }
  0x21   : > { %p3655_p2 = scmp.lt.s32.totalorder %s3653_s19, %s3648_s27 }
  0x22   : > { %p3651_p10 = pnand %p3650_p9, %p3649_p7 }
  0x23   : > { %p3656_p6 = por %p3655_p2, %p3654_p0 }
  0x24   : > { %p3652_p11 = pneg %p3651_p10 }
  0x26   : > { %p3657_p5 = pnand %p3656_p6, %p3652_p11 }
  0x28   : > { %3660 = shalt.err (!%p3657_p5)
}
  0x29   : > { %3543 = dma.hbm_to_vmem [thread:$0]  (!%p3898_p8), %s336_s28, 512, %s338_s1, %s325_s30  }
  0x2a   : > { %346 = sbr.rel (%p3853_p3) target bundleno = 1302 (0x516), region = 60  ;;  %s3915_s17 = sand.u32 (!%p3853_p3), 1, %s3738_s14  }
  0x2b   : > { %s5177_s29 = sshll.u32 (!%p3853_p3), %s3915_s17, 5  ;;  %s349_s22 = scalar_lea.sflag (!%p3853_p3), [#allocation4], %s3915_s17 }
  0x2c   : > { %s3921_s15 = scalar_lea.vmem (!%p3853_p3), [#allocation3], %s5177_s29 }
  0x2f   : > { %3721 = dma.done.wait (%p3880_p12), %s349_s22, 512  }
  0x30   : > { %3723 = vsyncadd (%p3880_p12), %s349_s22, 4294966784 }
  0x31   : > { %3725 = dma.done.wait (%p48_p1), [#allocation7], 2048  }
  0x32   : > { %3727 = vsyncadd (%p48_p1), [#allocation7], 4294965248  ;;  %v3751_v0 = vmov 0   ;;  %v396_v1 = vld [vmem:[%s3921_s15] sm:$0xff]  ;;  %v397_v2 = vld [vmem:[%s3921_s15 + $0x8] sm:$0xff]  ;;  %s3752_s11 = smov 127  }
  0x33   : > { %3605 = vset.pattern.permute.xlu1 %v3751_v0  ;;  %3606 = vset.pattern.permute.xlu2 %v3751_v0  ;;  %v398_v3 = vld [vmem:[%s3921_s15 + $0x10] sm:$0xff]  ;;  %v400_v4 = vadd.f32 %v397_v2, %v396_v1  ;;  %v405_v5 = vmul.f32 %v396_v1, %v396_v1  ;;  %v406_v6 = vmul.f32 %v397_v2, %v397_v2  ;;  %v399_v8 = vld [vmem:[%s3921_s15 + $0x18] sm:$0xff]  ;;  %s3753_s28 = smov 121   ;;  %s5197_s26 = smov 1   ;;  %vm1545_vm11 = vcmask 1043456  }
  0x34   : > { %3607 = vset.pattern.permute.xlu0 %v3751_v0  ;;  %v437_v7 = vld [vmem:[%s5165_s2] sm:$0xff]  ;;  %v407_v10 = vmul.f32 %v398_v3, %v398_v3  ;;  %v408_v13 = vmul.f32 %v399_v8, %v399_v8  ;;  %s3755_s23 = smov 8   ;;  %s3756_s19 = smov 55  }
  0x35   : > { %440 = vperm.xlu1 %3605, %v437_v7   ;;  %v401_v9 = vadd.f32 %v400_v4, %v398_v3  ;;  %v409_v11 = vadd.f32 %v406_v6, %v405_v5  ;;  %v447_v15 = vld [vmem:[%s5166_s3] sm:$0xff]  ;;  %s3757_s24 = smov 7   ;;  %s5178_s25 = smov 57   ;;  %v477_v6 = vlaneseq }
  0x36   : > { %v887_v44 = vld [vmem:[#allocation6 + $0x25] ss:$8 sm:$0xf]  ;;  %s3759_s22 = smov 56   ;;  %s3760_s1 = smov 9  }
  0x37   : > { %v402_v12 = vadd.f32 %v401_v9, %v399_v8  ;;  %v410_v14 = vadd.f32 %v409_v11, %v407_v10  ;;  %v889_v50 = vperm.slane %v887_v44, 0  ;;  %v890_v51 = vperm.slane %v887_v44, 1  ;;  %s5184_s21 = smov 64   ;;  %s5180_s27 = smov 63  }
  0x38   : > { %v891_v52 = vperm.slane %v887_v44, 2  ;;  %v892_v53 = vperm.slane %v887_v44, 3  ;;  %s3763_s30 = smov 71   ;;  %s5182_s29 = smov 65   ;;  %v4039_v7 = vand.u32 127, %v477_v6 }
  0x39   : > { %403 = vadd.xlane.f32.xlu0 %v402_v12  ;;  %v411_v16 = vadd.f32 %v410_v14, %v408_v13  ;;  %v4041_v9 = vld [vmem:[#allocation6 + $0x26] ss:$8 sm:$0xf] }
  0x3a   : > { %vm913_vm7 = vcmp.lt.s32.totalorder %v4039_v7, 127  ;;  %v921_v10 = vperm.slane %v4041_v9, 0  ;;  %v922_v11 = vperm.slane %v4041_v9, 1  ;;  %vm945_vm8 = vcmp.lt.s32.totalorder %v4039_v7, 121 }
  0x3b   : > { %vm734_vm9 = vcmp.lt.s32.totalorder %v4039_v7, 55  ;;  %vm862_vm10 = vcmp.lt.s32.totalorder %v4039_v7, 1  ;;  %vm798_vm12 = vcmp.lt.s32.totalorder %v4039_v7, 8  ;;  %vm830_vm13 = vcmp.lt.s32.totalorder %v4039_v7, 7 }
  0x3c   : > { %vm670_vm14 = vcmp.lt.s32.totalorder %v4039_v7, 57  ;;  %vm702_vm15 = vcmp.lt.s32.totalorder %v4039_v7, 56 }
  0x3d   : > { %450 = vperm.xlu1 %3605, %v447_v15  }
  0x41   : > { %412 = vadd.xlane.f32.xlu0 %v411_v16 }
  0xa7   : > { %v441_v28 = vpop.permute.xlu1 %440 }
  0xac   : > { %v404_v17 = vpop.xlane.xlu0 %403 }
  0xad   : > { %v414_v18 = vmul.f32 0.001953125, %v404_v17 }
  0xaf   : > { %v416_v20 = vmul.f32 %v414_v18, %v414_v18  ;;  %v418_v31 = vsub.f32 %v396_v1, %v414_v18  ;;  %v419_v32 = vsub.f32 %v397_v2, %v414_v18  ;;  %v420_v33 = vsub.f32 %v398_v3, %v414_v18  ;;  %v451_v45 = vpop.permute.xlu1 %450 }
  0xb0   : > { %v421_v34 = vsub.f32 %v399_v8, %v414_v18 }
  0xb4   : > { %v413_v19 = vpop.xlane.xlu0 %412 }
  0xb5   : > { %v415_v21 = vmul.f32 0.001953125, %v413_v19  ;;  %v4064_v19 = vld [vmem:[#allocation6 + $0x27] ss:$8 sm:$0xf] }
  0xb7   : > { %v417_v22 = vsub.f32 %v415_v21, %v416_v20  ;;  %v953_v21 = vperm.slane %v4064_v19, 0 }
  0xb9   : > { %v422_v23 = vadd.f32 1e-05, %v417_v22  ;;  %v954_v22 = vperm.slane %v4064_v19, 1 }
  0xbb   : > { %3608 = vrsqrt.f32 %v422_v23  ;;  %vm429_vm1 = vweird.f32 %v422_v23 }
  0xc1   : > { %v3609_v24 = vpop.eup %3608 }
  0xc2   : > { %v424_v25 = vmul.f32 %v3609_v24, %v422_v23  ;;  %vm430_vm0 = vweird.f32 %v3609_v24 }
  0xc3   : > { %vm431_vm2 = vmor %vm429_vm1, %vm430_vm0  ;;  %vm766_vm0 = vcmp.lt.s32.totalorder %v4039_v7, 9  ;;  %vm606_vm1 = vcmp.lt.s32.totalorder %v4039_v7, 64 }
  0xc4   : > { %v425_v26 = vmul.f32 %v3609_v24, %v424_v25 }
  0xc6   : > { %v426_v27 = vmul.f32 0.5, %v425_v26 }
  0xc8   : > { %v427_v29 = vsub.f32 1.5, %v426_v27 }
  0xca   : > { %v428_v30 = vmul.f32 %v3609_v24, %v427_v29 }
  0xcc   : > { %v432_v35 = vsel %vm431_vm2, %v3609_v24, %v428_v30  ;;  %v4085_v30 = vld [vmem:[#allocation6 + $0x62] ss:$8 sm:$0xf]  ;;  %vm638_vm2 = vcmp.lt.s32.totalorder %v4039_v7, 63 }
  0xcd   : > { %v433_v36 = vmul.f32 %v432_v35, %v418_v31  ;;  %v434_v37 = vmul.f32 %v432_v35, %v419_v32  ;;  %v435_v38 = vmul.f32 %v432_v35, %v420_v33  ;;  %v436_v39 = vmul.f32 %v432_v35, %v421_v34 }
  0xce   : > { %v1188_v32 = vperm.slane %v4085_v30, 0  ;;  %v1189_v33 = vperm.slane %v4085_v30, 1 }
  0xcf   : > { %v443_v40 = vmul.f32 %v441_v28, %v433_v36  ;;  %v444_v41 = vmul.f32 %v441_v28, %v434_v37  ;;  %v445_v42 = vmul.f32 %v441_v28, %v435_v38  ;;  %v446_v43 = vmul.f32 %v441_v28, %v436_v39  ;;  %v4106_v38 = vld [vmem:[#allocation6 + $0x24] ss:$8 sm:$0xf] }
  0xd0   : > { %v871_v44 = vperm.slane %v4106_v38, 1 }
  0xd1   : > { %v453_v46 = vadd.f32 %v451_v45, %v443_v40  ;;  %v454_v47 = vadd.f32 %v451_v45, %v444_v41  ;;  %v455_v48 = vadd.f32 %v451_v45, %v445_v42  ;;  %v456_v49 = vadd.f32 %v451_v45, %v446_v43 }
  0xd2   : > { %v870_v43 = vperm.slane %v4106_v38, 0 }
  0xd3   : > { %vm457_vm3 = vcmp.ge.f32.partialorder %v453_v46, 0.0  ;;  %vm458_vm4 = vcmp.ge.f32.partialorder %v454_v47, 0.0  ;;  %vm459_vm5 = vcmp.ge.f32.partialorder %v455_v48, 0.0  ;;  %vm460_vm6 = vcmp.ge.f32.partialorder %v456_v49, 0.0 }
  0xd4   : > { %v461_v54 = vmul.f32 0.01, %v453_v46  ;;  %v462_v55 = vmul.f32 0.01, %v454_v47  ;;  %v463_v56 = vmul.f32 0.01, %v455_v48 }
  0xd5   : > { %v464_v57 = vmul.f32 0.01, %v456_v49 }
  0xd6   : > { %v3941_v58 = vsel %vm457_vm3, %v453_v46, %v461_v54  ;;  %v3943_v59 = vsel %vm458_vm4, %v454_v47, %v462_v55  ;;  %v3945_v60 = vsel %vm459_vm5, %v455_v48, %v463_v56  ;;  %vm5186_vm3 = vcmp.lt.s32.totalorder %v4039_v7, 71 }
  0xd7   : > { %v3947_v61 = vsel %vm460_vm6, %v456_v49, %v464_v57  ;;  %909 = vrot.lane.b32.xlu0 %v3945_v60, %s3752_s11  ;;  %937 = vrot.lane.b32.xlu1 %v3941_v58, %s3753_s28  ;;  %v897_v62 = vmul.f32 %v889_v50, %v3941_v58  ;;  %v898_v63 = vmul.f32 %v890_v51, %v3943_v59  ;;  %vm5196_vm4 = vcmp.lt.s32.totalorder %v4039_v7, 65 }
  0xd8   : > { %905 = vrot.lane.b32.xlu2 %v3941_v58, %s3752_s11  ;;  %v899_v0 = vmul.f32 %v891_v52, %v3945_v60  ;;  %v900_v1 = vmul.f32 %v892_v53, %v3947_v61  ;;  %vm5187_vm5 = vcmp.lt.s32.totalorder %v4039_v7, 73  ;;  %vm5195_vm6 = vcmp.lt.s32.totalorder %v4039_v7, 72 }
  0xd9   : > { %v901_v2 = vpack.c.bf16 %v898_v63, %v897_v62 }
  0xda   : > { %v902_v3 = vpack.c.bf16 %v900_v1, %v899_v0 }
  0xdb   : > { %903 = vst [vmem:[#allocation2 + $0xd0] sm:$0xff] %v901_v2 }
  0xdc   : > { %904 = vst [vmem:[#allocation2 + $0xd8] sm:$0xff] %v902_v3 }
  0xdf   : > { %854 = vrot.lane.b32.xlu0 %v3941_v58, %s5197_s26  ;;  %941 = vrot.lane.b32.xlu1 %v3945_v60, %s3753_s28 }
  0xe0   : > { %907 = vrot.lane.b32.xlu2 %v3943_v59, %s3752_s11 }
  0xe7   : > { %790 = vrot.lane.b32.xlu0 %v3941_v58, %s3755_s23  ;;  %728 = vrot.lane.b32.xlu1 %v3943_v59, %s3756_s19 }
  0xe8   : > { %939 = vrot.lane.b32.xlu2 %v3943_v59, %s3753_s28 }
  0xef   : > { %822 = vrot.lane.b32.xlu0 %v3941_v58, %s3757_s24  ;;  %856 = vrot.lane.b32.xlu1 %v3943_v59, %s5197_s26 }
  0xf0   : > { %726 = vrot.lane.b32.xlu2 %v3941_v58, %s3756_s19 }
  0xf7   : > { %662 = vrot.lane.b32.xlu0 %v3941_v58, %s5178_s25  ;;  %792 = vrot.lane.b32.xlu1 %v3943_v59, %s3755_s23 }
  0xf8   : > { %730 = vrot.lane.b32.xlu2 %v3945_v60, %s3756_s19 }
  0xff   : > { %694 = vrot.lane.b32.xlu0 %v3941_v58, %s3759_s22  ;;  %824 = vrot.lane.b32.xlu1 %v3943_v59, %s3757_s24 }
 0x100   : > { %860 = vrot.lane.b32.xlu2 %v3947_v61, %s5197_s26 }
 0x107   : > { %732 = vrot.lane.b32.xlu0 %v3947_v61, %s3756_s19  ;;  %664 = vrot.lane.b32.xlu1 %v3943_v59, %s5178_s25 }
 0x108   : > { %796 = vrot.lane.b32.xlu2 %v3947_v61, %s3755_s23 }
 0x10f   : > { %764 = vrot.lane.b32.xlu0 %v3947_v61, %s3760_s1  ;;  %696 = vrot.lane.b32.xlu1 %v3943_v59, %s3759_s22 }
 0x110   : > { %828 = vrot.lane.b32.xlu2 %v3947_v61, %s3757_s24 }
 0x117   : > { %602 = vrot.lane.b32.xlu0 %v3945_v60, %s5184_s21  ;;  %758 = vrot.lane.b32.xlu1 %v3941_v58, %s3760_s1 }
 0x118   : > { %666 = vrot.lane.b32.xlu2 %v3945_v60, %s5178_s25 }
 0x11f   : > { %634 = vrot.lane.b32.xlu0 %v3945_v60, %s5180_s27  ;;  %598 = vrot.lane.b32.xlu1 %v3941_v58, %s5184_s21 }
 0x120   : > { %698 = vrot.lane.b32.xlu2 %v3945_v60, %s3759_s22 }
 0x127   : > { %534 = vrot.lane.b32.xlu0 %v3941_v58, %s3763_s30  ;;  %630 = vrot.lane.b32.xlu1 %v3941_v58, %s5180_s27 }
 0x128   : > { %760 = vrot.lane.b32.xlu2 %v3943_v59, %s3760_s1 }
 0x12f   : > { %566 = vrot.lane.b32.xlu0 %v3941_v58, %s5182_s29  ;;  %668 = vrot.lane.b32.xlu1 %v3947_v61, %s5178_s25  ;;  %s3765_s25 = smov 73  }
 0x130   : > { %600 = vrot.lane.b32.xlu2 %v3943_v59, %s5184_s21 }
 0x132   : > { %v4025_v4 = vpop.permute.xlu2 %905 }
 0x137   : > { %911 = vrot.lane.b32.xlu0 %v3947_v61, %s3752_s11  ;;  %536 = vrot.lane.b32.xlu1 %v3943_v59, %s3763_s30 }
 0x138   : > { %632 = vrot.lane.b32.xlu2 %v3943_v59, %s5180_s27 }
 0x13a   : > { %v908_v5 = vpop.permute.xlu2 %907 }
 0x13b   : > { %v916_v12 = vsel %vm913_vm7, %v4025_v4, %v908_v5 }
 0x13c   : > { %v929_v17 = vmul.f32 %v921_v10, %v916_v12 }
 0x13f   : > { %636 = vrot.lane.b32.xlu0 %v3947_v61, %s5180_s27  ;;  %568 = vrot.lane.b32.xlu1 %v3943_v59, %s5182_s29  ;;  %s3766_s27 = smov 72  }
 0x140   : > { %700 = vrot.lane.b32.xlu2 %v3947_v61, %s3759_s22 }
 0x142   : > { %v940_v8 = vpop.permute.xlu2 %939 }
 0x147   : > { %473 = vrot.lane.b32.xlu0 %v3945_v60, %s3765_s25  ;;  %943 = vrot.lane.b32.xlu1 %v3947_v61, %s3753_s28 }
 0x148   : > { %538 = vrot.lane.b32.xlu2 %v3945_v60, %s3763_s30 }
 0x149   : > { %v4055_v13 = vpop.permute.xlu0 %909  ;;  %v4057_v14 = vpop.permute.xlu1 %937 }
 0x14a   : > { %v915_v15 = vsel %vm913_vm7, %v908_v5, %v4055_v13  ;;  %v4062_v16 = vpop.permute.xlu2 %726  ;;  %v948_v23 = vsel %vm945_vm8, %v4057_v14, %v940_v8  ;;  %v4133_v5 = vld [vmem:[#allocation6 + $0x22] ss:$8 sm:$0xf] }
 0x14b   : > { %v930_v18 = vmul.f32 %v922_v11, %v915_v15  ;;  %v961_v28 = vmul.f32 %v953_v21, %v948_v23  ;;  %v807_v10 = vperm.slane %v4133_v5, 1  ;;  %v4156_v21 = vld [vmem:[#allocation6 + $0x23] ss:$8 sm:$0xf] }
 0x14c   : > { %v3449_v23 = vld [vmem:[#allocation2 + $0xcc] sm:$0xf0] }
 0x14d   : > { %v933_v20 = vpack.c.bf16 %v930_v18, %v929_v17 }
 0x14f   : > { %935 = vst [vmem:[#allocation2 + $0xe0] sm:$0xff] %v933_v20  ;;  %506 = vrot.lane.b32.xlu0 %v3945_v60, %s3766_s27  ;;  %469 = vrot.lane.b32.xlu1 %v3941_v58, %s3765_s25 }
 0x150   : > { %570 = vrot.lane.b32.xlu2 %v3945_v60, %s5182_s29 }
 0x151   : > { %v855_v24 = vpop.permute.xlu0 %854  ;;  %v4078_v25 = vpop.permute.xlu1 %941 }
 0x152   : > { %v947_v26 = vsel %vm945_vm8, %v940_v8, %v4078_v25  ;;  %v4083_v27 = vpop.permute.xlu2 %730  ;;  %v806_v8 = vperm.slane %v4133_v5, 0 }
 0x153   : > { %v962_v29 = vmul.f32 %v954_v22, %v947_v26 }
 0x155   : > { %v965_v31 = vpack.c.bf16 %v962_v29, %v961_v28  ;;  %v3093_v28 = vld [vmem:[#allocation2 + $0xd0] sm:$0xf0]  ;;  %v838_v29 = vperm.slane %v4156_v21, 0 }
 0x156   : > { %v3107_v45 = vld [vmem:[#allocation2 + $0xe0] sm:$0xf]  ;;  %v3451_v47 = vld [vmem:[#allocation2 + $0xe4] sm:$0xf] }
 0x157   : > { %967 = vst [vmem:[#allocation2 + $0xf0] sm:$0xff] %v965_v31  ;;  %572 = vrot.lane.b32.xlu0 %v3947_v61, %s5182_s29  ;;  %502 = vrot.lane.b32.xlu1 %v3941_v58, %s3766_s27  ;;  %s5190_s29 = smov 120   ;;  %v839_v31 = vperm.slane %v4156_v21, 1 }
 0x158   : > { %604 = vrot.lane.b32.xlu2 %v3947_v61, %s5184_s21  ;;  %s5188_s21 = smov 119  }
 0x159   : > { %v791_v34 = vpop.permute.xlu0 %790  ;;  %v729_v35 = vpop.permute.xlu1 %728 }
 0x15a   : > { %v4099_v36 = vsel %vm734_vm9, %v729_v35, %v4083_v27  ;;  %v4104_v37 = vsel %vm734_vm9, %v4062_v16, %v729_v35  ;;  %v4108_v39 = vpop.permute.xlu2 %860 }
 0x15b   : > { %v1196_v40 = vmul.f32 %v1188_v32, %v4104_v37  ;;  %v1197_v41 = vmul.f32 %v1189_v33, %v4099_v36  ;;  %v866_v53 = vsel %vm862_vm10, %v4108_v39, %v855_v24 }
 0x15c   : > { %v878_v0 = vmul.f32 %v870_v43, %v866_v53  ;;  %v1191_v53 = vperm.slane %v4085_v30, 3 }
 0x15d   : > { %v1200_v42 = vpack.c.bf16 %v1197_v41, %v1196_v40  ;;  %v740_v41 = vld [vmem:[#allocation6 + $0x20] ss:$8 sm:$0xf] }
 0x15e   : > { %v3453_v46 = vld [vmem:[#allocation2 + $0xec] sm:$0xf0]  ;;  %v3109_v48 = vld [vmem:[#allocation2 + $0xf0] sm:$0xf0] }
 0x15f   : > { %969 = vrot.lane.b32.xlu0 %v3941_v58, %s5190_s29  ;;  %858 = vrot.lane.b32.xlu1 %v3945_v60, %s5197_s26  ;;  %v3108_v49 = vor.u32 %v3453_v46, %v3107_v45  ;;  %v3112_v50 = vor.u32 %v3451_v47, %v3109_v48  ;;  %v1429_v51 = vunpack.c.l.b16 %v1200_v42  ;;  %v1430_v52 = vunpack.c.h.b16 %v1200_v42 }
 0x160   : > { %471 = vrot.lane.b32.xlu2 %v3943_v59, %s3765_s25  ;;  %v743_v46 = vperm.slane %v740_v41, 1  ;;  %v744_v47 = vperm.slane %v740_v41, 2 }
 0x161   : > { %v823_v54 = vpop.permute.xlu0 %822  ;;  %v4124_v55 = vpop.permute.xlu1 %856  ;;  %1558 = vmatpush.bf16.msra.mxu0 %v3108_v49  ;;  %1584 = vmatpush.bf16.msra.mxu2 %v3112_v50  ;;  %v1485_v56 = vpack.c.b16 %v1429_v51, %v1429_v51  ;;  %v1486_v57 = vpack.c.b16 %v1430_v52, %v1430_v52  ;;  %v4179_v49 = vld [vmem:[#allocation6 + $0x60] ss:$8 sm:$0xf]  ;;  %v742_v50 = vperm.slane %v740_v41, 0  ;;  %v745_v51 = vperm.slane %v740_v41, 3 }
 0x162   : > { %v865_v62 = vsel %vm862_vm10, %v855_v24, %v4124_v55  ;;  %v4129_v63 = vpop.permute.xlu2 %796  ;;  %v1190_v52 = vperm.slane %v4085_v30, 2 }
 0x163   : > { %v879_v1 = vmul.f32 %v871_v44, %v865_v62  ;;  %v1547_v2 = vsel %vm1545_vm11, %v1485_v56, 0  ;;  %v1550_v3 = vsel %vm1545_vm11, %v1486_v57, 0  ;;  %v802_v11 = vsel %vm798_vm12, %v4129_v63, %v791_v34 }
 0x164   : > { %1573 = vmatpush.bf16.msra.mxu1 %v1547_v2  ;;  %1599 = vmatpush.bf16.msra.mxu3 %v1550_v3  ;;  %v814_v18 = vmul.f32 %v806_v8, %v802_v11  ;;  %v1151_v56 = vperm.slane %v4179_v49, 1  ;;  %v751_v57 = vmul.f32 %v743_v46, %v4104_v37  ;;  %v752_v62 = vmul.f32 %v744_v47, %v4099_v36  ;;  %v4214_v11 = vld [vmem:[#allocation6 + $0x61] ss:$8 sm:$0xf] }
 0x165   : > { %v882_v6 = vpack.c.bf16 %v879_v1, %v878_v0 }
 0x167   : > { %884 = vst [vmem:[#allocation2 + $0xc0] sm:$0xff] %v882_v6  ;;  %1001 = vrot.lane.b32.xlu0 %v3941_v58, %s5188_s21  ;;  %794 = vrot.lane.b32.xlu1 %v3945_v60, %s3755_s23 }
 0x168   : > { %504 = vrot.lane.b32.xlu2 %v3943_v59, %s3766_s27 }
 0x169   : > { %v4147_v12 = vpop.permute.xlu0 %662  ;;  %v4149_v15 = vpop.permute.xlu1 %792 }
 0x16a   : > { %v801_v58 = vsel %vm798_vm12, %v791_v34, %v4149_v15  ;;  %v4154_v17 = vpop.permute.xlu2 %828 }
 0x16b   : > { %v815_v20 = vmul.f32 %v807_v10, %v801_v58  ;;  %v834_v34 = vsel %vm830_vm13, %v4154_v17, %v823_v54 }
 0x16c   : > { %v846_v44 = vmul.f32 %v838_v29, %v834_v34  ;;  %v1169_v29 = vperm.slane %v4214_v11, 0 }
 0x16d   : > { %v818_v22 = vpack.c.bf16 %v815_v20, %v814_v18 }
 0x16e   : > { %v3091_v24 = vld [vmem:[#allocation2 + $0xc0] sm:$0xf]  ;;  %v3447_v26 = vld [vmem:[#allocation2 + $0xc4] sm:$0xf] }
 0x16f   : > { %820 = vst [vmem:[#allocation2 + $0xa0] sm:$0xff] %v818_v22  ;;  %475 = vrot.lane.b32.xlu0 %v3947_v61, %s3765_s25  ;;  %971 = vrot.lane.b32.xlu1 %v3943_v59, %s5190_s29  ;;  %v3092_v32 = vor.u32 %v3449_v23, %v3091_v24  ;;  %v3096_v33 = vor.u32 %v3447_v26, %v3093_v28 }
 0x170   : > { %540 = vrot.lane.b32.xlu2 %v3947_v61, %s3763_s30 }
 0x171   : > { %v4170_v35 = vpop.permute.xlu0 %694  ;;  %v4172_v40 = vpop.permute.xlu1 %824  ;;  %1559 = vmatpush.bf16.msra.mxu0 %v3092_v32  ;;  %1585 = vmatpush.bf16.msra.mxu2 %v3096_v33 }
 0x172   : > { %v833_v42 = vsel %vm830_vm13, %v823_v54, %v4172_v40  ;;  %v4177_v43 = vpop.permute.xlu2 %666  ;;  %v1150_v54 = vperm.slane %v4179_v49, 0 }
 0x173   : > { %v847_v45 = vmul.f32 %v839_v31, %v833_v42  ;;  %v1170_v31 = vperm.slane %v4214_v11, 1 }
 0x175   : > { %v850_v48 = vpack.c.bf16 %v847_v45, %v846_v44 }
 0x176   : > { %v3075_v22 = vld [vmem:[#allocation2 + $0xa0] sm:$0xf]  ;;  %v3443_v26 = vld [vmem:[#allocation2 + $0xa4] sm:$0xf] }
 0x177   : > { %852 = vst [vmem:[#allocation2 + $0xb0] sm:$0xff] %v850_v48  ;;  %975 = vrot.lane.b32.xlu0 %v3947_v61, %s5190_s29  ;;  %1003 = vrot.lane.b32.xlu1 %v3943_v59, %s5188_s21  ;;  %v4241_v48 = vld [vmem:[#allocation6 + $0x21] ss:$8 sm:$0xf] }
 0x178   : > { %826 = vrot.lane.b32.xlu2 %v3945_v60, %s3757_s24 }
 0x179   : > { %v733_v0 = vpop.permute.xlu0 %732  ;;  %v665_v59 = vpop.permute.xlu1 %664 }
 0x17a   : > { %v735_v1 = vsel %vm734_vm9, %v4083_v27, %v733_v0  ;;  %v738_v30 = vsel %vm734_vm9, %v733_v0, %v4062_v16  ;;  %v4203_v2 = vsel %vm670_vm14, %v665_v59, %v4177_v43  ;;  %v4208_v37 = vsel %vm670_vm14, %v4147_v12, %v665_v59  ;;  %v4210_v36 = vpop.permute.xlu2 %698  ;;  %v4258_v59 = vld [vmem:[#allocation6 + $0x46] ss:$8 sm:$0xf] }
 0x17b   : > { %v750_v3 = vmul.f32 %v742_v50, %v738_v30  ;;  %v753_v6 = vmul.f32 %v745_v51, %v735_v1  ;;  %v1198_v8 = vmul.f32 %v1190_v52, %v735_v1  ;;  %v1199_v27 = vmul.f32 %v1191_v53, %v738_v30 }
 0x17c   : > { %v1158_v10 = vmul.f32 %v1150_v54, %v4208_v37  ;;  %v1159_v16 = vmul.f32 %v1151_v56, %v4203_v2  ;;  %v774_v51 = vperm.slane %v4241_v48, 0  ;;  %v775_v52 = vperm.slane %v4241_v48, 1 }
 0x17d   : > { %v754_v58 = vpack.c.bf16 %v751_v57, %v750_v3  ;;  %v755_v18 = vpack.c.bf16 %v753_v6, %v752_v62  ;;  %v4216_v20 = vpack.c.bf16 %v1199_v27, %v1198_v8  ;;  %v1113_v27 = vperm.slane %v4258_v59, 1 }
 0x17e   : > { %v1162_v23 = vpack.c.bf16 %v1159_v16, %v1158_v10  ;;  %v3445_v24 = vld [vmem:[#allocation2 + $0xac] sm:$0xf0]  ;;  %v3077_v28 = vld [vmem:[#allocation2 + $0xb0] sm:$0xf0]  ;;  %v1112_v10 = vperm.slane %v4258_v59, 0 }
 0x17f   : > { %756 = vst [vmem:[#allocation2 + $0x80] sm:$0xff] %v754_v58  ;;  %508 = vrot.lane.b32.xlu1 %v3947_v61, %s3766_s27  ;;  %v3076_v32 = vor.u32 %v3445_v24, %v3075_v22  ;;  %v3080_v33 = vor.u32 %v3443_v26, %v3077_v28  ;;  %v708_v22 = vld [vmem:[#allocation6 + $0x7] ss:$8 sm:$0xf] }
 0x180   : > { %757 = vst [vmem:[#allocation2 + $0x88] sm:$0xff] %v755_v18  ;;  %973 = vrot.lane.b32.xlu2 %v3945_v60, %s5190_s29  ;;  %v4279_v28 = vld [vmem:[#allocation6 + $0x47] ss:$8 sm:$0xf]  ;;  %s5208_s29 = smov 57  }
 0x181   : > { %1164 = vst [vmem:[#allocation2 + $0x180] sm:$0xff] %v1162_v23  ;;  %v4225_v34 = vpop.permute.xlu0 %764  ;;  %v697_v41 = vpop.permute.xlu1 %696  ;;  %1560 = vmatpush.bf16.msra.mxu0 %v3076_v32  ;;  %1586 = vmatpush.bf16.msra.mxu2 %v3080_v33  ;;  %v712_v33 = vperm.slane %v708_v22, 2 }
 0x182   : > { %v4230_v42 = vsel %vm702_vm15, %v697_v41, %v4210_v36  ;;  %v4235_v44 = vsel %vm702_vm15, %v4170_v35, %v697_v41  ;;  %v4237_v45 = vpop.permute.xlu2 %760 }
 0x183   : > { %v1177_v46 = vmul.f32 %v1169_v29, %v4235_v44  ;;  %v1178_v47 = vmul.f32 %v1170_v31, %v4230_v42 }
 0x185   : > { %v1181_v50 = vpack.c.bf16 %v1178_v47, %v1177_v46  ;;  %v1132_v46 = vperm.slane %v4279_v28, 1 }
 0x186   : > { %v3059_v47 = vld [vmem:[#allocation2 + $0x80] sm:$0xf] }
 0x187   : > { %1183 = vst [vmem:[#allocation2 + $0x190] sm:$0xff] %v1181_v50  ;;  %1007 = vrot.lane.b32.xlu1 %v3947_v61, %s5188_s21 }
 0x188   : > { %1005 = vrot.lane.b32.xlu2 %v3945_v60, %s5188_s21  ;;  %v3187_v30 = vld [vmem:[#allocation2 + $0x180] sm:$0xf]  ;;  %v3471_v6 = vld [vmem:[#allocation2 + $0x184] sm:$0xf]  ;;  %s5209_s21 = smov 64  }
 0x189   : > { %v4250_v53 = vpop.permute.xlu0 %602  ;;  %v759_v54 = vpop.permute.xlu1 %758 }
 0x18a   : > { %v769_v56 = vsel %vm766_vm0, %v759_v54, %v4237_v45  ;;  %v770_v61 = vsel %vm766_vm0, %v4225_v34, %v759_v54  ;;  %v601_v57 = vpop.permute.xlu2 %600  ;;  %v1131_v54 = vperm.slane %v4279_v28, 0 }
 0x18b   : > { %v782_v62 = vmul.f32 %v774_v51, %v770_v61  ;;  %v783_v0 = vmul.f32 %v775_v52, %v769_v56  ;;  %v4266_v18 = vsel %vm606_vm1, %v601_v57, %v4250_v53  ;;  %v3439_v51 = vld [vmem:[#allocation2 + $0x84] sm:$0xf]  ;;  %v710_v56 = vperm.slane %v708_v22, 0 }
 0x18c   : > { %v1121_v31 = vmul.f32 %v1113_v27, %v4266_v18 }
 0x18d   : > { %v786_v1 = vpack.c.bf16 %v783_v0, %v782_v62  ;;  %v713_v0 = vperm.slane %v708_v22, 3 }
 0x18e   : > { %v3473_v3 = vld [vmem:[#allocation2 + $0x18c] sm:$0xf0]  ;;  %v3189_v8 = vld [vmem:[#allocation2 + $0x190] sm:$0xf0] }
 0x18f   : > { %788 = vst [vmem:[#allocation2 + $0x90] sm:$0xff] %v786_v1  ;;  %v3188_v16 = vor.u32 %v3473_v3, %v3187_v30  ;;  %v3192_v58 = vor.u32 %v3471_v6, %v3189_v8  ;;  %v1171_v1 = vperm.slane %v4214_v11, 2  ;;  %v1172_v30 = vperm.slane %v4214_v11, 3  ;;  %v676_v8 = vld [vmem:[#allocation6 + $0x6] ss:$8 sm:$0xf] }
 0x190   : > { %762 = vrot.lane.b32.xlu2 %v3945_v60, %s3760_s1  ;;  %v711_v60 = vperm.slane %v708_v22, 1 }
 0x191   : > { %v4270_v23 = vpop.permute.xlu0 %634  ;;  %v4272_v24 = vpop.permute.xlu1 %598  ;;  %1574 = vmatpush.bf16.msra.mxu1 %v3188_v16  ;;  %1600 = vmatpush.bf16.msra.mxu3 %v3192_v58 }
 0x192   : > { %v4277_v26 = vsel %vm606_vm1, %v4272_v24, %v601_v57  ;;  %v633_v29 = vpop.permute.xlu2 %632  ;;  %v719_v27 = vmul.f32 %v711_v60, %v4235_v44 }
 0x193   : > { %v1120_v32 = vmul.f32 %v1112_v10, %v4277_v26  ;;  %v4289_v62 = vsel %vm638_vm2, %v633_v29, %v4270_v23  ;;  %v720_v10 = vmul.f32 %v712_v33, %v4230_v42 }
 0x194   : > { %v1140_v22 = vmul.f32 %v1132_v46, %v4289_v62 }
 0x195   : > { %v1124_v41 = vpack.c.bf16 %v1121_v31, %v1120_v32 }
 0x196   : > { %v3441_v50 = vld [vmem:[#allocation2 + $0x8c] sm:$0xf0]  ;;  %v3061_v52 = vld [vmem:[#allocation2 + $0x90] sm:$0xf0] }
 0x197   : > { %1126 = vst [vmem:[#allocation2 + $0x160] sm:$0xff] %v1124_v41  ;;  %v3060_v61 = vor.u32 %v3441_v50, %v3059_v47  ;;  %v3064_v57 = vor.u32 %v3439_v51, %v3061_v52  ;;  %v679_v41 = vperm.slane %v676_v8, 1  ;;  %v680_v47 = vperm.slane %v676_v8, 2 }
 0x198   : > { %v678_v52 = vperm.slane %v676_v8, 0 }
 0x199   : > { %v4293_v3 = vpop.permute.xlu0 %534  ;;  %v4295_v6 = vpop.permute.xlu1 %630  ;;  %1561 = vmatpush.bf16.msra.mxu0 %v3060_v61  ;;  %1587 = vmatpush.bf16.msra.mxu2 %v3064_v57  ;;  %v1152_v61 = vperm.slane %v4179_v49, 2  ;;  %v687_v57 = vmul.f32 %v679_v41, %v4208_v37 }
 0x19a   : > { %v4302_v16 = vsel %vm638_vm2, %v4295_v6, %v633_v29  ;;  %v701_v58 = vpop.permute.xlu2 %700 }
 0x19b   : > { %v1139_v11 = vmul.f32 %v1131_v54, %v4302_v16  ;;  %v703_v31 = vsel %vm702_vm15, %v4210_v36, %v701_v58  ;;  %v706_v44 = vsel %vm702_vm15, %v701_v58, %v4170_v35  ;;  %v681_v54 = vperm.slane %v676_v8, 3 }
 0x19c   : > { %v718_v32 = vmul.f32 %v710_v56, %v706_v44  ;;  %v721_v42 = vmul.f32 %v713_v0, %v703_v31  ;;  %v1179_v60 = vmul.f32 %v1171_v1, %v703_v31  ;;  %v1180_v33 = vmul.f32 %v1172_v30, %v706_v44  ;;  %v4329_v44 = vld [vmem:[#allocation6 + $0x44] ss:$8 sm:$0xf] }
 0x19d   : > { %v1143_v29 = vpack.c.bf16 %v1140_v22, %v1139_v11  ;;  %v1153_v36 = vperm.slane %v4179_v49, 3  ;;  %v688_v0 = vmul.f32 %v680_v47, %v4203_v2  ;;  %v4326_v22 = vld [vmem:[#allocation6 + $0x4] ss:$8 sm:$0xf]  ;;  %v923_v31 = vperm.slane %v4041_v9, 2 }
 0x19e   : > { %v722_v50 = vpack.c.bf16 %v719_v27, %v718_v32  ;;  %v723_v51 = vpack.c.bf16 %v721_v42, %v720_v10  ;;  %v1182_v46 = vpack.c.bf16 %v1180_v33, %v1179_v60  ;;  %v3467_v42 = vld [vmem:[#allocation2 + $0x164] sm:$0xf]  ;;  %v1074_v47 = vperm.slane %v4329_v44, 0 }
 0x19f   : > { %1145 = vst [vmem:[#allocation2 + $0x170] sm:$0xff] %v1143_v29  ;;  %v644_v29 = vld [vmem:[#allocation6 + $0x5] ss:$8 sm:$0xf] }
 0x1a0   : > { %724 = vst [vmem:[#allocation2 + $0x70] sm:$0xff] %v722_v50  ;;  %v1075_v50 = vperm.slane %v4329_v44, 1 }
 0x1a1   : > { %725 = vst [vmem:[#allocation2 + $0x78] sm:$0xff] %v723_v51  ;;  %v4314_v35 = vpop.permute.xlu0 %566  ;;  %v669_v56 = vpop.permute.xlu1 %668  ;;  %v616_v51 = vperm.slane %v4326_v22, 2 }
 0x1a2   : > { %1184 = vst [vmem:[#allocation2 + $0x198] sm:$0xff] %v1182_v46  ;;  %v671_v1 = vsel %vm670_vm14, %v4177_v43, %v669_v56  ;;  %v674_v30 = vsel %vm670_vm14, %v669_v56, %v4147_v12  ;;  %v4324_v8 = vpop.permute.xlu2 %538  ;;  %v3171_v43 = vld [vmem:[#allocation2 + $0x160] sm:$0xf]  ;;  %v924_v12 = vperm.slane %v4041_v9, 3  ;;  %v615_v46 = vperm.slane %v4326_v22, 1 }
 0x1a3   : > { %v686_v49 = vmul.f32 %v678_v52, %v674_v30  ;;  %v689_v27 = vmul.f32 %v681_v54, %v671_v1  ;;  %v1160_v10 = vmul.f32 %v1152_v61, %v671_v1  ;;  %v1161_v58 = vmul.f32 %v1153_v36, %v674_v30 }
 0x1a4   : > { %v647_v1 = vperm.slane %v644_v29, 1 }
 0x1a5   : > { %v690_v37 = vpack.c.bf16 %v687_v57, %v686_v49  ;;  %v691_v11 = vpack.c.bf16 %v689_v27, %v688_v0  ;;  %v1163_v2 = vpack.c.bf16 %v1161_v58, %v1160_v10  ;;  %v648_v0 = vperm.slane %v644_v29, 2 }
 0x1a6   : > { %v3469_v32 = vld [vmem:[#allocation2 + $0x16c] sm:$0xf0]  ;;  %v3173_v60 = vld [vmem:[#allocation2 + $0x170] sm:$0xf0]  ;;  %v646_v27 = vperm.slane %v644_v29, 0  ;;  %v649_v10 = vperm.slane %v644_v29, 3 }
 0x1a7   : > { %692 = vst [vmem:[#allocation2 + $0x60] sm:$0xff] %v690_v37  ;;  %v3172_v33 = vor.u32 %v3469_v32, %v3171_v43  ;;  %v3176_v41 = vor.u32 %v3467_v42, %v3173_v60  ;;  %v1133_v37 = vperm.slane %v4279_v28, 2  ;;  %v3045_v60 = vld [vmem:[#allocation2 + $0x70] sm:$0xf0] }
 0x1a8   : > { %693 = vst [vmem:[#allocation2 + $0x68] sm:$0xff] %v691_v11  ;;  %v4358_v11 = vld [vmem:[#allocation6 + $0x45] ss:$8 sm:$0xf] }
 0x1a9   : > { %1165 = vst [vmem:[#allocation2 + $0x188] sm:$0xff] %v1163_v2  ;;  %v912_v52 = vpop.permute.xlu0 %911  ;;  %v537_v54 = vpop.permute.xlu1 %536  ;;  %1575 = vmatpush.bf16.msra.mxu1 %v3172_v33  ;;  %1601 = vmatpush.bf16.msra.mxu3 %v3176_v41  ;;  %v3437_v2 = vld [vmem:[#allocation2 + $0x6c] sm:$0xf0]  ;;  %v656_v41 = vmul.f32 %v648_v0, %v4289_v62  ;;  %v1093_v29 = vperm.slane %v4358_v11, 0 }
 0x1aa   : > { %v914_v9 = vsel %vm913_vm7, %v4055_v13, %v912_v52  ;;  %v917_v61 = vsel %vm913_vm7, %v912_v52, %v4025_v4  ;;  %v4346_v36 = vsel %vm5186_vm3, %v537_v54, %v4324_v8  ;;  %v4351_v56 = vsel %vm5186_vm3, %v4293_v3, %v537_v54  ;;  %v4353_v57 = vpop.permute.xlu2 %570 }
 0x1ab   : > { %v931_v30 = vmul.f32 %v923_v31, %v914_v9  ;;  %v932_v13 = vmul.f32 %v924_v12, %v917_v61  ;;  %v1082_v49 = vmul.f32 %v1074_v47, %v4351_v56  ;;  %v1083_v4 = vmul.f32 %v1075_v50, %v4346_v36 }
 0x1ac   : > { %v1134_v31 = vperm.slane %v4279_v28, 3  ;;  %v1094_v47 = vperm.slane %v4358_v11, 1  ;;  %v614_v50 = vperm.slane %v4326_v22, 0  ;;  %v655_v52 = vmul.f32 %v647_v1, %v4302_v16 }
 0x1ad   : > { %v934_v58 = vpack.c.bf16 %v932_v13, %v931_v30  ;;  %v1086_v43 = vpack.c.bf16 %v1083_v4, %v1082_v49  ;;  %v617_v61 = vperm.slane %v4326_v22, 3  ;;  %v1114_v28 = vperm.slane %v4258_v59, 2 }
 0x1ae   : > { %v3043_v32 = vld [vmem:[#allocation2 + $0x60] sm:$0xf]  ;;  %v3435_v42 = vld [vmem:[#allocation2 + $0x64] sm:$0xf]  ;;  %v1115_v30 = vperm.slane %v4258_v59, 3 }
 0x1af   : > { %936 = vst [vmem:[#allocation2 + $0xe8] sm:$0xff] %v934_v58  ;;  %v3044_v12 = vor.u32 %v3437_v2, %v3043_v32  ;;  %v3048_v33 = vor.u32 %v3435_v42, %v3045_v60  ;;  %v623_v58 = vmul.f32 %v615_v46, %v4277_v26  ;;  %v955_v46 = vperm.slane %v4064_v19, 2 }
 0x1b0   : > { %1088 = vst [vmem:[#allocation2 + $0x140] sm:$0xff] %v1086_v43 }
 0x1b1   : > { %v637_v54 = vpop.permute.xlu0 %636  ;;  %v569_v9 = vpop.permute.xlu1 %568  ;;  %1562 = vmatpush.bf16.msra.mxu0 %v3044_v12  ;;  %1588 = vmatpush.bf16.msra.mxu2 %v3048_v33 }
 0x1b2   : > { %v639_v62 = vsel %vm638_vm2, %v4270_v23, %v637_v54  ;;  %v642_v0 = vsel %vm638_vm2, %v637_v54, %v4295_v6  ;;  %v4379_v16 = vsel %vm5196_vm4, %v569_v9, %v4353_v57  ;;  %v4384_v22 = vsel %vm5196_vm4, %v4314_v35, %v569_v9  ;;  %v605_v59 = vpop.permute.xlu2 %604  ;;  %v4406_v54 = vld [vmem:[#allocation6 + $0x42] ss:$8 sm:$0xf] }
 0x1b3   : > { %v654_v1 = vmul.f32 %v646_v27, %v642_v0  ;;  %v657_v13 = vmul.f32 %v649_v10, %v639_v62  ;;  %v1141_v49 = vmul.f32 %v1133_v37, %v639_v62  ;;  %v1142_v4 = vmul.f32 %v1134_v31, %v642_v0 }
 0x1b4   : > { %v624_v23 = vmul.f32 %v616_v51, %v4266_v18  ;;  %v1101_v6 = vmul.f32 %v1093_v29, %v4384_v22  ;;  %v1102_v2 = vmul.f32 %v1094_v47, %v4379_v16  ;;  %v607_v60 = vsel %vm606_vm1, %v4250_v53, %v605_v59 }
 0x1b5   : > { %v658_v43 = vpack.c.bf16 %v655_v52, %v654_v1  ;;  %v659_v32 = vpack.c.bf16 %v657_v13, %v656_v41  ;;  %v1144_v42 = vpack.c.bf16 %v1142_v4, %v1141_v49  ;;  %v610_v27 = vsel %vm606_vm1, %v605_v59, %v4272_v24 }
 0x1b6   : > { %v1105_v12 = vpack.c.bf16 %v1102_v2, %v1101_v6  ;;  %v625_v10 = vmul.f32 %v617_v61, %v607_v60  ;;  %v1122_v18 = vmul.f32 %v1114_v28, %v607_v60  ;;  %v622_v26 = vmul.f32 %v614_v50, %v610_v27  ;;  %v4409_v61 = vld [vmem:[#allocation6 + $0x2] ss:$8 sm:$0xf] }
 0x1b7   : > { %660 = vst [vmem:[#allocation2 + $0x50] sm:$0xff] %v658_v43  ;;  %v1123_v51 = vmul.f32 %v1115_v30, %v610_v27  ;;  %v956_v37 = vperm.slane %v4064_v19, 3  ;;  %v1036_v28 = vperm.slane %v4406_v54, 0  ;;  %v580_v30 = vld [vmem:[#allocation6 + $0x3] ss:$8 sm:$0xf] }
 0x1b8   : > { %661 = vst [vmem:[#allocation2 + $0x58] sm:$0xff] %v659_v32  ;;  %v627_v31 = vpack.c.bf16 %v625_v10, %v624_v23  ;;  %v626_v33 = vpack.c.bf16 %v623_v58, %v622_v26  ;;  %v3155_v62 = vld [vmem:[#allocation2 + $0x140] sm:$0xf]  ;;  %v3463_v0 = vld [vmem:[#allocation2 + $0x144] sm:$0xf]  ;;  %v551_v58 = vperm.slane %v4409_v61, 1 }
 0x1b9   : > { %1146 = vst [vmem:[#allocation2 + $0x178] sm:$0xff] %v1144_v42  ;;  %v1125_v41 = vpack.c.bf16 %v1123_v51, %v1122_v18  ;;  %v4398_v53 = vpop.permute.xlu0 %473  ;;  %v944_v29 = vpop.permute.xlu1 %943  ;;  %v583_v51 = vperm.slane %v580_v30, 1 }
 0x1ba   : > { %1107 = vst [vmem:[#allocation2 + $0x150] sm:$0xff] %v1105_v12  ;;  %v946_v24 = vsel %vm945_vm8, %v4078_v25, %v944_v29  ;;  %v949_v47 = vsel %vm945_vm8, %v944_v29, %v4057_v14  ;;  %v472_v50 = vpop.permute.xlu2 %471  ;;  %v1037_v25 = vperm.slane %v4406_v54, 1  ;;  %v552_v12 = vperm.slane %v4409_v61, 2 }
 0x1bb   : > { %628 = vst [vmem:[#allocation2 + $0x40] sm:$0xff] %v626_v33  ;;  %v963_v19 = vmul.f32 %v955_v46, %v946_v24  ;;  %v964_v52 = vmul.f32 %v956_v37, %v949_v47  ;;  %v4416_v14 = vsel %vm5187_vm5, %v472_v50, %v4398_v53  ;;  %v4431_v37 = vld [vmem:[#allocation6 + $0x43] ss:$8 sm:$0xf]  ;;  %v582_v33 = vperm.slane %v580_v30, 0 }
 0x1bc   : > { %629 = vst [vmem:[#allocation2 + $0x48] sm:$0xff] %v627_v31  ;;  %v1045_v27 = vmul.f32 %v1037_v25, %v4416_v14  ;;  %v584_v31 = vperm.slane %v580_v30, 2  ;;  %v559_v29 = vmul.f32 %v551_v58, %v4351_v56  ;;  %v560_v24 = vmul.f32 %v552_v12, %v4346_v36 }
 0x1bd   : > { %1127 = vst [vmem:[#allocation2 + $0x168] sm:$0xff] %v1125_v41  ;;  %v966_v9 = vpack.c.bf16 %v964_v52, %v963_v19  ;;  %v585_v41 = vperm.slane %v580_v30, 3  ;;  %v1095_v47 = vperm.slane %v4358_v11, 2  ;;  %v1056_v19 = vperm.slane %v4431_v37, 1 }
 0x1be   : > { %v3433_v59 = vld [vmem:[#allocation2 + $0x4c] sm:$0xf0]  ;;  %v3029_v23 = vld [vmem:[#allocation2 + $0x50] sm:$0xf0]  ;;  %v1055_v52 = vperm.slane %v4431_v37, 0  ;;  %v553_v25 = vperm.slane %v4409_v61, 3 }
 0x1bf   : > { %968 = vst [vmem:[#allocation2 + $0xf8] sm:$0xff] %v966_v9  ;;  %v550_v9 = vperm.slane %v4409_v61, 0 }
 0x1c1   : > { %v4418_v1 = vpop.permute.xlu0 %506  ;;  %v4420_v13 = vpop.permute.xlu1 %469  ;;  %v3465_v49 = vld [vmem:[#allocation2 + $0x14c] sm:$0xf0]  ;;  %v3157_v4 = vld [vmem:[#allocation2 + $0x150] sm:$0xf0] }
 0x1c2   : > { %v4426_v6 = vsel %vm5187_vm5, %v4420_v13, %v472_v50  ;;  %v3156_v2 = vor.u32 %v3465_v49, %v3155_v62  ;;  %v3160_v43 = vor.u32 %v3463_v0, %v3157_v4  ;;  %v505_v32 = vpop.permute.xlu2 %504  ;;  %v3027_v42 = vld [vmem:[#allocation2 + $0x40] sm:$0xf]  ;;  %v3431_v60 = vld [vmem:[#allocation2 + $0x44] sm:$0xf]  ;;  %v1096_v50 = vperm.slane %v4358_v11, 3 }
 0x1c3   : > { %v1044_v10 = vmul.f32 %v1036_v28, %v4426_v6  ;;  %v3028_v18 = vor.u32 %v3433_v59, %v3027_v42  ;;  %v3032_v26 = vor.u32 %v3431_v60, %v3029_v23  ;;  %v591_v28 = vmul.f32 %v583_v51, %v4384_v22 }
 0x1c4   : > { %1576 = vmatpush.bf16.msra.mxu1 %v3156_v2  ;;  %1602 = vmatpush.bf16.msra.mxu3 %v3160_v43  ;;  %v4446_v56 = vsel %vm5195_vm6, %v505_v32, %v4418_v1  ;;  %v1076_v11 = vperm.slane %v4329_v44, 2  ;;  %v1077_v62 = vperm.slane %v4329_v44, 3  ;;  %v592_v0 = vmul.f32 %v584_v31, %v4379_v16 }
 0x1c5   : > { %v1048_v46 = vpack.c.bf16 %v1045_v27, %v1044_v10  ;;  %1563 = vmatpush.bf16.msra.mxu0 %v3028_v18  ;;  %1589 = vmatpush.bf16.msra.mxu2 %v3032_v26  ;;  %v1064_v16 = vmul.f32 %v1056_v19, %v4446_v56  ;;  %v872_v51 = vperm.slane %v4106_v38, 2  ;;  %v840_v31 = vperm.slane %v4156_v21, 2 }
 0x1c7   : > { %1050 = vst [vmem:[#allocation2 + $0x120] sm:$0xff] %v1048_v46  ;;  %v873_v46 = vperm.slane %v4106_v38, 3 }
 0x1c9   : > { %v573_v36 = vpop.permute.xlu0 %572  ;;  %v4448_v30 = vpop.permute.xlu1 %502 }
 0x1ca   : > { %v575_v61 = vsel %vm5196_vm4, %v4353_v57, %v573_v36  ;;  %v578_v22 = vsel %vm5196_vm4, %v573_v36, %v4314_v35  ;;  %v4462_v59 = vsel %vm5195_vm6, %v4448_v30, %v505_v32  ;;  %v541_v49 = vpop.permute.xlu2 %540  ;;  %v809_v36 = vperm.slane %v4133_v5, 3 }
 0x1cb   : > { %v590_v4 = vmul.f32 %v582_v33, %v578_v22  ;;  %v593_v23 = vmul.f32 %v585_v41, %v575_v61  ;;  %v1103_v58 = vmul.f32 %v1095_v47, %v575_v61  ;;  %v1104_v44 = vmul.f32 %v1096_v50, %v578_v22 }
 0x1cc   : > { %v1063_v2 = vmul.f32 %v1055_v52, %v4462_v59  ;;  %v543_v57 = vsel %vm5186_vm3, %v4324_v8, %v541_v49  ;;  %v546_v35 = vsel %vm5186_vm3, %v541_v49, %v4293_v3  ;;  %v841_v3 = vperm.slane %v4156_v21, 3 }
 0x1cd   : > { %v594_v43 = vpack.c.bf16 %v591_v28, %v590_v4  ;;  %v595_v32 = vpack.c.bf16 %v593_v23, %v592_v0  ;;  %v1106_v42 = vpack.c.bf16 %v1104_v44, %v1103_v58  ;;  %v558_v60 = vmul.f32 %v550_v9, %v546_v35 }
 0x1ce   : > { %v1067_v12 = vpack.c.bf16 %v1064_v16, %v1063_v2  ;;  %v561_v27 = vmul.f32 %v553_v25, %v543_v57  ;;  %v1084_v10 = vmul.f32 %v1076_v11, %v543_v57  ;;  %v1085_v18 = vmul.f32 %v1077_v62, %v546_v35  ;;  %v3139_v11 = vld [vmem:[#allocation2 + $0x120] sm:$0xf]  ;;  %v3459_v49 = vld [vmem:[#allocation2 + $0x124] sm:$0xf] }
 0x1cf   : > { %596 = vst [vmem:[#allocation2 + $0x30] sm:$0xff] %v594_v43  ;;  %v562_v26 = vpack.c.bf16 %v559_v29, %v558_v60  ;;  %v484_v62 = vld [vmem:[#allocation6] ss:$8 sm:$0xf]  ;;  %vm5192_vm3 = vcmp.lt.s32.totalorder %v4039_v7, 120 }
 0x1d0   : > { %597 = vst [vmem:[#allocation2 + $0x38] sm:$0xff] %v595_v32  ;;  %v563_v8 = vpack.c.bf16 %v561_v27, %v560_v24  ;;  %v1087_v33 = vpack.c.bf16 %v1085_v18, %v1084_v10  ;;  %v488_v60 = vperm.slane %v484_v62, 2  ;;  %v486_v10 = vperm.slane %v484_v62, 0 }
 0x1d1   : > { %1108 = vst [vmem:[#allocation2 + $0x158] sm:$0xff] %v1106_v42  ;;  %v4476_v41 = vpop.permute.xlu0 %969  ;;  %v859_v47 = vpop.permute.xlu1 %858  ;;  %v1038_v18 = vperm.slane %v4406_v54, 2 }
 0x1d2   : > { %1069 = vst [vmem:[#allocation2 + $0x130] sm:$0xff] %v1067_v12  ;;  %v863_v29 = vsel %vm862_vm10, %v859_v47, %v4108_v39  ;;  %v864_v38 = vsel %vm862_vm10, %v4124_v55, %v859_v47  ;;  %v827_v50 = vpop.permute.xlu2 %826  ;;  %v808_v55 = vperm.slane %v4133_v5, 2  ;;  %v487_v12 = vperm.slane %v484_v62, 1 }
 0x1d3   : > { %564 = vst [vmem:[#allocation2 + $0x20] sm:$0xff] %v562_v26  ;;  %v880_v24 = vmul.f32 %v872_v51, %v864_v38  ;;  %v881_v19 = vmul.f32 %v873_v46, %v863_v29  ;;  %v831_v21 = vsel %vm830_vm13, %v827_v50, %v4154_v17  ;;  %v832_v52 = vsel %vm830_vm13, %v4172_v40, %v827_v50 }
 0x1d4   : > { %565 = vst [vmem:[#allocation2 + $0x28] sm:$0xff] %v563_v8  ;;  %v848_v9 = vmul.f32 %v840_v31, %v832_v52  ;;  %v849_v25 = vmul.f32 %v841_v3, %v831_v21  ;;  %v1039_v26 = vperm.slane %v4406_v54, 3  ;;  %v496_v8 = vmul.f32 %v488_v60, %v4416_v14 }
 0x1d5   : > { %1089 = vst [vmem:[#allocation2 + $0x148] sm:$0xff] %v1087_v33  ;;  %v883_v39 = vpack.c.bf16 %v881_v19, %v880_v24  ;;  %v495_v31 = vmul.f32 %v487_v12, %v4426_v6 }
 0x1d6   : > { %v851_v28 = vpack.c.bf16 %v849_v25, %v848_v9  ;;  %v3429_v0 = vld [vmem:[#allocation2 + $0x2c] sm:$0xf0]  ;;  %v3013_v17 = vld [vmem:[#allocation2 + $0x30] sm:$0xf0] }
 0x1d7   : > { %885 = vst [vmem:[#allocation2 + $0xc8] sm:$0xff] %v883_v39 }
 0x1d8   : > { %853 = vst [vmem:[#allocation2 + $0xb8] sm:$0xff] %v851_v28 }
 0x1d9   : > { %v4492_v61 = vpop.permute.xlu0 %1001  ;;  %v795_v22 = vpop.permute.xlu1 %794  ;;  %v3461_v40 = vld [vmem:[#allocation2 + $0x12c] sm:$0xf0]  ;;  %v3141_v4 = vld [vmem:[#allocation2 + $0x130] sm:$0xf0] }
 0x1da   : > { %v799_v23 = vsel %vm798_vm12, %v795_v22, %v4129_v63  ;;  %v800_v58 = vsel %vm798_vm12, %v4149_v15, %v795_v22  ;;  %v3140_v5 = vor.u32 %v3461_v40, %v3139_v11  ;;  %v3144_v44 = vor.u32 %v3459_v49, %v3141_v4  ;;  %v974_v16 = vpop.permute.xlu2 %973  ;;  %v3011_v2 = vld [vmem:[#allocation2 + $0x20] sm:$0xf]  ;;  %v3427_v57 = vld [vmem:[#allocation2 + $0x24] sm:$0xf] }
 0x1db   : > { %v816_v35 = vmul.f32 %v808_v55, %v800_v58  ;;  %v817_v43 = vmul.f32 %v809_v36, %v799_v23  ;;  %v3012_v32 = vor.u32 %v3429_v0, %v3011_v2  ;;  %v3016_v42 = vor.u32 %v3427_v57, %v3013_v17  ;;  %v983_v63 = vld [vmem:[#allocation6 + $0x40] ss:$8 sm:$0xf] }
 0x1dc   : > { %1577 = vmatpush.bf16.msra.mxu1 %v3140_v5  ;;  %1603 = vmatpush.bf16.msra.mxu3 %v3144_v44  ;;  %v489_v15 = vperm.slane %v484_v62, 3  ;;  %v985_v51 = vperm.slane %v983_v63, 0  ;;  %v986_v46 = vperm.slane %v983_v63, 1  ;;  %v987_v28 = vperm.slane %v983_v63, 2 }
 0x1dd   : > { %v819_v27 = vpack.c.bf16 %v817_v43, %v816_v35  ;;  %1564 = vmatpush.bf16.msra.mxu0 %v3012_v32  ;;  %1590 = vmatpush.bf16.msra.mxu2 %v3016_v42  ;;  %v988_v55 = vperm.slane %v983_v63, 3  ;;  %v776_v17 = vperm.slane %v4241_v48, 2  ;;  %v777_v22 = vperm.slane %v4241_v48, 3  ;;  %v516_v5 = vld [vmem:[#allocation6 + $0x1] ss:$8 sm:$0xf] }
 0x1de   : > { %v520_v60 = vperm.slane %v516_v5, 2  ;;  %v519_v12 = vperm.slane %v516_v5, 1 }
 0x1df   : > { %821 = vst [vmem:[#allocation2 + $0xa8] sm:$0xff] %v819_v27  ;;  %v518_v27 = vperm.slane %v516_v5, 0 }
 0x1e1   : > { %v476_v3 = vpop.permute.xlu0 %475  ;;  %v972_v33 = vpop.permute.xlu1 %971 }
 0x1e2   : > { %v480_v47 = vsel %vm5187_vm5, %v4398_v53, %v476_v3  ;;  %v483_v29 = vsel %vm5187_vm5, %v476_v3, %v4420_v13  ;;  %v979_v54 = vsel %vm5192_vm3, %v972_v33, %v974_v16  ;;  %v980_v38 = vsel %vm5192_vm3, %v4476_v41, %v972_v33  ;;  %v4516_v14 = vpop.permute.xlu2 %1005  ;;  %v4518_v53 = vld [vmem:[#allocation6 + $0x41] ss:$8 sm:$0xf] }
 0x1e3   : > { %v494_v6 = vmul.f32 %v486_v10, %v483_v29  ;;  %v497_v50 = vmul.f32 %v489_v15, %v480_v47  ;;  %v1046_v24 = vmul.f32 %v1038_v18, %v480_v47  ;;  %v1047_v19 = vmul.f32 %v1039_v26, %v483_v29 }
 0x1e4   : > { %v993_v21 = vmul.f32 %v985_v51, %v980_v38  ;;  %v994_v52 = vmul.f32 %v986_v46, %v979_v54  ;;  %vm5194_vm5 = vcmp.lt.s32.totalorder %v4039_v7, 119  ;;  %v1017_v36 = vperm.slane %v4518_v53, 0  ;;  %v3454_v54 = vld [vmem:[#allocation2 + $0xf4] sm:$0xf0] }
 0x1e5   : > { %v498_v9 = vpack.c.bf16 %v495_v31, %v494_v6  ;;  %v499_v25 = vpack.c.bf16 %v497_v50, %v496_v8  ;;  %v1049_v13 = vpack.c.bf16 %v1047_v19, %v1046_v24  ;;  %v1018_v11 = vperm.slane %v4518_v53, 1 }
 0x1e6   : > { %v997_v39 = vpack.c.bf16 %v994_v52, %v993_v21  ;;  %v521_v10 = vperm.slane %v516_v5, 3  ;;  %v1057_v15 = vperm.slane %v4431_v37, 2  ;;  %v1058_v18 = vperm.slane %v4431_v37, 3  ;;  %v4556_v37 = vld [vmem:[%s5167_s4] sm:$0xff] }
 0x1e7   : > { %500 = vst [vmem:[#allocation2] sm:$0xff] %v498_v9  ;;  %v1431_v26 = vunpack.c.l.b16 %v4216_v20  ;;  %v527_v51 = vmul.f32 %v519_v12, %v4462_v59  ;;  %v1267_v38 = vunpack.c.h.b16 %v4556_v37  ;;  %v1020_v24 = vperm.slane %v4518_v53, 3 }
 0x1e8   : > { %501 = vst [vmem:[#allocation2 + $0x8] sm:$0xff] %v499_v25  ;;  %v3115_v25 = vld [vmem:[#allocation2 + $0xe8] sm:$0xf] }
 0x1e9   : > { %1051 = vst [vmem:[#allocation2 + $0x128] sm:$0xff] %v1049_v13  ;;  %v976_v62 = vpop.permute.xlu0 %975  ;;  %v1004_v0 = vpop.permute.xlu1 %1003  ;;  %v1432_v13 = vunpack.c.h.b16 %v4216_v20 }
 0x1ea   : > { %999 = vst [vmem:[#allocation2 + $0x100] sm:$0xff] %v997_v39  ;;  %v978_v40 = vsel %vm5192_vm3, %v974_v16, %v976_v62  ;;  %v981_v49 = vsel %vm5192_vm3, %v976_v62, %v4476_v41  ;;  %v1011_v4 = vsel %vm5194_vm5, %v1004_v0, %v4516_v14  ;;  %v1012_v23 = vsel %vm5194_vm5, %v4492_v61, %v1004_v0  ;;  %v763_v58 = vpop.permute.xlu2 %762  ;;  %v3099_v62 = vld [vmem:[#allocation2 + $0xc8] sm:$0xf] }
 0x1eb   : > { %v995_v44 = vmul.f32 %v987_v28, %v978_v40  ;;  %v996_v48 = vmul.f32 %v988_v55, %v981_v49  ;;  %v1025_v2 = vmul.f32 %v1017_v36, %v1012_v23  ;;  %v1026_v57 = vmul.f32 %v1018_v11, %v1011_v4  ;;  %v3195_v0 = vld [vmem:[#allocation2 + $0x188] sm:$0xf]  ;;  %v3474_v40 = vld [vmem:[#allocation2 + $0x194] sm:$0xf0] }
 0x1ec   : > { %v767_v16 = vsel %vm766_vm0, %v763_v58, %v4225_v34  ;;  %v768_v41 = vsel %vm766_vm0, %v4237_v45, %v763_v58  ;;  %v528_v45 = vmul.f32 %v520_v60, %v4446_v56  ;;  %v3116_v28 = vor.u32 %v3454_v54, %v3115_v25  ;;  %v3179_v49 = vld [vmem:[#allocation2 + $0x168] sm:$0xf]  ;;  %v3470_v4 = vld [vmem:[#allocation2 + $0x174] sm:$0xf0]  ;;  %v3464_v25 = vld [vmem:[#allocation2 + $0x14c] sm:$0xf] }
 0x1ed   : > { %v998_v35 = vpack.c.bf16 %v996_v48, %v995_v44  ;;  %v1029_v43 = vpack.c.bf16 %v1026_v57, %v1025_v2  ;;  %v784_v32 = vmul.f32 %v776_v17, %v768_v41  ;;  %v785_v42 = vmul.f32 %v777_v22, %v767_v16  ;;  %v3450_v22 = vld [vmem:[#allocation2 + $0xd4] sm:$0xf0]  ;;  %v3083_v48 = vld [vmem:[#allocation2 + $0xa8] sm:$0xf]  ;;  %v3117_v2 = vld [vmem:[#allocation2 + $0xf8] sm:$0xf0] }
 0x1ee   : > { %v4562_v55 = vpack.c.b16 %v1267_v38, %v1267_v38  ;;  %vm5193_vm3 = vcmask 719872   ;;  %v1266_v23 = vunpack.c.l.b16 %v4556_v37  ;;  %v3196_v5 = vor.u32 %v3474_v40, %v3195_v0  ;;  %v2995_v44 = vld [vmem:[#allocation2] sm:$0xf]  ;;  %v3423_v16 = vld [vmem:[#allocation2 + $0x4] sm:$0xf] }
 0x1ef   : > { %1000 = vst [vmem:[#allocation2 + $0x108] sm:$0xff] %v998_v35  ;;  %v787_v63 = vpack.c.bf16 %v785_v42, %v784_v32  ;;  %v3452_v32 = vld [vmem:[#allocation2 + $0xec] sm:$0xf]  ;;  %v3446_v42 = vld [vmem:[#allocation2 + $0xb4] sm:$0xf0] }
 0x1f0   : > { %1031 = vst [vmem:[#allocation2 + $0x110] sm:$0xff] %v1029_v43  ;;  %v3120_v60 = vor.u32 %v3452_v32, %v3117_v2  ;;  %v3067_v37 = vld [vmem:[#allocation2 + $0x88] sm:$0xf] }
 0x1f1   : > { %789 = vst [vmem:[#allocation2 + $0x98] sm:$0xff] %v787_v63  ;;  %v509_v34 = vpop.permute.xlu1 %508  ;;  %v3123_v6 = vld [vmem:[#allocation2 + $0x100] sm:$0xf]  ;;  %v3455_v50 = vld [vmem:[#allocation2 + $0x104] sm:$0xf]  ;;  %v3084_v63 = vor.u32 %v3446_v42, %v3083_v48 }
 0x1f2   : > { %v511_v46 = vsel %vm5195_vm6, %v4418_v1, %v509_v34  ;;  %v514_v8 = vsel %vm5195_vm6, %v509_v34, %v4448_v30  ;;  %v1019_v1 = vperm.slane %v4518_v53, 2  ;;  %v1487_v30 = vpack.c.b16 %v1431_v26, %v1431_v26  ;;  %v3472_v34 = vld [vmem:[#allocation2 + $0x18c] sm:$0xf]  ;;  %v3051_v54 = vld [vmem:[#allocation2 + $0x68] sm:$0xf] }
 0x1f3   : > { %v526_v31 = vmul.f32 %v518_v27, %v514_v8  ;;  %v529_v3 = vmul.f32 %v521_v10, %v511_v46  ;;  %v1065_v33 = vmul.f32 %v1057_v15, %v511_v46  ;;  %v1066_v47 = vmul.f32 %v1058_v18, %v514_v8  ;;  %v3466_v15 = vld [vmem:[#allocation2 + $0x154] sm:$0xf0]  ;;  %v3448_v18 = vld [vmem:[#allocation2 + $0xcc] sm:$0xf]  ;;  %v3101_v46 = vld [vmem:[#allocation2 + $0xd8] sm:$0xf0] }
 0x1f4   : > { %v1553_v11 = vsel %vm1545_vm11, %v1487_v30, 0  ;;  %v4577_v27 = vpack.c.b16 %v1266_v23, %v1266_v23  ;;  %v3180_v10 = vor.u32 %v3470_v4, %v3179_v49  ;;  %v3197_v8 = vld [vmem:[#allocation2 + $0x198] sm:$0xf0]  ;;  %v3019_v49 = vld [vmem:[#allocation2 + $0x28] sm:$0xf] }
 0x1f5   : > { %v530_v56 = vpack.c.bf16 %v527_v51, %v526_v31  ;;  %v531_v29 = vpack.c.bf16 %v529_v3, %v528_v45  ;;  %v1068_v59 = vpack.c.bf16 %v1066_v47, %v1065_v33  ;;  %v3163_v45 = vld [vmem:[#allocation2 + $0x148] sm:$0xf]  ;;  %v1259_v51 = vld [vmem:[%s5168_s5] sm:$0xff]  ;;  %v3104_v31 = vor.u32 %v3448_v18, %v3101_v46  ;;  %v3430_v4 = vld [vmem:[#allocation2 + $0x34] sm:$0xf0] }
 0x1f6   : > { %v3200_v3 = vor.u32 %v3472_v34, %v3197_v8  ;;  %v3164_v47 = vor.u32 %v3466_v15, %v3163_v45  ;;  %1262 = vperm.xlu2 %3606, %v1259_v51   ;;  %v3460_v23 = vld [vmem:[#allocation2 + $0x12c] sm:$0xf]  ;;  %v3037_v48 = vld [vmem:[#allocation2 + $0x58] sm:$0xf0] }
 0x1f7   : > { %532 = vst [vmem:[#allocation2 + $0x10] sm:$0xff] %v530_v56  ;;  %v3457_v19 = vld [vmem:[#allocation2 + $0x10c] sm:$0xf0]  ;;  %v3125_v21 = vld [vmem:[#allocation2 + $0x110] sm:$0xf0] }
 0x1f8   : > { %533 = vst [vmem:[#allocation2 + $0x18] sm:$0xff] %v531_v29  ;;  %v3124_v52 = vor.u32 %v3457_v19, %v3123_v6  ;;  %v3128_v9 = vor.u32 %v3455_v50, %v3125_v21  ;;  %v3442_v26 = vld [vmem:[#allocation2 + $0x94] sm:$0xf0]  ;;  %v3444_v56 = vld [vmem:[#allocation2 + $0xac] sm:$0xf] }
 0x1f9   : > { %1070 = vst [vmem:[#allocation2 + $0x138] sm:$0xff] %v1068_v59  ;;  %v1008_v39 = vpop.permute.xlu1 %1007  ;;  %v3068_v33 = vor.u32 %v3442_v26, %v3067_v37  ;;  %v3468_v29 = vld [vmem:[#allocation2 + $0x16c] sm:$0xf]  ;;  %v3181_v59 = vld [vmem:[#allocation2 + $0x178] sm:$0xf0] }
 0x1fa   : > { %v1010_v36 = vsel %vm5194_vm5, %v4516_v14, %v1008_v39  ;;  %v1013_v53 = vsel %vm5194_vm5, %v1008_v39, %v4492_v61  ;;  %1578 = vmatpush.bf16.msra.mxu1 %v3124_v52  ;;  %1604 = vmatpush.bf16.msra.mxu3 %v3128_v9  ;;  %v1488_v14 = vpack.c.b16 %v1432_v13, %v1432_v13  ;;  %v3438_v6 = vld [vmem:[#allocation2 + $0x74] sm:$0xf0]  ;;  %v3147_v50 = vld [vmem:[#allocation2 + $0x128] sm:$0xf]  ;;  %v3069_v9 = vld [vmem:[#allocation2 + $0x98] sm:$0xf0] }
 0x1fb   : > { %v1027_v20 = vmul.f32 %v1019_v1, %v1010_v36  ;;  %v1028_v17 = vmul.f32 %v1020_v24, %v1013_v53  ;;  %v3100_v61 = vor.u32 %v3450_v22, %v3099_v62  ;;  %v3085_v1 = vld [vmem:[#allocation2 + $0xb8] sm:$0xf0]  ;;  %v3184_v24 = vor.u32 %v3468_v29, %v3181_v59  ;;  %v3434_v19 = vld [vmem:[#allocation2 + $0x54] sm:$0xf0]  ;;  %v3035_v39 = vld [vmem:[#allocation2 + $0x48] sm:$0xf] }
 0x1fc   : > { %v1556_v12 = vsel %vm1545_vm11, %v1488_v14, 0  ;;  %v3088_v30 = vor.u32 %v3444_v56, %v3085_v1  ;;  %v3052_v21 = vor.u32 %v3438_v6, %v3051_v54  ;;  %v3165_v13 = vld [vmem:[#allocation2 + $0x158] sm:$0xf0]  ;;  %v1699_v36 = vld [vmem:[%s5169_s6] sm:$0xff]  ;;  %v3440_v53 = vld [vmem:[#allocation2 + $0x8c] sm:$0xf] }
 0x1fd   : > { %v1030_v58 = vpack.c.bf16 %v1028_v17, %v1027_v20  ;;  %3202 = vmatmul.msk.bf16.vlgmr.msra.gmra.mxu3 %vm5193_vm3, %v4562_v55  ;;  %3201 = vmatmul.msk.bf16.vlgmr.msra.gmra.mxu1 %vm5193_vm3, %v4562_v55  ;;  %v3072_v62 = vor.u32 %v3440_v53, %v3069_v9  ;;  %v3168_v0 = vor.u32 %v3464_v25, %v3165_v13  ;;  %v3436_v22 = vld [vmem:[#allocation2 + $0x6c] sm:$0xf]  ;;  %v3053_v14 = vld [vmem:[#allocation2 + $0x78] sm:$0xf0] }
 0x1fe   : > { %1610 = vmatpush.bf16.msrb.mxu1 %v3116_v28  ;;  %1625 = vmatpush.bf16.msrb.mxu3 %v1553_v11  ;;  %v3425_v57 = vld [vmem:[#allocation2 + $0xc] sm:$0xf0]  ;;  %v2997_v41 = vld [vmem:[#allocation2 + $0x10] sm:$0xf0]  ;;  %v3131_v11 = vld [vmem:[#allocation2 + $0x108] sm:$0xf]  ;;  %v3036_v20 = vor.u32 %v3434_v19, %v3035_v39 }
 0x1ff   : > { %1032 = vst [vmem:[#allocation2 + $0x118] sm:$0xff] %v1030_v58  ;;  %v2996_v35 = vor.u32 %v3425_v57, %v2995_v44  ;;  %v3000_v43 = vor.u32 %v3423_v16, %v2997_v41  ;;  %1702 = vperm.xlu2 %3606, %v1699_v36   ;;  %v3056_v58 = vor.u32 %v3436_v22, %v3053_v14  ;;  %v3432_v44 = vld [vmem:[#allocation2 + $0x4c] sm:$0xf]  ;;  %v3426_v57 = vld [vmem:[#allocation2 + $0x14] sm:$0xf0]  ;;  %v1709_v16 = vld [vmem:[%s5170_s7] sm:$0xff] }
 0x200   : > { %v3462_v38 = vld [vmem:[#allocation2 + $0x134] sm:$0xf0]  ;;  %v3149_v40 = vld [vmem:[#allocation2 + $0x138] sm:$0xf0]  ;;  %v3456_v41 = vld [vmem:[#allocation2 + $0x10c] sm:$0xf] }
 0x201   : > { %1565 = vmatpush.bf16.msra.mxu0 %v2996_v35  ;;  %1591 = vmatpush.bf16.msra.mxu2 %v3000_v43  ;;  %v3148_v52 = vor.u32 %v3462_v38, %v3147_v50  ;;  %v3003_v35 = vld [vmem:[#allocation2 + $0x8] sm:$0xf]  ;;  %v3040_v43 = vor.u32 %v3432_v44, %v3037_v48  ;;  %v3424_v15 = vld [vmem:[#allocation2 + $0xc] sm:$0xf] }
 0x202   : > { %1611 = vmatpush.bf16.msrb.mxu1 %v3100_v61  ;;  %1626 = vmatpush.bf16.msrb.mxu3 %v3196_v5  ;;  %v3152_v61 = vor.u32 %v3460_v23, %v3149_v40  ;;  %v3020_v5 = vor.u32 %v3430_v4, %v3019_v49  ;;  %v3004_v42 = vor.u32 %v3426_v57, %v3003_v35 }
 0x204   : > { %1592 = vmatmul.bf16.vlgmr.msra.gmra.mxu2 %v4577_v27  ;;  %1566 = vmatmul.bf16.vlgmr.msra.gmra.mxu0 %v4577_v27 }
 0x205   : > { %1636 = vmatpush.bf16.msrb.mxu0 %v3120_v60  ;;  %1651 = vmatpush.bf16.msrb.mxu2 %v1556_v12  ;;  %v3428_v60 = vld [vmem:[#allocation2 + $0x2c] sm:$0xf]  ;;  %v3021_v12 = vld [vmem:[#allocation2 + $0x38] sm:$0xf0] }
 0x206   : > { %1612 = vmatpush.bf16.msrb.mxu1 %v3084_v63  ;;  %1627 = vmatpush.bf16.msrb.mxu3 %v3180_v10  ;;  %v3458_v28 = vld [vmem:[#allocation2 + $0x114] sm:$0xf0]  ;;  %v3133_v2 = vld [vmem:[#allocation2 + $0x118] sm:$0xf0]  ;;  %v3024_v63 = vor.u32 %v3428_v60, %v3021_v12 }
 0x207   : > { %v3132_v17 = vor.u32 %v3458_v28, %v3131_v11  ;;  %v3136_v32 = vor.u32 %v3456_v41, %v3133_v2  ;;  %1712 = vperm.xlu2 %3606, %v1709_v16   ;;  %v3005_v10 = vld [vmem:[#allocation2 + $0x18] sm:$0xf0] }
 0x208   : > { %v3008_v18 = vor.u32 %v3424_v15, %v3005_v10 }
 0x209   : > { %1637 = vmatpush.bf16.msrb.mxu0 %v3104_v31  ;;  %1652 = vmatpush.bf16.msrb.mxu2 %v3200_v3 }
 0x20a   : > { %1613 = vmatpush.bf16.msrb.mxu1 %v3068_v33  ;;  %1628 = vmatpush.bf16.msrb.mxu3 %v3164_v47 }
 0x20d   : > { %1638 = vmatpush.bf16.msrb.mxu0 %v3088_v30  ;;  %1653 = vmatpush.bf16.msrb.mxu2 %v3184_v24 }
 0x20e   : > { %1614 = vmatpush.bf16.msrb.mxu1 %v3052_v21  ;;  %1629 = vmatpush.bf16.msrb.mxu3 %v3148_v52 }
 0x211   : > { %1639 = vmatpush.bf16.msrb.mxu0 %v3072_v62  ;;  %1654 = vmatpush.bf16.msrb.mxu2 %v3168_v0 }
 0x212   : > { %1615 = vmatpush.bf16.msrb.mxu1 %v3036_v20  ;;  %1630 = vmatpush.bf16.msrb.mxu3 %v3132_v17 }
 0x215   : > { %1640 = vmatpush.bf16.msrb.mxu0 %v3056_v58  ;;  %1655 = vmatpush.bf16.msrb.mxu2 %v3152_v61 }
 0x216   : > { %1616 = vmatpush.bf16.msrb.mxu1 %v3020_v5  ;;  %3203 = vmatmul.msk.bf16.vlgmr.msrb.gmra.mxu3 %vm5193_vm3, %v4562_v55 }
 0x219   : > { %1641 = vmatpush.bf16.msrb.mxu0 %v3040_v43  ;;  %1656 = vmatpush.bf16.msrb.mxu2 %v3136_v32 }
 0x21a   : > { %1617 = vmatpush.bf16.msrb.mxu1 %v3004_v42 }
 0x21c   : > { %3204 = vmatmul.msk.bf16.vlgmr.msrb.gmra.mxu2 %vm5193_vm3, %v4562_v55 }
 0x21d   : > { %1618 = vmatmul.bf16.vlgmr.msrb.gmra.mxu1 %v4577_v27  ;;  %1642 = vmatpush.bf16.msrb.mxu0 %v3024_v63 }
 0x221   : > { %1643 = vmatpush.bf16.msrb.mxu0 %v3008_v18  ;;  %v2121_v18 = vld [vmem:[#allocation6 + $0x25] ss:$8 sm:$0xf] }
 0x224   : > { %1644 = vmatmul.bf16.vlgmr.msrb.gmra.mxu0 %v4577_v27 }
 0x250   : > { %v1263_v3 = vpop.permute.xlu2 %1262 }
 0x259   : > { %v1703_v61 = vpop.permute.xlu2 %1702 }
 0x27a   : > { %v1580_v34 = vpop.f32.mrf.mxu1 }
 0x280   : > { %v1606_v26 = vpop.f32.mrf.mxu3 }
 0x281   : > { %v1567_v45 = vpop.f32.mrf.mxu0 }
 0x282   : > { %v1582_v51 = vpop.f32.mrf.mxu1  ;;  %v1568_v33 = vadd.f32 %v1567_v45, %v1263_v3 }
 0x284   : > { %v1581_v59 = vadd.f32 %v1580_v34, %v1568_v33  ;;  %v1713_v34 = vpop.permute.xlu2 %1712 }
 0x286   : > { %v1667_v6 = vmul.f32 %v1581_v59, %v1581_v59 }
 0x287   : > { %v1593_v46 = vpop.f32.mrf.mxu2 }
 0x288   : > { %v1608_v8 = vpop.f32.mrf.mxu3  ;;  %v1594_v55 = vadd.f32 %v1593_v46, %v1263_v3 }
 0x289   : > { %v1569_v37 = vpop.f32.mrf.mxu0  ;;  %v2123_v8 = vperm.slane %v2121_v18, 0 }
 0x28a   : > { %v1607_v54 = vadd.f32 %v1606_v26, %v1594_v55  ;;  %v2124_v37 = vperm.slane %v2121_v18, 1 }
 0x28c   : > { %v1668_v27 = vmul.f32 %v1607_v54, %v1607_v54  ;;  %v1662_v52 = vadd.f32 %v1607_v54, %v1581_v59 }
 0x28e   : > { %v1671_v13 = vadd.f32 %v1668_v27, %v1667_v6 }
 0x28f   : > { %v1595_v31 = vpop.f32.mrf.mxu2 }
 0x290   : > { %v2125_v31 = vperm.slane %v2121_v18, 2 }
 0x299   : > { %v1632_v47 = vpop.f32.mrf.mxu3 }
 0x29a   : > { %v1619_v56 = vpop.f32.mrf.mxu1 }
 0x29b   : > { %v1620_v29 = vadd.f32 %v1619_v56, %v1263_v3 }
 0x29d   : > { %v1633_v38 = vadd.f32 %v1632_v47, %v1620_v29 }
 0x29f   : > { %v1658_v1 = vpop.f32.mrf.mxu2  ;;  %v1669_v24 = vmul.f32 %v1633_v38, %v1633_v38  ;;  %v1663_v25 = vadd.f32 %v1662_v52, %v1633_v38  ;;  %v4688_v52 = vld [vmem:[#allocation6 + $0x26] ss:$8 sm:$0xf] }
 0x2a1   : > { %v1634_v50 = vpop.f32.mrf.mxu3  ;;  %v1645_v30 = vpop.f32.mrf.mxu0  ;;  %v1672_v36 = vadd.f32 %v1671_v13, %v1669_v24 }
 0x2a2   : > { %v1621_v19 = vpop.f32.mrf.mxu1  ;;  %v1646_v21 = vadd.f32 %v1645_v30, %v1263_v3  ;;  %v2126_v3 = vperm.slane %v2121_v18, 3 }
 0x2a4   : > { %v1659_v9 = vadd.f32 %v1658_v1, %v1646_v21 }
 0x2a6   : > { %v1664_v39 = vadd.f32 %v1663_v25, %v1659_v9  ;;  %v1670_v28 = vmul.f32 %v1659_v9, %v1659_v9  ;;  %v2154_v25 = vperm.slane %v4688_v52, 1 }
 0x2a7   : > { %v1660_v53 = vpop.f32.mrf.mxu2 }
 0x2a8   : > { %1665 = vadd.xlane.f32.xlu0 %v1664_v39  ;;  %v1673_v11 = vadd.f32 %v1672_v36, %v1670_v28 }
 0x2a9   : > { %v1647_v62 = vpop.f32.mrf.mxu0 }
 0x2aa   : > { %1674 = vadd.xlane.f32.xlu1 %v1673_v11  ;;  %v4706_v11 = vld [vmem:[#allocation6 + $0x27] ss:$8 sm:$0xf] }
 0x31b   : > { %v1666_v0 = vpop.xlane.xlu0 %1665 }
 0x31c   : > { %v1676_v20 = vmul.f32 0.001953125, %v1666_v0  ;;  %v2183_v0 = vperm.slane %v4706_v11, 0 }
 0x31d   : > { %v1675_v17 = vpop.xlane.xlu1 %1674 }
 0x31e   : > { %v1677_v22 = vmul.f32 0.001953125, %v1675_v17  ;;  %v1678_v40 = vmul.f32 %v1676_v20, %v1676_v20  ;;  %v1680_v2 = vsub.f32 %v1581_v59, %v1676_v20  ;;  %v1681_v57 = vsub.f32 %v1607_v54, %v1676_v20 }
 0x31f   : > { %v1682_v16 = vsub.f32 %v1633_v38, %v1676_v20  ;;  %v1683_v41 = vsub.f32 %v1659_v9, %v1676_v20  ;;  %v2153_v9 = vperm.slane %v4688_v52, 0  ;;  %v2184_v20 = vperm.slane %v4706_v11, 1 }
 0x320   : > { %v1679_v49 = vsub.f32 %v1677_v22, %v1678_v40 }
 0x322   : > { %v1684_v4 = vadd.f32 1e-05, %v1679_v49 }
 0x324   : > { %3610 = vrsqrt.f32 %v1684_v4  ;;  %vm1691_vm5 = vweird.f32 %v1684_v4 }
 0x32a   : > { %v3611_v14 = vpop.eup %3610 }
 0x32b   : > { %v1686_v23 = vmul.f32 %v3611_v14, %v1684_v4  ;;  %vm1692_vm3 = vweird.f32 %v3611_v14 }
 0x32c   : > { %vm1693_vm6 = vmor %vm1691_vm5, %vm1692_vm3 }
 0x32d   : > { %v1687_v58 = vmul.f32 %v3611_v14, %v1686_v23 }
 0x32f   : > { %v1688_v5 = vmul.f32 0.5, %v1687_v58 }
 0x331   : > { %v1689_v44 = vsub.f32 1.5, %v1688_v5 }
 0x333   : > { %v1690_v48 = vmul.f32 %v3611_v14, %v1689_v44 }
 0x335   : > { %v1694_v35 = vsel %vm1693_vm6, %v3611_v14, %v1690_v48  ;;  %v4736_v48 = vld [vmem:[#allocation6 + $0x24] ss:$8 sm:$0xf] }
 0x336   : > { %v1695_v43 = vmul.f32 %v1694_v35, %v1680_v2  ;;  %v1696_v32 = vmul.f32 %v1694_v35, %v1681_v57  ;;  %v1697_v42 = vmul.f32 %v1694_v35, %v1682_v16  ;;  %v1698_v60 = vmul.f32 %v1694_v35, %v1683_v41 }
 0x337   : > { %v2105_v35 = vperm.slane %v4736_v48, 0 }
 0x338   : > { %v1705_v12 = vmul.f32 %v1703_v61, %v1695_v43  ;;  %v1706_v63 = vmul.f32 %v1703_v61, %v1696_v32  ;;  %v1707_v10 = vmul.f32 %v1703_v61, %v1697_v42  ;;  %v1708_v15 = vmul.f32 %v1703_v61, %v1698_v60 }
 0x339   : > { %v2106_v42 = vperm.slane %v4736_v48, 1 }
 0x33a   : > { %v1715_v26 = vadd.f32 %v1713_v34, %v1705_v12  ;;  %v1716_v45 = vadd.f32 %v1713_v34, %v1706_v63  ;;  %v1717_v51 = vadd.f32 %v1713_v34, %v1707_v10  ;;  %v1718_v46 = vadd.f32 %v1713_v34, %v1708_v15 }
 0x33c   : > { %vm1719_vm3 = vcmp.ge.f32.partialorder %v1715_v26, 0.0  ;;  %vm1720_vm5 = vcmp.ge.f32.partialorder %v1716_v45, 0.0  ;;  %vm1721_vm6 = vcmp.ge.f32.partialorder %v1717_v51, 0.0  ;;  %vm1722_vm4 = vcmp.ge.f32.partialorder %v1718_v46, 0.0 }
 0x33d   : > { %v1723_v33 = vmul.f32 0.01, %v1715_v26  ;;  %v1724_v55 = vmul.f32 0.01, %v1716_v45  ;;  %v1725_v47 = vmul.f32 0.01, %v1717_v51 }
 0x33e   : > { %v1726_v56 = vmul.f32 0.01, %v1718_v46 }
 0x33f   : > { %v4596_v29 = vsel %vm1719_vm3, %v1715_v26, %v1723_v33  ;;  %v4598_v59 = vsel %vm1720_vm5, %v1716_v45, %v1724_v55  ;;  %v4600_v54 = vsel %vm1721_vm6, %v1717_v51, %v1725_v47  ;;  %v4758_v26 = vld [vmem:[#allocation6 + $0x22] ss:$8 sm:$0xf]  ;;  %vm5223_vm3 = vcmp.lt.s32.totalorder %v4039_v7, 72 }
 0x340   : > { %v4602_v38 = vsel %vm1722_vm4, %v1718_v46, %v1726_v56  ;;  %2173 = vrot.lane.b32.xlu1 %v4600_v54, %s3753_s28  ;;  %2169 = vrot.lane.b32.xlu0 %v4596_v29, %s3753_s28  ;;  %v2131_v1 = vmul.f32 %v2123_v8, %v4596_v29  ;;  %v2132_v6 = vmul.f32 %v2124_v37, %v4598_v59  ;;  %v2045_v51 = vperm.slane %v4758_v26, 0  ;;  %v4778_v56 = vld [vmem:[#allocation6 + $0x23] ss:$8 sm:$0xf]  ;;  %vm5224_vm5 = vmmov %vm5223_vm3 }
 0x341   : > { %2139 = vrot.lane.b32.xlu2 %v4596_v29, %s3752_s11  ;;  %v2133_v27 = vmul.f32 %v2125_v31, %v4600_v54  ;;  %v2134_v50 = vmul.f32 %v2126_v3, %v4602_v38  ;;  %v2046_v46 = vperm.slane %v4758_v26, 1  ;;  %vm5225_vm6 = vcmp.lt.s32.totalorder %v4039_v7, 73 }
 0x342   : > { %v2135_v30 = vpack.c.bf16 %v2132_v6, %v2131_v1 }
 0x343   : > { %v2136_v24 = vpack.c.bf16 %v2134_v50, %v2133_v27 }
 0x344   : > { %2137 = vst [vmem:[#allocation2 + $0xd0] sm:$0xff] %v2135_v30 }
 0x345   : > { %2138 = vst [vmem:[#allocation2 + $0xd8] sm:$0xff] %v2136_v24  ;;  %v2075_v24 = vperm.slane %v4778_v56, 0 }
 0x348   : > { %2037 = vrot.lane.b32.xlu1 %v4602_v38, %s3755_s23  ;;  %2097 = vrot.lane.b32.xlu0 %v4602_v38, %s5197_s26 }
 0x349   : > { %2141 = vrot.lane.b32.xlu2 %v4598_v59, %s3752_s11 }
 0x34b   : > { %v3501_v6 = vld [vmem:[#allocation2 + $0xcc] sm:$0xf0]  ;;  %v3305_v30 = vld [vmem:[#allocation2 + $0xd0] sm:$0xf0] }
 0x350   : > { %2067 = vrot.lane.b32.xlu1 %v4602_v38, %s3757_s24  ;;  %2033 = vrot.lane.b32.xlu0 %v4598_v59, %s3755_s23 }
 0x351   : > { %2143 = vrot.lane.b32.xlu2 %v4600_v54, %s3752_s11 }
 0x358   : > { %1975 = vrot.lane.b32.xlu1 %v4600_v54, %s3756_s19  ;;  %2063 = vrot.lane.b32.xlu0 %v4598_v59, %s3757_s24 }
 0x359   : > { %2171 = vrot.lane.b32.xlu2 %v4598_v59, %s3753_s28 }
 0x360   : > { %2003 = vrot.lane.b32.xlu1 %v4598_v59, %s3760_s1  ;;  %1973 = vrot.lane.b32.xlu0 %v4598_v59, %s3756_s19 }
 0x361   : > { %2091 = vrot.lane.b32.xlu2 %v4596_v29, %s5197_s26 }
 0x368   : > { %1913 = vrot.lane.b32.xlu1 %v4598_v59, %s5208_s29  ;;  %2001 = vrot.lane.b32.xlu0 %v4596_v29, %s3760_s1 }
 0x369   : > { %2093 = vrot.lane.b32.xlu2 %v4598_v59, %s5197_s26  ;;  %s5210_s26 = smov 63  }
 0x370   : > { %1943 = vrot.lane.b32.xlu1 %v4598_v59, %s3759_s22  ;;  %1911 = vrot.lane.b32.xlu0 %v4596_v29, %s5208_s29 }
 0x371   : > { %2031 = vrot.lane.b32.xlu2 %v4596_v29, %s3755_s23 }
 0x378   : > { %1945 = vrot.lane.b32.xlu1 %v4600_v54, %s3759_s22  ;;  %1941 = vrot.lane.b32.xlu0 %v4596_v29, %s3759_s22 }
 0x379   : > { %2061 = vrot.lane.b32.xlu2 %v4596_v29, %s3757_s24 }
 0x380   : > { %1857 = vrot.lane.b32.xlu1 %v4602_v38, %s5209_s21  ;;  %1915 = vrot.lane.b32.xlu0 %v4600_v54, %s5208_s29 }
 0x381   : > { %1971 = vrot.lane.b32.xlu2 %v4596_v29, %s3756_s19 }
 0x388   : > { %1887 = vrot.lane.b32.xlu1 %v4602_v38, %s5210_s26  ;;  %1853 = vrot.lane.b32.xlu0 %v4598_v59, %s5209_s21 }
 0x389   : > { %1977 = vrot.lane.b32.xlu2 %v4602_v38, %s3756_s19  ;;  %s5211_s19 = smov 65  }
 0x390   : > { %2145 = vrot.lane.b32.xlu1 %v4602_v38, %s3752_s11  ;;  %1883 = vrot.lane.b32.xlu0 %v4598_v59, %s5210_s26  ;;  %s5212_s11 = smov 120  }
 0x391   : > { %2007 = vrot.lane.b32.xlu2 %v4602_v38, %s3760_s1 }
 0x398   : > { %1793 = vrot.lane.b32.xlu1 %v4598_v59, %s3763_s30  ;;  %1885 = vrot.lane.b32.xlu0 %v4600_v54, %s5210_s26 }
 0x399   : > { %1917 = vrot.lane.b32.xlu2 %v4602_v38, %s5208_s29 }
 0x39b   : > { %v4680_v19 = vpop.permute.xlu2 %2139 }
 0x3a0   : > { %1823 = vrot.lane.b32.xlu1 %v4598_v59, %s5211_s19  ;;  %1791 = vrot.lane.b32.xlu0 %v4596_v29, %s3763_s30 }
 0x3a1   : > { %1947 = vrot.lane.b32.xlu2 %v4602_v38, %s3759_s22 }
 0x3a3   : > { %v2142_v21 = vpop.permute.xlu2 %2141 }
 0x3a4   : > { %v2149_v13 = vsel %vm913_vm7, %v4680_v19, %v2142_v21 }
 0x3a5   : > { %v2161_v36 = vmul.f32 %v2153_v9, %v2149_v13 }
 0x3a8   : > { %1825 = vrot.lane.b32.xlu1 %v4600_v54, %s5211_s19  ;;  %1821 = vrot.lane.b32.xlu0 %v4596_v29, %s5211_s19 }
 0x3a9   : > { %1851 = vrot.lane.b32.xlu2 %v4596_v29, %s5209_s21 }
 0x3ab   : > { %v4701_v39 = vpop.permute.xlu2 %2143 }
 0x3ac   : > { %v2148_v28 = vsel %vm913_vm7, %v2142_v21, %v4701_v39  ;;  %v2076_v21 = vperm.slane %v4778_v56, 1 }
 0x3ad   : > { %v2162_v53 = vmul.f32 %v2154_v25, %v2148_v28 }
 0x3af   : > { %v2165_v62 = vpack.c.bf16 %v2162_v53, %v2161_v36 }
 0x3b0   : > { %1733 = vrot.lane.b32.xlu1 %v4598_v59, %s3765_s25  ;;  %1795 = vrot.lane.b32.xlu0 %v4600_v54, %s3763_s30 }
 0x3b1   : > { %2167 = vst [vmem:[#allocation2 + $0xe0] sm:$0xff] %v2165_v62  ;;  %1881 = vrot.lane.b32.xlu2 %v4596_v29, %s5210_s26  ;;  %s5214_s26 = smov 1  }
 0x3b2   : > { %v4716_v17 = vpop.permute.xlu1 %2173  ;;  %v4718_v22 = vpop.permute.xlu0 %2169 }
 0x3b3   : > { %v2172_v40 = vpop.permute.xlu2 %2171 }
 0x3b4   : > { %v2178_v49 = vsel %vm945_vm8, %v2172_v40, %v4716_v17  ;;  %v2179_v4 = vsel %vm945_vm8, %v4718_v22, %v2172_v40  ;;  %v2403_v40 = vld [vmem:[#allocation6 + $0x62] ss:$8 sm:$0xf] }
 0x3b5   : > { %v2191_v14 = vmul.f32 %v2183_v0, %v2179_v4  ;;  %v2192_v23 = vmul.f32 %v2184_v20, %v2178_v49  ;;  %v2406_v4 = vperm.slane %v2403_v40, 1 }
 0x3b7   : > { %v2195_v58 = vpack.c.bf16 %v2192_v23, %v2191_v14  ;;  %v2405_v14 = vperm.slane %v2403_v40, 0 }
 0x3b8   : > { %1763 = vrot.lane.b32.xlu1 %v4598_v59, %s3766_s27  ;;  %1731 = vrot.lane.b32.xlu0 %v4596_v29, %s3765_s25  ;;  %v3319_v2 = vld [vmem:[#allocation2 + $0xe0] sm:$0xf]  ;;  %v3503_v16 = vld [vmem:[#allocation2 + $0xe4] sm:$0xf] }
 0x3b9   : > { %2197 = vst [vmem:[#allocation2 + $0xf0] sm:$0xff] %v2195_v58  ;;  %1855 = vrot.lane.b32.xlu2 %v4600_v54, %s5209_s21 }
 0x3ba   : > { %v4732_v61 = vpop.permute.xlu1 %2037  ;;  %v4734_v5 = vpop.permute.xlu0 %2097 }
 0x3bb   : > { %v2092_v44 = vpop.permute.xlu2 %2091 }
 0x3bc   : > { %v2102_v60 = vsel %vm862_vm10, %v4734_v5, %v2092_v44 }
 0x3bd   : > { %v2113_v18 = vmul.f32 %v2105_v35, %v2102_v60 }
 0x3c0   : > { %1765 = vrot.lane.b32.xlu1 %v4600_v54, %s3766_s27  ;;  %1761 = vrot.lane.b32.xlu0 %v4596_v29, %s3766_s27  ;;  %v3505_v57 = vld [vmem:[#allocation2 + $0xec] sm:$0xf0]  ;;  %v3321_v41 = vld [vmem:[#allocation2 + $0xf0] sm:$0xf0] }
 0x3c1   : > { %2175 = vrot.lane.b32.xlu2 %v4602_v38, %s3753_s28  ;;  %v3320_v43 = vor.u32 %v3505_v57, %v3319_v2  ;;  %v3324_v32 = vor.u32 %v3503_v16, %v3321_v41  ;;  %s5213_s28 = smov 119   ;;  %v1983_v2 = vld [vmem:[#allocation6 + $0x20] ss:$8 sm:$0xf] }
 0x3c2   : > { %v4749_v12 = vpop.permute.xlu1 %2067  ;;  %v4751_v63 = vpop.permute.xlu0 %2033  ;;  %v1985_v60 = vperm.slane %v1983_v2, 0 }
 0x3c3   : > { %2773 = vmatpush.bf16.msra.mxu3 %v3320_v43  ;;  %2799 = vmatpush.bf16.msra.mxu2 %v3324_v32  ;;  %v4753_v10 = vpop.permute.xlu2 %2093  ;;  %v2476_v43 = vld [vmem:[%s5172_s9] sm:$0xff]  ;;  %v1987_v32 = vperm.slane %v1983_v2, 2 }
 0x3c4   : > { %v2101_v15 = vsel %vm862_vm10, %v2092_v44, %v4753_v10 }
 0x3c5   : > { %v2114_v34 = vmul.f32 %v2106_v42, %v2101_v15  ;;  %v1986_v42 = vperm.slane %v1983_v2, 1 }
 0x3c7   : > { %v2117_v45 = vpack.c.bf16 %v2114_v34, %v2113_v18  ;;  %v1988_v18 = vperm.slane %v1983_v2, 3  ;;  %v2407_v34 = vperm.slane %v2403_v40, 2 }
 0x3c8   : > { %2005 = vrot.lane.b32.xlu1 %v4600_v54, %s3760_s1  ;;  %1735 = vrot.lane.b32.xlu0 %v4600_v54, %s3765_s25  ;;  %s5243_s1 = sshll.u32 %s3915_s17, 5 }
 0x3c9   : > { %2119 = vst [vmem:[#allocation2 + $0xc0] sm:$0xff] %v2117_v45  ;;  %1797 = vrot.lane.b32.xlu2 %v4602_v38, %s3763_s30  ;;  %v2408_v45 = vperm.slane %v2403_v40, 3  ;;  %s3527_s30 = sshll.u32 %s3848_s20, 5  ;;  %s2886_s20 = scalar_lea.sflag [#allocation5], %s3915_s17 }
 0x3ca   : > { %v4768_v8 = vpop.permute.xlu1 %1975  ;;  %v4770_v37 = vpop.permute.xlu0 %2063 }
 0x3cb   : > { %v2032_v31 = vpop.permute.xlu2 %2031 }
 0x3cc   : > { %v2041_v3 = vsel %vm798_vm12, %v2032_v31, %v4751_v63  ;;  %v2042_v33 = vsel %vm798_vm12, %v4732_v61, %v2032_v31 }
 0x3cd   : > { %v2053_v55 = vmul.f32 %v2045_v51, %v2042_v33  ;;  %v2054_v47 = vmul.f32 %v2046_v46, %v2041_v3 }
 0x3cf   : > { %v2057_v1 = vpack.c.bf16 %v2054_v47, %v2053_v55 }
 0x3d0   : > { %2203 = vrot.lane.b32.xlu1 %v4600_v54, %s5212_s11  ;;  %2065 = vrot.lane.b32.xlu0 %v4600_v54, %s3757_s24  ;;  %v3303_v27 = vld [vmem:[#allocation2 + $0xc0] sm:$0xf]  ;;  %v3499_v50 = vld [vmem:[#allocation2 + $0xc4] sm:$0xf] }
 0x3d1   : > { %2059 = vst [vmem:[#allocation2 + $0xa0] sm:$0xff] %v2057_v1  ;;  %1827 = vrot.lane.b32.xlu2 %v4602_v38, %s5211_s19  ;;  %v3304_v9 = vor.u32 %v3501_v6, %v3303_v27  ;;  %v3308_v25 = vor.u32 %v3499_v50, %v3305_v30  ;;  %s2897_s19 = scalar_lea.hbm %s5173_s10, %s3527_s30 }
 0x3d2   : > { %v4788_v13 = vpop.permute.xlu1 %2003  ;;  %v1974_v28 = vpop.permute.xlu0 %1973 }
 0x3d3   : > { %v2062_v36 = vpop.permute.xlu2 %2061  ;;  %2774 = vmatpush.bf16.msra.mxu3 %v3304_v9  ;;  %2800 = vmatpush.bf16.msra.mxu2 %v3308_v25  ;;  %v1980_v23 = vsel %vm734_vm9, %v1974_v28, %v4768_v8 }
 0x3d4   : > { %v2071_v53 = vsel %vm830_vm13, %v2062_v36, %v4770_v37  ;;  %v2072_v62 = vsel %vm830_vm13, %v4749_v12, %v2062_v36  ;;  %v2414_v41 = vmul.f32 %v2406_v4, %v1980_v23 }
 0x3d5   : > { %v2083_v0 = vmul.f32 %v2075_v24, %v2072_v62  ;;  %v2084_v20 = vmul.f32 %v2076_v21, %v2071_v53  ;;  %v1995_v21 = vmul.f32 %v1987_v32, %v1980_v23 }
 0x3d7   : > { %v2087_v49 = vpack.c.bf16 %v2084_v20, %v2083_v0  ;;  %v4825_v0 = vld [vmem:[#allocation6 + $0x61] ss:$8 sm:$0xf] }
 0x3d8   : > { %2233 = vrot.lane.b32.xlu1 %v4600_v54, %s5213_s28  ;;  %2201 = vrot.lane.b32.xlu0 %v4598_v59, %s5212_s11  ;;  %v3287_v51 = vld [vmem:[#allocation2 + $0xa0] sm:$0xf]  ;;  %v3495_v31 = vld [vmem:[#allocation2 + $0xa4] sm:$0xf]  ;;  %v2387_v2 = vperm.slane %v4825_v0, 0 }
 0x3d9   : > { %2089 = vst [vmem:[#allocation2 + $0xb0] sm:$0xff] %v2087_v49  ;;  %2095 = vrot.lane.b32.xlu2 %v4600_v54, %s5214_s26  ;;  %v4829_v49 = vld [vmem:[#allocation6 + $0x21] ss:$8 sm:$0xf] }
 0x3da   : > { %v4805_v58 = vpop.permute.xlu1 %1913  ;;  %v4807_v44 = vpop.permute.xlu0 %2001 }
 0x3db   : > { %v1972_v57 = vpop.permute.xlu2 %1971 }
 0x3dc   : > { %v1981_v16 = vsel %vm734_vm9, %v1972_v57, %v1974_v28 }
 0x3dd   : > { %v2413_v35 = vmul.f32 %v2405_v14, %v1981_v16 }
 0x3df   : > { %v2417_v15 = vpack.c.bf16 %v2414_v41, %v2413_v35  ;;  %v2015_v35 = vperm.slane %v4829_v49, 0 }
 0x3e0   : > { %2479 = vperm.xlu1 %3605, %v2476_v43   ;;  %2231 = vrot.lane.b32.xlu0 %v4598_v59, %s5213_s28  ;;  %v3497_v46 = vld [vmem:[#allocation2 + $0xac] sm:$0xf0]  ;;  %v3289_v3 = vld [vmem:[#allocation2 + $0xb0] sm:$0xf0]  ;;  %v1994_v59 = vmul.f32 %v1986_v42, %v1981_v16  ;;  %v2011_v43 = vsel %vm766_vm0, %v4807_v44, %v4788_v13 }
 0x3e1   : > { %1737 = vrot.lane.b32.xlu2 %v4602_v38, %s3765_s25  ;;  %v3288_v33 = vor.u32 %v3497_v46, %v3287_v51  ;;  %v3292_v55 = vor.u32 %v3495_v31, %v3289_v3  ;;  %v2646_v47 = vunpack.c.l.b16 %v2417_v15  ;;  %v2647_v1 = vunpack.c.h.b16 %v2417_v15  ;;  %v1923_v15 = vld [vmem:[#allocation6 + $0x6] ss:$8 sm:$0xf]  ;;  %s3696_s25 = scalar_lea.hbm %s5173_s10, 64 }
 0x3e2   : > { %v1944_v6 = vpop.permute.xlu1 %1943  ;;  %v4818_v27 = vpop.permute.xlu0 %1911 }
 0x3e3   : > { %v1978_v50 = vpop.permute.xlu2 %1977  ;;  %2775 = vmatpush.bf16.msra.mxu3 %v3288_v33  ;;  %2801 = vmatpush.bf16.msra.mxu2 %v3292_v55  ;;  %v2702_v30 = vpack.c.b16 %v2646_v47, %v2646_v47  ;;  %v2703_v24 = vpack.c.b16 %v2647_v1, %v2647_v1  ;;  %v1926_v33 = vperm.slane %v1923_v15, 1  ;;  %v1921_v47 = vsel %vm670_vm14, %v4818_v27, %v4805_v58 }
 0x3e4   : > { %v1979_v9 = vsel %vm734_vm9, %v4768_v8, %v1978_v50  ;;  %v1982_v25 = vsel %vm734_vm9, %v1978_v50, %v1972_v57  ;;  %v2388_v8 = vperm.slane %v4825_v0, 1  ;;  %v2016_v57 = vperm.slane %v4829_v49, 1 }
 0x3e5   : > { %v1993_v28 = vmul.f32 %v1985_v60, %v1982_v25  ;;  %v1996_v36 = vmul.f32 %v1988_v18, %v1979_v9  ;;  %v2415_v53 = vmul.f32 %v2407_v34, %v1979_v9  ;;  %v2416_v62 = vmul.f32 %v2408_v45, %v1982_v25  ;;  %v2367_v18 = vld [vmem:[#allocation6 + $0x60] ss:$8 sm:$0xf] }
 0x3e6   : > { %v2762_v20 = vsel %vm1545_vm11, %v2702_v30, 0  ;;  %v2765_v40 = vsel %vm1545_vm11, %v2703_v24, 0  ;;  %v2024_v46 = vmul.f32 %v2016_v57, %v2011_v43  ;;  %v2369_v55 = vperm.slane %v2367_v18, 0 }
 0x3e7   : > { %v1997_v4 = vpack.c.bf16 %v1994_v59, %v1993_v28  ;;  %v1998_v14 = vpack.c.bf16 %v1996_v36, %v1995_v21  ;;  %v4831_v23 = vpack.c.bf16 %v2416_v62, %v2415_v53  ;;  %2788 = vmatpush.bf16.msra.mxu1 %v2762_v20  ;;  %2814 = vmatpush.bf16.msra.mxu0 %v2765_v40  ;;  %v2370_v50 = vperm.slane %v2367_v18, 1  ;;  %v1953_v36 = vld [vmem:[#allocation6 + $0x7] ss:$8 sm:$0xf] }
 0x3e8   : > { %2235 = vrot.lane.b32.xlu0 %v4602_v38, %s5213_s28  ;;  %v1925_v30 = vperm.slane %v1923_v15, 0  ;;  %v1928_v24 = vperm.slane %v1923_v15, 3  ;;  %v2372_v21 = vperm.slane %v2367_v18, 3  ;;  %v1934_v25 = vmul.f32 %v1926_v33, %v1921_v47 }
 0x3e9   : > { %1999 = vst [vmem:[#allocation2 + $0x80] sm:$0xff] %v1997_v4  ;;  %1767 = vrot.lane.b32.xlu2 %v4602_v38, %s3766_s27  ;;  %v2377_v28 = vmul.f32 %v2369_v55, %v1921_v47  ;;  %v1956_v43 = vperm.slane %v1953_v36, 1  ;;  %s394_s27 = scalar_lea.vmem [#allocation8], %s5243_s1 }
 0x3ea   : > { %2000 = vst [vmem:[#allocation2 + $0x88] sm:$0xff] %v1998_v14  ;;  %v4840_v16 = vpop.permute.xlu1 %1945  ;;  %v4842_v41 = vpop.permute.xlu0 %1941 }
 0x3eb   : > { %v1950_v32 = vsel %vm702_vm15, %v1944_v6, %v4840_v16  ;;  %v4855_v42 = vsel %vm702_vm15, %v4842_v41, %v1944_v6  ;;  %v4857_v60 = vpop.permute.xlu2 %2007  ;;  %v1927_v6 = vperm.slane %v1923_v15, 2 }
 0x3ec   : > { %v2396_v34 = vmul.f32 %v2388_v8, %v1950_v32  ;;  %v2395_v45 = vmul.f32 %v2387_v2, %v4855_v42  ;;  %v2012_v51 = vsel %vm766_vm0, %v4857_v60, %v4807_v44  ;;  %v2371_v44 = vperm.slane %v2367_v18, 2 }
 0x3ed   : > { %v2023_v3 = vmul.f32 %v2015_v35, %v2012_v51  ;;  %v1957_v35 = vperm.slane %v1953_v36, 2  ;;  %v1955_v18 = vperm.slane %v1953_v36, 0  ;;  %v1958_v51 = vperm.slane %v1953_v36, 3 }
 0x3ee   : > { %v2399_v31 = vpack.c.bf16 %v2396_v34, %v2395_v45 }
 0x3ef   : > { %v2027_v1 = vpack.c.bf16 %v2024_v46, %v2023_v3  ;;  %v2389_v46 = vperm.slane %v4825_v0, 2 }
 0x3f0   : > { %2401 = vst [vmem:[#allocation2 + $0x190] sm:$0xff] %v2399_v31  ;;  %v3271_v31 = vld [vmem:[#allocation2 + $0x80] sm:$0xf]  ;;  %v3491_v3 = vld [vmem:[#allocation2 + $0x84] sm:$0xf] }
 0x3f1   : > { %2035 = vrot.lane.b32.xlu2 %v4600_v54, %s3755_s23  ;;  %2029 = vst [vmem:[#allocation2 + $0x90] sm:$0xff] %v2027_v1 }
 0x3f2   : > { %v4870_v59 = vpop.permute.xlu1 %1857  ;;  %v1916_v9 = vpop.permute.xlu0 %1915 }
 0x3f3   : > { %v1920_v53 = vsel %vm670_vm14, %v4805_v58, %v1916_v9  ;;  %v1918_v62 = vpop.permute.xlu2 %1917 }
 0x3f4   : > { %v1935_v20 = vmul.f32 %v1927_v6, %v1920_v53  ;;  %v2378_v40 = vmul.f32 %v2370_v50, %v1920_v53  ;;  %v1919_v54 = vsel %vm670_vm14, %v1916_v9, %v1918_v62  ;;  %v1922_v4 = vsel %vm670_vm14, %v1918_v62, %v4818_v27 }
 0x3f5   : > { %v1933_v14 = vmul.f32 %v1925_v30, %v1922_v4  ;;  %v1936_v8 = vmul.f32 %v1928_v24, %v1919_v54  ;;  %v2379_v2 = vmul.f32 %v2371_v44, %v1919_v54  ;;  %v2380_v57 = vmul.f32 %v2372_v21, %v1922_v4 }
 0x3f6   : > { %v2381_v15 = vpack.c.bf16 %v2378_v40, %v2377_v28  ;;  %v2390_v27 = vperm.slane %v4825_v0, 3  ;;  %v1965_v30 = vmul.f32 %v1957_v35, %v1950_v32  ;;  %v1964_v44 = vmul.f32 %v1956_v43, %v4855_v42  ;;  %v4895_v32 = vld [vmem:[#allocation6 + $0x4] ss:$8 sm:$0xf] }
 0x3f7   : > { %v1937_v34 = vpack.c.bf16 %v1934_v25, %v1933_v14  ;;  %v1938_v58 = vpack.c.bf16 %v1936_v8, %v1935_v20  ;;  %v2382_v45 = vpack.c.bf16 %v2380_v57, %v2379_v2  ;;  %v3525_v53 = vld [vmem:[#allocation2 + $0x18c] sm:$0xf0]  ;;  %v3401_v4 = vld [vmem:[#allocation2 + $0x190] sm:$0xf0]  ;;  %v2156_v14 = vperm.slane %v4688_v52, 3 }
 0x3f8   : > { %2383 = vst [vmem:[#allocation2 + $0x180] sm:$0xff] %v2381_v15  ;;  %v3493_v33 = vld [vmem:[#allocation2 + $0x8c] sm:$0xf0]  ;;  %v3273_v55 = vld [vmem:[#allocation2 + $0x90] sm:$0xf0]  ;;  %v1865_v2 = vperm.slane %v4895_v32, 0 }
 0x3f9   : > { %1939 = vst [vmem:[#allocation2 + $0x60] sm:$0xff] %v1937_v34  ;;  %2199 = vrot.lane.b32.xlu2 %v4596_v29, %s5212_s11  ;;  %v3272_v6 = vor.u32 %v3493_v33, %v3271_v31  ;;  %v3276_v50 = vor.u32 %v3491_v3, %v3273_v55  ;;  %v1866_v57 = vperm.slane %v4895_v32, 1  ;;  %v2349_v3 = vld [vmem:[#allocation6 + $0x47] ss:$8 sm:$0xf]  ;;  %vm5217_vm14 = vcmp.lt.s32.totalorder %v4039_v7, 71 }
 0x3fa   : > { %1940 = vst [vmem:[#allocation2 + $0x68] sm:$0xff] %v1938_v58  ;;  %v4884_v47 = vpop.permute.xlu1 %1887  ;;  %v4886_v1 = vpop.permute.xlu0 %1853 }
 0x3fb   : > { %2384 = vst [vmem:[#allocation2 + $0x188] sm:$0xff] %v2382_v45  ;;  %v1948_v24 = vpop.permute.xlu2 %1947  ;;  %2776 = vmatpush.bf16.msra.mxu3 %v3272_v6  ;;  %2802 = vmatpush.bf16.msra.mxu2 %v3276_v50  ;;  %v2352_v50 = vperm.slane %v2349_v3, 1 }
 0x3fc   : > { %v1949_v21 = vsel %vm702_vm15, %v4840_v16, %v1948_v24  ;;  %v1952_v0 = vsel %vm702_vm15, %v1948_v24, %v4842_v41  ;;  %v2155_v16 = vperm.slane %v4688_v52, 2 }
 0x3fd   : > { %v1963_v9 = vmul.f32 %v1955_v18, %v1952_v0  ;;  %v1966_v25 = vmul.f32 %v1958_v51, %v1949_v21  ;;  %v2397_v28 = vmul.f32 %v2389_v46, %v1949_v21  ;;  %v2398_v36 = vmul.f32 %v2390_v27, %v1952_v0  ;;  %v1893_v51 = vld [vmem:[#allocation6 + $0x5] ss:$8 sm:$0xf] }
 0x3fe   : > { %v1897_v33 = vperm.slane %v1893_v51, 2  ;;  %v1898_v55 = vperm.slane %v1893_v51, 3 }
 0x3ff   : > { %v1967_v62 = vpack.c.bf16 %v1964_v44, %v1963_v9  ;;  %v1968_v20 = vpack.c.bf16 %v1966_v25, %v1965_v30  ;;  %v2400_v42 = vpack.c.bf16 %v2398_v36, %v2397_v28  ;;  %v3399_v40 = vld [vmem:[#allocation2 + $0x180] sm:$0xf]  ;;  %v3523_v54 = vld [vmem:[#allocation2 + $0x184] sm:$0xf]  ;;  %v2353_v44 = vperm.slane %v2349_v3, 2 }
 0x400   : > { %v3400_v41 = vor.u32 %v3525_v53, %v3399_v40  ;;  %v3404_v8 = vor.u32 %v3523_v54, %v3401_v4  ;;  %v3487_v6 = vld [vmem:[#allocation2 + $0x64] sm:$0xf]  ;;  %v1895_v28 = vperm.slane %v1893_v51, 0  ;;  %v1896_v36 = vperm.slane %v1893_v51, 1 }
 0x401   : > { %1969 = vst [vmem:[#allocation2 + $0x70] sm:$0xff] %v1967_v62  ;;  %2229 = vrot.lane.b32.xlu2 %v4596_v29, %s5213_s28  ;;  %v2351_v53 = vperm.slane %v2349_v3, 0  ;;  %s2901_s28 = sshll.u32 %s2897_s19, 4  ;;  %s2902_s28 = int_to_ptr.hbm [resolvable:$true] %s2901_s28 }
 0x402   : > { %1970 = vst [vmem:[#allocation2 + $0x78] sm:$0xff] %v1968_v20  ;;  %v2146_v35 = vpop.permute.xlu1 %2145  ;;  %v1884_v43 = vpop.permute.xlu0 %1883  ;;  %2789 = vmatpush.bf16.msra.mxu1 %v3400_v41  ;;  %2815 = vmatpush.bf16.msra.mxu0 %v3404_v8  ;;  %s3690_s26 = sshra.s32 %s2902_s28, 4  ;;  %s3691_s26 = int_to_ptr.hbm [resolvable:$true] %s3690_s26 }
 0x403   : > { %2402 = vst [vmem:[#allocation2 + $0x198] sm:$0xff] %v2400_v42  ;;  %v2147_v52 = vsel %vm913_vm7, %v4701_v39, %v2146_v35  ;;  %v2150_v15 = vsel %vm913_vm7, %v2146_v35, %v4680_v19  ;;  %v1852_v18 = vpop.permute.xlu2 %1851  ;;  %v3255_v19 = vld [vmem:[#allocation2 + $0x60] sm:$0xf]  ;;  %v2354_v42 = vperm.slane %v2349_v3, 3  ;;  %v1868_v3 = vperm.slane %v4895_v32, 3  ;;  %s3692_s24 = scalar_lea.hbm %s3691_s26, 32  ;;  %p3697_p12 = scmp.lt.s32.totalorder %s3691_s26, %s5173_s10 }
 0x404   : > { %v2163_v29 = vmul.f32 %v2155_v16, %v2147_v52  ;;  %v2164_v34 = vmul.f32 %v2156_v14, %v2150_v15  ;;  %v1861_v58 = vsel %vm606_vm1, %v1852_v18, %v4886_v1  ;;  %v1862_v45 = vsel %vm606_vm1, %v4870_v59, %v1852_v18  ;;  %p3693_p1 = scmp.ne.s32.totalorder %s3691_s26, %s3692_s24  ;;  %p3698_p8 = scmp.lt.s32.totalorder %s3696_s25, %s3692_s24 }
 0x405   : > { %v1873_v46 = vmul.f32 %v1865_v2, %v1862_v45  ;;  %v1874_v31 = vmul.f32 %v1866_v57, %v1861_v58  ;;  %vm5215_vm7 = vcmp.lt.s32.totalorder %v4039_v7, 65 }
 0x406   : > { %v2166_v39 = vpack.c.bf16 %v2164_v34, %v2163_v29  ;;  %vm5216_vm9 = vmmov %vm5215_vm7  ;;  %p3694_p3 = pnand %p3693_p1, %p3884_p13  ;;  %p3699_p7 = por %p3698_p8, %p3697_p12 }
 0x407   : > { %v1877_v27 = vpack.c.bf16 %v1874_v31, %v1873_v46  ;;  %v1867_v46 = vperm.slane %v4895_v32, 2 }
 0x408   : > { %2168 = vst [vmem:[#allocation2 + $0xe8] sm:$0xff] %v2166_v39  ;;  %v3489_v30 = vld [vmem:[#allocation2 + $0x6c] sm:$0xf0]  ;;  %v3257_v24 = vld [vmem:[#allocation2 + $0x70] sm:$0xf0]  ;;  %p3695_p5 = pneg %p3694_p3 }
 0x409   : > { %1879 = vst [vmem:[#allocation2 + $0x40] sm:$0xff] %v1877_v27  ;;  %2205 = vrot.lane.b32.xlu2 %v4602_v38, %s5212_s11  ;;  %v3256_v21 = vor.u32 %v3489_v30, %v3255_v19  ;;  %v3260_v0 = vor.u32 %v3487_v6, %v3257_v24  ;;  %v2331_v38 = vld [vmem:[#allocation6 + $0x46] ss:$8 sm:$0xf]  ;;  %s2899_s11 = sshll.u32 %s394_s27, 4  ;;  %s2900_s11 = int_to_ptr.vmem [resolvable:$true] %s2899_s11 }
 0x40a   : > { %v4917_v9 = vpop.permute.xlu1 %1793  ;;  %v1886_v25 = vpop.permute.xlu0 %1885  ;;  %v2333_v15 = vperm.slane %v2331_v38, 0  ;;  %v2336_v29 = vperm.slane %v2331_v38, 3  ;;  %v2335_v39 = vperm.slane %v2331_v38, 2  ;;  %p3700_p9 = pnand %p3699_p7, %p3695_p5 }
 0x40b   : > { %v1889_v62 = vsel %vm638_vm2, %v1886_v25, %v4884_v47  ;;  %v1890_v20 = vsel %vm638_vm2, %v1884_v43, %v1886_v25  ;;  %v1882_v40 = vpop.permute.xlu2 %1881  ;;  %2777 = vmatpush.bf16.msra.mxu3 %v3256_v21  ;;  %2803 = vmatpush.bf16.msra.mxu2 %v3260_v0  ;;  %v4939_v21 = vld [vmem:[#allocation6 + $0x45] ss:$8 sm:$0xf] }
 0x40c   : > { %v1905_v54 = vmul.f32 %v1897_v33, %v1890_v20  ;;  %v1906_v4 = vmul.f32 %v1898_v55, %v1889_v62  ;;  %v2360_v16 = vmul.f32 %v2352_v50, %v1890_v20  ;;  %v2361_v14 = vmul.f32 %v2353_v44, %v1889_v62 }
 0x40d   : > { %v1891_v41 = vsel %vm638_vm2, %v1882_v40, %v1884_v43  ;;  %v1892_v8 = vsel %vm638_vm2, %v4884_v47, %v1882_v40  ;;  %v2334_v43 = vperm.slane %v2331_v38, 1  ;;  %v2341_v55 = vmul.f32 %v2333_v15, %v1861_v58  ;;  %vm5221_vm2 = vmmov %vm5215_vm7 }
 0x40e   : > { %v1908_v2 = vpack.c.bf16 %v1906_v4, %v1905_v54  ;;  %v1903_v57 = vmul.f32 %v1895_v28, %v1892_v8  ;;  %v1904_v35 = vmul.f32 %v1896_v36, %v1891_v41  ;;  %v2359_v52 = vmul.f32 %v2351_v53, %v1891_v41  ;;  %v1803_v41 = vld [vmem:[#allocation6 + $0x2] ss:$8 sm:$0xf]  ;;  %vm5222_vm4 = vmmov %vm5221_vm2 }
 0x40f   : > { %v2362_v18 = vmul.f32 %v2354_v42, %v1892_v8  ;;  %v2344_v19 = vmul.f32 %v2336_v29, %v1862_v45  ;;  %v2316_v58 = vperm.slane %v4939_v21, 1  ;;  %v2315_v45 = vperm.slane %v4939_v21, 0  ;;  %v2295_v8 = vld [vmem:[#allocation6 + $0x44] ss:$8 sm:$0xf] }
 0x410   : > { %1910 = vst [vmem:[#allocation2 + $0x58] sm:$0xff] %v1908_v2  ;;  %v1907_v34 = vpack.c.bf16 %v1904_v35, %v1903_v57  ;;  %v2363_v51 = vpack.c.bf16 %v2360_v16, %v2359_v52  ;;  %v3239_v36 = vld [vmem:[#allocation2 + $0x40] sm:$0xf]  ;;  %v3483_v53 = vld [vmem:[#allocation2 + $0x44] sm:$0xf]  ;;  %v2185_v42 = vperm.slane %v4706_v11, 2 }
 0x411   : > { %v2364_v31 = vpack.c.bf16 %v2362_v18, %v2361_v14  ;;  %v2186_v40 = vperm.slane %v4706_v11, 3  ;;  %v1806_v29 = vperm.slane %v1803_v41, 1 }
 0x412   : > { %1909 = vst [vmem:[#allocation2 + $0x50] sm:$0xff] %v1907_v34  ;;  %v1824_v27 = vpop.permute.xlu1 %1823  ;;  %v4931_v47 = vpop.permute.xlu0 %1791  ;;  %v2297_v34 = vperm.slane %v2295_v8, 0 }
 0x413   : > { %2365 = vst [vmem:[#allocation2 + $0x170] sm:$0xff] %v2363_v51  ;;  %v1856_v33 = vpop.permute.xlu2 %1855  ;;  %v1807_v51 = vperm.slane %v1803_v41, 2 }
 0x414   : > { %2366 = vst [vmem:[#allocation2 + $0x178] sm:$0xff] %v2364_v31  ;;  %v1859_v6 = vsel %vm606_vm1, %v1856_v33, %v4870_v59  ;;  %v1860_v50 = vsel %vm606_vm1, %v4886_v1, %v1856_v33  ;;  %v1801_v31 = vsel %vm5217_vm14, %v4931_v47, %v4917_v9 }
 0x415   : > { %v1875_v32 = vmul.f32 %v1867_v46, %v1860_v50  ;;  %v1876_v30 = vmul.f32 %v1868_v3, %v1859_v6  ;;  %v2342_v24 = vmul.f32 %v2334_v43, %v1860_v50  ;;  %v2343_v44 = vmul.f32 %v2335_v39, %v1859_v6 }
 0x416   : > { %v2298_v46 = vperm.slane %v2295_v8, 1  ;;  %v1808_v43 = vperm.slane %v1803_v41, 3  ;;  %v2299_v39 = vperm.slane %v2295_v8, 2 }
 0x417   : > { %v1878_v0 = vpack.c.bf16 %v1876_v30, %v1875_v32  ;;  %v2345_v25 = vpack.c.bf16 %v2342_v24, %v2341_v55  ;;  %v2346_v28 = vpack.c.bf16 %v2344_v19, %v2343_v44  ;;  %v1805_v32 = vperm.slane %v1803_v41, 0 }
 0x418   : > { %v2300_v30 = vperm.slane %v2295_v8, 3  ;;  %v2305_v24 = vmul.f32 %v2297_v34, %v1801_v31 }
 0x419   : > { %1880 = vst [vmem:[#allocation2 + $0x48] sm:$0xff] %v1878_v0  ;;  %v3485_v59 = vld [vmem:[#allocation2 + $0x4c] sm:$0xf0]  ;;  %v3241_v62 = vld [vmem:[#allocation2 + $0x50] sm:$0xf0] }
 0x41a   : > { %2347 = vst [vmem:[#allocation2 + $0x160] sm:$0xff] %v2345_v25  ;;  %v4943_v1 = vpop.permute.xlu1 %1825  ;;  %v4945_v20 = vpop.permute.xlu0 %1821  ;;  %v3240_v38 = vor.u32 %v3485_v59, %v3239_v36  ;;  %v3244_v54 = vor.u32 %v3483_v53, %v3241_v62  ;;  %v3385_v33 = vld [vmem:[#allocation2 + $0x170] sm:$0xf0]  ;;  %v1814_v62 = vmul.f32 %v1806_v29, %v1801_v31 }
 0x41b   : > { %2348 = vst [vmem:[#allocation2 + $0x168] sm:$0xff] %v2346_v28  ;;  %v4952_v4 = vsel %vm5215_vm7, %v1824_v27, %v4943_v1  ;;  %v4957_v16 = vsel %vm5216_vm9, %v4945_v20, %v1824_v27  ;;  %v2176_v14 = vpop.permute.xlu2 %2175  ;;  %vm5227_vm7 = vmmov %vm5225_vm6 }
 0x41c   : > { %v2324_v2 = vmul.f32 %v2316_v58, %v4952_v4  ;;  %v2323_v11 = vmul.f32 %v2315_v45, %v4957_v16  ;;  %2778 = vmatpush.bf16.msra.mxu3 %v3240_v38  ;;  %v2177_v57 = vsel %vm945_vm8, %v4716_v17, %v2176_v14  ;;  %v2180_v35 = vsel %vm945_vm8, %v2176_v14, %v4718_v22  ;;  %v3521_v17 = vld [vmem:[#allocation2 + $0x16c] sm:$0xf0]  ;;  %vm5218_vm8 = vmmov %vm5217_vm14 }
 0x41d   : > { %2804 = vmatpush.bf16.msra.mxu2 %v3244_v54  ;;  %v2193_v15 = vmul.f32 %v2185_v42, %v2177_v57  ;;  %v2194_v18 = vmul.f32 %v2186_v40, %v2180_v35  ;;  %vm5219_vm15 = vmmov %vm5218_vm8  ;;  %v1833_v45 = vld [vmem:[#allocation6 + $0x3] ss:$8 sm:$0xf]  ;;  %v2317_v57 = vperm.slane %v4939_v21, 2  ;;  %v2318_v35 = vperm.slane %v4939_v21, 3 }
 0x41e   : > { %v2327_v52 = vpack.c.bf16 %v2324_v2, %v2323_v11  ;;  %vm5220_vm1 = vmmov %vm5218_vm8  ;;  %v1837_v54 = vperm.slane %v1833_v45, 2  ;;  %v1836_v14 = vperm.slane %v1833_v45, 1  ;;  %v1835_v2 = vperm.slane %v1833_v45, 0 }
 0x41f   : > { %v2196_v3 = vpack.c.bf16 %v2194_v18, %v2193_v15  ;;  %v1838_v11 = vperm.slane %v1833_v45, 3  ;;  %vm5229_vm9 = vmmov %vm5223_vm3 }
 0x420   : > { %2329 = vst [vmem:[#allocation2 + $0x150] sm:$0xff] %v2327_v52  ;;  %v1845_v18 = vmul.f32 %v1837_v54, %v4952_v4  ;;  %v1844_v29 = vmul.f32 %v1836_v14, %v4957_v16  ;;  %v2018_v54 = vperm.slane %v4829_v49, 3  ;;  %vm5230_vm14 = vmmov %vm5223_vm3 }
 0x421   : > { %v3383_v27 = vld [vmem:[#allocation2 + $0x160] sm:$0xf]  ;;  %v3519_v22 = vld [vmem:[#allocation2 + $0x164] sm:$0xf]  ;;  %2198 = vst [vmem:[#allocation2 + $0xf8] sm:$0xff] %v2196_v3 }
 0x422   : > { %v4971_v55 = vpop.permute.xlu1 %1733  ;;  %v1796_v19 = vpop.permute.xlu0 %1795  ;;  %v3384_v6 = vor.u32 %v3521_v17, %v3383_v27  ;;  %v3388_v50 = vor.u32 %v3519_v22, %v3385_v33  ;;  %v4993_v17 = vld [vmem:[#allocation6 + $0x43] ss:$8 sm:$0xf] }
 0x423   : > { %v1800_v44 = vsel %vm5218_vm8, %v4917_v9, %v1796_v19  ;;  %v1798_v0 = vpop.permute.xlu2 %1797 }
 0x424   : > { %v1815_v25 = vmul.f32 %v1807_v51, %v1800_v44  ;;  %v2306_v28 = vmul.f32 %v2298_v46, %v1800_v44  ;;  %2790 = vmatpush.bf16.msra.mxu1 %v3384_v6  ;;  %2816 = vmatpush.bf16.msra.mxu0 %v3388_v50  ;;  %v1799_v58 = vsel %vm5219_vm15, %v1796_v19, %v1798_v0  ;;  %v2280_v19 = vperm.slane %v4993_v17, 1 }
 0x425   : > { %v1802_v36 = vsel %vm5220_vm1, %v1798_v0, %v4931_v47  ;;  %v1816_v53 = vmul.f32 %v1808_v43, %v1799_v58  ;;  %v2307_v59 = vmul.f32 %v2299_v39, %v1799_v58  ;;  %v2108_v44 = vperm.slane %v4736_v48, 3 }
 0x426   : > { %v2309_v42 = vpack.c.bf16 %v2306_v28, %v2305_v24  ;;  %v1813_v40 = vmul.f32 %v1805_v32, %v1802_v36  ;;  %v2308_v38 = vmul.f32 %v2300_v30, %v1802_v36  ;;  %v2107_v24 = vperm.slane %v4736_v48, 2 }
 0x427   : > { %v1818_v9 = vpack.c.bf16 %v1816_v53, %v1815_v25  ;;  %v3517_v43 = vld [vmem:[#allocation2 + $0x14c] sm:$0xf0]  ;;  %v3369_v33 = vld [vmem:[#allocation2 + $0x150] sm:$0xf0] }
 0x428   : > { %2311 = vst [vmem:[#allocation2 + $0x140] sm:$0xff] %v2309_v42  ;;  %v1817_v41 = vpack.c.bf16 %v1814_v62, %v1813_v40  ;;  %v2310_v8 = vpack.c.bf16 %v2308_v38, %v2307_v59  ;;  %v1743_v59 = vld [vmem:[#allocation6] ss:$8 sm:$0xf]  ;;  %v2017_v38 = vperm.slane %v4829_v49, 2 }
 0x429   : > { %1820 = vst [vmem:[#allocation2 + $0x28] sm:$0xff] %v1818_v9  ;;  %v1747_v14 = vperm.slane %v1743_v59, 2 }
 0x42a   : > { %1819 = vst [vmem:[#allocation2 + $0x20] sm:$0xff] %v1817_v41  ;;  %v1764_v47 = vpop.permute.xlu1 %1763  ;;  %v4983_v52 = vpop.permute.xlu0 %1731 }
 0x42b   : > { %2312 = vst [vmem:[#allocation2 + $0x148] sm:$0xff] %v2310_v8  ;;  %v1828_v15 = vpop.permute.xlu2 %1827  ;;  %v1741_v9 = vsel %vm5225_vm6, %v4983_v52, %v4971_v55 }
 0x42c   : > { %v1829_v34 = vsel %vm5221_vm2, %v4943_v1, %v1828_v15  ;;  %v1832_v51 = vsel %vm5222_vm4, %v1828_v15, %v4945_v20  ;;  %v2279_v1 = vperm.slane %v4993_v17, 0  ;;  %v4997_v20 = vld [vmem:[#allocation6 + $0x42] ss:$8 sm:$0xf] }
 0x42d   : > { %v1843_v46 = vmul.f32 %v1835_v2, %v1832_v51  ;;  %v1846_v21 = vmul.f32 %v1838_v11, %v1829_v34  ;;  %v2325_v31 = vmul.f32 %v2317_v57, %v1829_v34  ;;  %v2326_v3 = vmul.f32 %v2318_v35, %v1832_v51  ;;  %v1773_v35 = vld [vmem:[#allocation6 + $0x1] ss:$8 sm:$0xf] }
 0x42e   : > { %v2261_v36 = vperm.slane %v4997_v20, 0  ;;  %v1746_v57 = vperm.slane %v1743_v59, 1  ;;  %v1745_v51 = vperm.slane %v1743_v59, 0  ;;  %v2263_v49 = vperm.slane %v4997_v20, 2 }
 0x42f   : > { %v1847_v39 = vpack.c.bf16 %v1844_v29, %v1843_v46  ;;  %v1848_v27 = vpack.c.bf16 %v1846_v21, %v1845_v18  ;;  %v2328_v4 = vpack.c.bf16 %v2326_v3, %v2325_v31  ;;  %v3367_v22 = vld [vmem:[#allocation2 + $0x140] sm:$0xf]  ;;  %v3515_v16 = vld [vmem:[#allocation2 + $0x144] sm:$0xf]  ;;  %v1748_v46 = vperm.slane %v1743_v59, 3 }
 0x430   : > { %v3368_v6 = vor.u32 %v3517_v43, %v3367_v22  ;;  %v3372_v50 = vor.u32 %v3515_v16, %v3369_v33  ;;  %v2269_v18 = vmul.f32 %v2261_v36, %v1741_v9  ;;  %v2264_v43 = vperm.slane %v4997_v20, 3 }
 0x431   : > { %1849 = vst [vmem:[#allocation2 + $0x30] sm:$0xff] %v1847_v39  ;;  %v3223_v41 = vld [vmem:[#allocation2 + $0x20] sm:$0xf]  ;;  %v1754_v33 = vmul.f32 %v1746_v57, %v1741_v9  ;;  %v2078_v36 = vperm.slane %v4778_v56, 3  ;;  %v1778_v59 = vperm.slane %v1773_v35, 3 }
 0x432   : > { %1850 = vst [vmem:[#allocation2 + $0x38] sm:$0xff] %v1848_v27  ;;  %v4999_v32 = vpop.permute.xlu1 %1765  ;;  %v5001_v30 = vpop.permute.xlu0 %1761  ;;  %2791 = vmatpush.bf16.msra.mxu1 %v3368_v6  ;;  %2817 = vmatpush.bf16.msra.mxu0 %v3372_v50 }
 0x433   : > { %2330 = vst [vmem:[#allocation2 + $0x158] sm:$0xff] %v2328_v4  ;;  %v5008_v0 = vsel %vm5223_vm3, %v1764_v47, %v4999_v32  ;;  %v5013_v25 = vsel %vm5224_vm5, %v5001_v30, %v1764_v47  ;;  %v2096_v28 = vpop.permute.xlu2 %2095  ;;  %vm5239_vm3 = vcmask 719872  }
 0x434   : > { %v2288_v58 = vmul.f32 %v2280_v19, %v5008_v0  ;;  %v2287_v45 = vmul.f32 %v2279_v1, %v5013_v25  ;;  %v2099_v48 = vsel %vm862_vm10, %v2096_v28, %v4734_v5  ;;  %v2100_v53 = vsel %vm862_vm10, %v4753_v10, %v2096_v28  ;;  %v3479_v5 = vld [vmem:[#allocation2 + $0x24] sm:$0xf]  ;;  %vm5226_vm10 = vmmov %vm5225_vm6 }
 0x435   : > { %v2115_v42 = vmul.f32 %v2107_v24, %v2100_v53  ;;  %v2116_v40 = vmul.f32 %v2108_v44, %v2099_v48  ;;  %v2262_v10 = vperm.slane %v4997_v20, 1  ;;  %v1777_v19 = vperm.slane %v1773_v35, 2  ;;  %vm5240_vm5 = vmmov %vm5239_vm3 }
 0x436   : > { %v2291_v62 = vpack.c.bf16 %v2288_v58, %v2287_v45  ;;  %v1776_v20 = vperm.slane %v1773_v35, 1  ;;  %v2077_v28 = vperm.slane %v4778_v56, 2  ;;  %v1775_v48 = vperm.slane %v1773_v35, 0 }
 0x437   : > { %v2118_v8 = vpack.c.bf16 %v2116_v40, %v2115_v42  ;;  %v1785_v40 = vmul.f32 %v1777_v19, %v5008_v0 }
 0x438   : > { %2293 = vst [vmem:[#allocation2 + $0x130] sm:$0xff] %v2291_v62  ;;  %v3481_v2 = vld [vmem:[#allocation2 + $0x2c] sm:$0xf0]  ;;  %v3225_v11 = vld [vmem:[#allocation2 + $0x30] sm:$0xf0]  ;;  %v2282_v62 = vperm.slane %v4993_v17, 3 }
 0x439   : > { %v3224_v47 = vor.u32 %v3481_v2, %v3223_v41  ;;  %v3228_v15 = vor.u32 %v3479_v5, %v3225_v11  ;;  %2120 = vst [vmem:[#allocation2 + $0xc8] sm:$0xff] %v2118_v8 }
 0x43a   : > { %v2006_v29 = vpop.permute.xlu1 %2005  ;;  %v1736_v34 = vpop.permute.xlu0 %1735 }
 0x43b   : > { %v2009_v21 = vsel %vm766_vm0, %v2006_v29, %v4857_v60  ;;  %v2010_v31 = vsel %vm766_vm0, %v4788_v13, %v2006_v29  ;;  %v1740_v3 = vsel %vm5226_vm10, %v4971_v55, %v1736_v34  ;;  %v1738_v39 = vpop.permute.xlu2 %1737  ;;  %2779 = vmatpush.bf16.msra.mxu3 %v3224_v47  ;;  %2805 = vmatpush.bf16.msra.mxu2 %v3228_v15  ;;  %vm5228_vm0 = vmmov %vm5225_vm6  ;;  %v2047_v29 = vperm.slane %v4758_v26, 2 }
 0x43c   : > { %v2025_v27 = vmul.f32 %v2017_v38, %v2010_v31  ;;  %v2026_v4 = vmul.f32 %v2018_v54, %v2009_v21  ;;  %v1755_v22 = vmul.f32 %v1747_v14, %v1740_v3  ;;  %v2270_v16 = vmul.f32 %v2262_v10, %v1740_v3  ;;  %v5072_v21 = vld [vmem:[%s5171_s8] sm:$0xff]  ;;  %vm5241_vm6 = vmmov %vm5239_vm3 }
 0x43d   : > { %v1739_v60 = vsel %vm5227_vm7, %v1736_v34, %v1738_v39  ;;  %v1742_v13 = vsel %vm5228_vm0, %v1738_v39, %v4983_v52  ;;  %v2281_v52 = vperm.slane %v4993_v17, 2  ;;  %v1784_v38 = vmul.f32 %v1776_v20, %v5013_v25  ;;  %v5080_v39 = vld [vmem:[#allocation6 + $0x40] ss:$8 sm:$0xf]  ;;  %vm5242_vm10 = vmmov %vm5239_vm3 }
 0x43e   : > { %v2028_v1 = vpack.c.bf16 %v2026_v4, %v2025_v27  ;;  %v2273_v55 = vpack.c.bf16 %v2270_v16, %v2269_v18  ;;  %v1753_v6 = vmul.f32 %v1745_v51, %v1742_v13  ;;  %v1756_v50 = vmul.f32 %v1748_v46, %v1739_v60 }
 0x43f   : > { %v2271_v24 = vmul.f32 %v2263_v49, %v1739_v60  ;;  %v2272_v44 = vmul.f32 %v2264_v43, %v1742_v13  ;;  %v3513_v57 = vld [vmem:[#allocation2 + $0x12c] sm:$0xf0]  ;;  %v3353_v35 = vld [vmem:[#allocation2 + $0x130] sm:$0xf0]  ;;  %v2648_v46 = vunpack.c.l.b16 %v4831_v23  ;;  %v2649_v49 = vunpack.c.h.b16 %v4831_v23 }
 0x440   : > { %2030 = vst [vmem:[#allocation2 + $0x98] sm:$0xff] %v2028_v1  ;;  %v1757_v58 = vpack.c.bf16 %v1754_v33, %v1753_v6  ;;  %v1758_v45 = vpack.c.bf16 %v1756_v50, %v1755_v22  ;;  %v2483_v27 = vunpack.c.l.b16 %v5072_v21 }
 0x441   : > { %2275 = vst [vmem:[#allocation2 + $0x120] sm:$0xff] %v2273_v55  ;;  %v2274_v53 = vpack.c.bf16 %v2272_v44, %v2271_v24  ;;  %v2704_v16 = vpack.c.b16 %v2648_v46, %v2648_v46  ;;  %v2705_v33 = vpack.c.b16 %v2649_v49, %v2649_v49 }
 0x442   : > { %1759 = vst [vmem:[#allocation2] sm:$0xff] %v1757_v58  ;;  %v2066_v42 = vpop.permute.xlu0 %2065  ;;  %v5083_v23 = vpop.permute.xlu1 %2203  ;;  %v5090_v20 = vpack.c.b16 %v2483_v27, %v2483_v27  ;;  %v3526_v58 = vld [vmem:[#allocation2 + $0x194] sm:$0xf0]  ;;  %v2215_v27 = vperm.slane %v5080_v39, 2 }
 0x443   : > { %1760 = vst [vmem:[#allocation2 + $0x8] sm:$0xff] %v1758_v45  ;;  %v2069_v9 = vsel %vm830_vm13, %v2066_v42, %v4749_v12  ;;  %v2070_v56 = vsel %vm830_vm13, %v4770_v37, %v2066_v42  ;;  %v1768_v54 = vpop.permute.xlu2 %1767  ;;  %v2768_v44 = vsel %vm1545_vm11, %v2704_v16, 0  ;;  %v3409_v45 = vld [vmem:[#allocation2 + $0x198] sm:$0xf0] }
 0x444   : > { %2276 = vst [vmem:[#allocation2 + $0x128] sm:$0xff] %v2274_v53  ;;  %v2085_v14 = vmul.f32 %v2077_v28, %v2070_v56  ;;  %v2086_v41 = vmul.f32 %v2078_v36, %v2069_v9  ;;  %v1769_v17 = vsel %vm5229_vm9, %v4999_v32, %v1768_v54  ;;  %v1772_v0 = vsel %vm5230_vm14, %v1768_v54, %v5001_v30  ;;  %v3391_v9 = vld [vmem:[#allocation2 + $0x168] sm:$0xf]  ;;  %v3520_v56 = vld [vmem:[#allocation2 + $0x16c] sm:$0xf] }
 0x445   : > { %v1783_v25 = vmul.f32 %v1775_v48, %v1772_v0  ;;  %v1786_v5 = vmul.f32 %v1778_v59, %v1769_v17  ;;  %v2289_v8 = vmul.f32 %v2281_v52, %v1769_v17  ;;  %v2290_v12 = vmul.f32 %v2282_v62, %v1772_v0  ;;  %v3407_v59 = vld [vmem:[#allocation2 + $0x188] sm:$0xf]  ;;  %v3524_v52 = vld [vmem:[#allocation2 + $0x18c] sm:$0xf] }
 0x446   : > { %v2088_v10 = vpack.c.bf16 %v2086_v41, %v2085_v14  ;;  %v2048_v30 = vperm.slane %v4758_v26, 3  ;;  %v2771_v28 = vsel %vm1545_vm11, %v2705_v33, 0  ;;  %v2241_v62 = vld [vmem:[#allocation6 + $0x41] ss:$8 sm:$0xf]  ;;  %v3408_v42 = vor.u32 %v3526_v58, %v3407_v59 }
 0x447   : > { %v1787_v2 = vpack.c.bf16 %v1784_v38, %v1783_v25  ;;  %v1788_v11 = vpack.c.bf16 %v1786_v5, %v1785_v40  ;;  %v2292_v37 = vpack.c.bf16 %v2290_v12, %v2289_v8  ;;  %v3412_v40 = vor.u32 %v3524_v52, %v3409_v45  ;;  %v3522_v14 = vld [vmem:[#allocation2 + $0x174] sm:$0xf0]  ;;  %v3393_v5 = vld [vmem:[#allocation2 + $0x178] sm:$0xf0]  ;;  %v3311_v52 = vld [vmem:[#allocation2 + $0xc8] sm:$0xf] }
 0x448   : > { %2090 = vst [vmem:[#allocation2 + $0xb8] sm:$0xff] %v2088_v10  ;;  %v3351_v47 = vld [vmem:[#allocation2 + $0x120] sm:$0xf]  ;;  %v3511_v15 = vld [vmem:[#allocation2 + $0x124] sm:$0xf]  ;;  %v2245_v54 = vperm.slane %v2241_v62, 2  ;;  %v3392_v10 = vor.u32 %v3522_v14, %v3391_v9 }
 0x449   : > { %1789 = vst [vmem:[#allocation2 + $0x10] sm:$0xff] %v1787_v2  ;;  %v3352_v18 = vor.u32 %v3513_v57, %v3351_v47  ;;  %v3356_v32 = vor.u32 %v3511_v15, %v3353_v35  ;;  %v3207_v22 = vld [vmem:[#allocation2] sm:$0xf]  ;;  %v3475_v60 = vld [vmem:[#allocation2 + $0x4] sm:$0xf]  ;;  %v2244_v17 = vperm.slane %v2241_v62, 1  ;;  %v3396_v2 = vor.u32 %v3520_v56, %v3393_v5 }
 0x44a   : > { %1790 = vst [vmem:[#allocation2 + $0x18] sm:$0xff] %v1788_v11  ;;  %v2202_v34 = vpop.permute.xlu0 %2201  ;;  %v2234_v41 = vpop.permute.xlu1 %2233  ;;  %v2243_v0 = vperm.slane %v2241_v62, 0  ;;  %v2246_v25 = vperm.slane %v2241_v62, 3  ;;  %vm5233_vm11 = vcmp.lt.s32.totalorder %v4039_v7, 119  ;;  %v3518_v57 = vld [vmem:[#allocation2 + $0x154] sm:$0xf0] }
 0x44b   : > { %2294 = vst [vmem:[#allocation2 + $0x138] sm:$0xff] %v2292_v37  ;;  %2792 = vmatpush.bf16.msra.mxu1 %v3352_v18  ;;  %2818 = vmatpush.bf16.msra.mxu0 %v3356_v32  ;;  %v2036_v51 = vpop.permute.xlu2 %2035  ;;  %vm5234_vm8 = vmmov %vm5233_vm11  ;;  %v3377_v35 = vld [vmem:[#allocation2 + $0x158] sm:$0xf0]  ;;  %v3512_v16 = vld [vmem:[#allocation2 + $0x12c] sm:$0xf] }
 0x44c   : > { %v2039_v31 = vsel %vm798_vm12, %v2036_v51, %v4732_v61  ;;  %v2040_v26 = vsel %vm798_vm12, %v4751_v63, %v2036_v51  ;;  %v2214_v61 = vperm.slane %v5080_v39, 1  ;;  %v2213_v63 = vperm.slane %v5080_v39, 0  ;;  %vm5235_vm15 = vmmov %vm5234_vm8  ;;  %v3516_v51 = vld [vmem:[#allocation2 + $0x14c] sm:$0xf] }
 0x44d   : > { %v2055_v3 = vmul.f32 %v2047_v29, %v2040_v26  ;;  %v2056_v43 = vmul.f32 %v2048_v30, %v2039_v31  ;;  %vm5231_vm12 = vcmp.lt.s32.totalorder %v4039_v7, 120  ;;  %vm5236_vm1 = vmmov %vm5234_vm8  ;;  %v3380_v49 = vor.u32 %v3516_v51, %v3377_v35  ;;  %v3500_v62 = vld [vmem:[#allocation2 + $0xcc] sm:$0xf]  ;;  %v3247_v51 = vld [vmem:[#allocation2 + $0x48] sm:$0xf] }
 0x44e   : > { %v2208_v6 = vsel %vm5231_vm12, %v2202_v34, %v5083_v23  ;;  %vm5232_vm13 = vmmov %vm5231_vm12 }
 0x44f   : > { %v2058_v4 = vpack.c.bf16 %v2056_v43, %v2055_v3  ;;  %v2222_v48 = vmul.f32 %v2214_v61, %v2208_v6  ;;  %vm5237_vm2 = vmmov %vm5231_vm12  ;;  %v3498_v5 = vld [vmem:[#allocation2 + $0xb4] sm:$0xf0] }
 0x450   : > { %v3477_v19 = vld [vmem:[#allocation2 + $0xc] sm:$0xf0]  ;;  %v3209_v13 = vld [vmem:[#allocation2 + $0x10] sm:$0xf0]  ;;  %vm5238_vm4 = vmmov %vm5237_vm2 }
 0x451   : > { %2060 = vst [vmem:[#allocation2 + $0xa8] sm:$0xff] %v2058_v4  ;;  %v3208_v1 = vor.u32 %v3477_v19, %v3207_v22  ;;  %v3212_v55 = vor.u32 %v3475_v60, %v3209_v13  ;;  %v2216_v4 = vperm.slane %v5080_v39, 3  ;;  %v3359_v22 = vld [vmem:[#allocation2 + $0x128] sm:$0xf]  ;;  %v2484_v39 = vunpack.c.h.b16 %v5072_v21  ;;  %v3502_v21 = vld [vmem:[#allocation2 + $0xd4] sm:$0xf0] }
 0x452   : > { %v2232_v50 = vpop.permute.xlu0 %2231  ;;  %v3514_v3 = vld [vmem:[#allocation2 + $0x134] sm:$0xf0]  ;;  %v3361_v43 = vld [vmem:[#allocation2 + $0x138] sm:$0xf0] }
 0x453   : > { %v5092_v24 = vpop.permute.xlu2 %2199  ;;  %2780 = vmatpush.bf16.msra.mxu3 %v3208_v1  ;;  %2806 = vmatpush.bf16.msra.mxu2 %v3212_v55  ;;  %v2238_v8 = vsel %vm5233_vm11, %v2232_v50, %v2234_v41  ;;  %v3360_v33 = vor.u32 %v3514_v3, %v3359_v22  ;;  %v3364_v19 = vor.u32 %v3512_v16, %v3361_v43  ;;  %v3482_v43 = vld [vmem:[#allocation2 + $0x34] sm:$0xf0]  ;;  %v3480_v22 = vld [vmem:[#allocation2 + $0x2c] sm:$0xf] }
 0x454   : > { %v2209_v36 = vsel %vm5232_vm13, %v5092_v24, %v2202_v34  ;;  %v2252_v32 = vmul.f32 %v2244_v17, %v2238_v8  ;;  %v3375_v34 = vld [vmem:[#allocation2 + $0x148] sm:$0xf]  ;;  %v2486_v7 = vpack.c.b16 %v2484_v39, %v2484_v39  ;;  %v3297_v8 = vld [vmem:[#allocation2 + $0xb8] sm:$0xf0] }
 0x455   : > { %v2221_v53 = vmul.f32 %v2213_v63, %v2209_v36  ;;  %v3376_v46 = vor.u32 %v3518_v57, %v3375_v34  ;;  %v3492_v57 = vld [vmem:[#allocation2 + $0x8c] sm:$0xf] }
 0x456   : > { %2781 = vmatmul.bf16.vlgmr.msra.gmra.mxu3 %v5090_v20  ;;  %2807 = vmatmul.bf16.vlgmr.msra.gmra.mxu2 %v5090_v20 }
 0x457   : > { %2840 = vmatpush.bf16.msrb.mxu3 %v2768_v44  ;;  %2866 = vmatpush.bf16.msrb.mxu2 %v2771_v28  ;;  %v2225_v38 = vpack.c.bf16 %v2222_v48, %v2221_v53  ;;  %v3329_v44 = vld [vmem:[#allocation2 + $0xf8] sm:$0xf0]  ;;  %v3327_v48 = vld [vmem:[#allocation2 + $0xe8] sm:$0xf]  ;;  %v3504_v53 = vld [vmem:[#allocation2 + $0xec] sm:$0xf] }
 0x458   : > { %v3332_v59 = vor.u32 %v3504_v53, %v3329_v44  ;;  %v3295_v56 = vld [vmem:[#allocation2 + $0xa8] sm:$0xf]  ;;  %v2480_v44 = vpop.permute.xlu1 %2479  ;;  %v3612_v53 = vld [vmem:[%s3921_s15] sm:$0xff] }
 0x459   : > { %2227 = vst [vmem:[#allocation2 + $0x100] sm:$0xff] %v2225_v38 }
 0x45a   : > { %v2236_v12 = vpop.permute.xlu0 %2235 }
 0x45b   : > { %2841 = vmatpush.bf16.msrb.mxu3 %v3408_v42  ;;  %2867 = vmatpush.bf16.msrb.mxu2 %v3412_v40  ;;  %v2237_v11 = vsel %vm5234_vm8, %v2234_v41, %v2236_v12  ;;  %v2230_v37 = vpop.permute.xlu2 %2229  ;;  %v3313_v42 = vld [vmem:[#allocation2 + $0xd8] sm:$0xf0]  ;;  %v3312_v40 = vor.u32 %v3502_v21, %v3311_v52 }
 0x45c   : > { %v2253_v47 = vmul.f32 %v2245_v54, %v2237_v11  ;;  %v2239_v15 = vsel %vm5235_vm15, %v2230_v37, %v2232_v50  ;;  %v2240_v18 = vsel %vm5236_vm1, %v2236_v12, %v2230_v37  ;;  %v3506_v50 = vld [vmem:[#allocation2 + $0xf4] sm:$0xf0]  ;;  %v3316_v38 = vor.u32 %v3500_v62, %v3313_v42  ;;  %v3496_v54 = vld [vmem:[#allocation2 + $0xac] sm:$0xf]  ;;  %v3281_v11 = vld [vmem:[#allocation2 + $0x98] sm:$0xf0] }
 0x45d   : > { %v2251_v29 = vmul.f32 %v2243_v0, %v2239_v15  ;;  %v2254_v30 = vmul.f32 %v2246_v25, %v2240_v18  ;;  %v3296_v12 = vor.u32 %v3498_v5, %v3295_v56  ;;  %v3279_v37 = vld [vmem:[#allocation2 + $0x88] sm:$0xf]  ;;  %v3490_v15 = vld [vmem:[#allocation2 + $0x74] sm:$0xf0]  ;;  %v3265_v18 = vld [vmem:[#allocation2 + $0x78] sm:$0xf0] }
 0x45f   : > { %2842 = vmatpush.bf16.msrb.mxu3 %v3392_v10  ;;  %2868 = vmatpush.bf16.msrb.mxu2 %v3396_v2  ;;  %v2255_v31 = vpack.c.bf16 %v2252_v32, %v2251_v29  ;;  %v2256_v26 = vpack.c.bf16 %v2254_v30, %v2253_v47  ;;  %v3300_v10 = vor.u32 %v3496_v54, %v3297_v8  ;;  %v3494_v2 = vld [vmem:[#allocation2 + $0x94] sm:$0xf0]  ;;  %v3263_v32 = vld [vmem:[#allocation2 + $0x68] sm:$0xf]  ;;  %v3488_v29 = vld [vmem:[#allocation2 + $0x6c] sm:$0xf] }
 0x460   : > { %v3335_v6 = vld [vmem:[#allocation2 + $0x100] sm:$0xf]  ;;  %v3507_v58 = vld [vmem:[#allocation2 + $0x104] sm:$0xf]  ;;  %v3280_v35 = vor.u32 %v3494_v2, %v3279_v37  ;;  %v3284_v47 = vor.u32 %v3492_v57, %v3281_v11  ;;  %v3264_v30 = vor.u32 %v3490_v15, %v3263_v32  ;;  %v3268_v34 = vor.u32 %v3488_v29, %v3265_v18 }
 0x461   : > { %2257 = vst [vmem:[#allocation2 + $0x110] sm:$0xff] %v2255_v31  ;;  %v3249_v31 = vld [vmem:[#allocation2 + $0x58] sm:$0xf0] }
 0x462   : > { %2258 = vst [vmem:[#allocation2 + $0x118] sm:$0xff] %v2256_v26 }
 0x463   : > { %2843 = vmatpush.bf16.msrb.mxu3 %v3376_v46  ;;  %2869 = vmatpush.bf16.msrb.mxu2 %v3380_v49  ;;  %v2206_v60 = vpop.permute.xlu2 %2205  ;;  %v3484_v46 = vld [vmem:[#allocation2 + $0x4c] sm:$0xf]  ;;  %v3486_v49 = vld [vmem:[#allocation2 + $0x54] sm:$0xf0] }
 0x464   : > { %v2207_v13 = vsel %vm5237_vm2, %v5083_v23, %v2206_v60  ;;  %v2210_v61 = vsel %vm5238_vm4, %v2206_v60, %v5092_v24  ;;  %v3328_v24 = vor.u32 %v3506_v50, %v3327_v48  ;;  %v3248_v26 = vor.u32 %v3486_v49, %v3247_v51  ;;  %v3217_v60 = vld [vmem:[#allocation2 + $0x18] sm:$0xf0] }
 0x465   : > { %v2223_v63 = vmul.f32 %v2215_v27, %v2207_v13  ;;  %v2224_v1 = vmul.f32 %v2216_v4, %v2210_v61  ;;  %v3252_v3 = vor.u32 %v3484_v46, %v3249_v31  ;;  %v3233_v27 = vld [vmem:[#allocation2 + $0x38] sm:$0xf0]  ;;  %v3231_v4 = vld [vmem:[#allocation2 + $0x28] sm:$0xf]  ;;  %v3476_v61 = vld [vmem:[#allocation2 + $0xc] sm:$0xf] }
 0x466   : > { %v3232_v16 = vor.u32 %v3482_v43, %v3231_v4  ;;  %v3215_v13 = vld [vmem:[#allocation2 + $0x8] sm:$0xf] }
 0x467   : > { %2844 = vmatpush.bf16.msrb.mxu3 %v3360_v33  ;;  %2870 = vmatpush.bf16.msrb.mxu2 %v3364_v19  ;;  %v2226_v55 = vpack.c.bf16 %v2224_v1, %v2223_v63  ;;  %v3236_v33 = vor.u32 %v3480_v22, %v3233_v27  ;;  %v3478_v19 = vld [vmem:[#allocation2 + $0x14] sm:$0xf0]  ;;  %v3220_v1 = vor.u32 %v3476_v61, %v3217_v60 }
 0x468   : > { %v3509_v28 = vld [vmem:[#allocation2 + $0x10c] sm:$0xf0]  ;;  %v3337_v45 = vld [vmem:[#allocation2 + $0x110] sm:$0xf0]  ;;  %v3216_v63 = vor.u32 %v3478_v19, %v3215_v13 }
 0x469   : > { %2228 = vst [vmem:[#allocation2 + $0x108] sm:$0xff] %v2226_v55  ;;  %v3336_v36 = vor.u32 %v3509_v28, %v3335_v6  ;;  %v3340_v23 = vor.u32 %v3507_v58, %v3337_v45  ;;  %v3510_v9 = vld [vmem:[#allocation2 + $0x114] sm:$0xf0]  ;;  %v3345_v17 = vld [vmem:[#allocation2 + $0x118] sm:$0xf0] }
 0x46b   : > { %2793 = vmatpush.bf16.msra.mxu1 %v3336_v36  ;;  %2819 = vmatpush.bf16.msra.mxu0 %v3340_v23 }
 0x46e   : > { %3413 = vmatmul.msk.bf16.vlgmr.msra.gmra.mxu1 %vm5239_vm3, %v2486_v7  ;;  %3414 = vmatmul.msk.bf16.vlgmr.msra.gmra.mxu0 %vm5240_vm5, %v2486_v7 }
 0x46f   : > { %2825 = vmatpush.bf16.msrb.mxu1 %v3328_v24  ;;  %2851 = vmatpush.bf16.msrb.mxu0 %v3332_v59  ;;  %v3613_v24 = vld [vmem:[%s3921_s15 + $0x8] sm:$0xff] }
 0x470   : > { %v3343_v14 = vld [vmem:[#allocation2 + $0x108] sm:$0xf]  ;;  %v3508_v41 = vld [vmem:[#allocation2 + $0x10c] sm:$0xf] }
 0x471   : > { %v3344_v0 = vor.u32 %v3510_v9, %v3343_v14  ;;  %v3348_v25 = vor.u32 %v3508_v41, %v3345_v17  ;;  %v3614_v17 = vld [vmem:[%s3921_s15 + $0x10] sm:$0xff] }
 0x473   : > { %2826 = vmatpush.bf16.msrb.mxu1 %v3312_v40  ;;  %2852 = vmatpush.bf16.msrb.mxu0 %v3316_v38 }
 0x474   : > { %2845 = vmatpush.bf16.msrb.mxu3 %v3344_v0  ;;  %2871 = vmatpush.bf16.msrb.mxu2 %v3348_v25  ;;  %v3615_v25 = vld [vmem:[%s3921_s15 + $0x18] sm:$0xff] }
 0x477   : > { %2827 = vmatpush.bf16.msrb.mxu1 %v3296_v12  ;;  %2853 = vmatpush.bf16.msrb.mxu0 %v3300_v10 }
 0x478   : > { %3415 = vmatmul.msk.bf16.vlgmr.msrb.gmra.mxu3 %vm5241_vm6, %v2486_v7  ;;  %3416 = vmatmul.msk.bf16.vlgmr.msrb.gmra.mxu2 %vm5242_vm10, %v2486_v7 }
 0x47b   : > { %2828 = vmatpush.bf16.msrb.mxu1 %v3280_v35  ;;  %2854 = vmatpush.bf16.msrb.mxu0 %v3284_v47 }
 0x47f   : > { %2829 = vmatpush.bf16.msrb.mxu1 %v3264_v30  ;;  %2855 = vmatpush.bf16.msrb.mxu0 %v3268_v34 }
 0x483   : > { %2830 = vmatpush.bf16.msrb.mxu1 %v3248_v26  ;;  %2856 = vmatpush.bf16.msrb.mxu0 %v3252_v3 }
 0x487   : > { %2831 = vmatpush.bf16.msrb.mxu1 %v3232_v16  ;;  %2857 = vmatpush.bf16.msrb.mxu0 %v3236_v33 }
 0x48b   : > { %2832 = vmatpush.bf16.msrb.mxu1 %v3216_v63  ;;  %2858 = vmatpush.bf16.msrb.mxu0 %v3220_v1 }
 0x48e   : > { %2833 = vmatmul.bf16.vlgmr.msrb.gmra.mxu1 %v5090_v20  ;;  %2859 = vmatmul.bf16.vlgmr.msrb.gmra.mxu0 %v5090_v20 }
 0x4d9   : > { %v2782_v39 = vpop.f32.mrf.mxu3  ;;  %v2808_v55 = vpop.f32.mrf.mxu2 }
 0x4da   : > { %v2783_v28 = vadd.f32 %v2782_v39, %v2480_v44  ;;  %v2809_v58 = vadd.f32 %v2808_v55, %v2480_v44 }
 0x4e1   : > { %v2784_v6 = vpop.f32.mrf.mxu3  ;;  %v2810_v50 = vpop.f32.mrf.mxu2 }
 0x4eb   : > { %v2795_v45 = vpop.f32.mrf.mxu1  ;;  %v2821_v36 = vpop.f32.mrf.mxu0 }
 0x4ec   : > { %v2796_v23 = vadd.f32 %v2795_v45, %v2783_v28  ;;  %v2822_v48 = vadd.f32 %v2821_v36, %v2809_v58 }
 0x4ee   : > { %v2877_v7 = vadd.f32 %v3612_v53, %v2796_v23  ;;  %v2878_v59 = vadd.f32 %v3613_v24, %v2822_v48 }
 0x4f0   : > { %2881 = vst [vmem:[%s394_s27] sm:$0xff] %v2877_v7 }
 0x4f1   : > { %2882 = vst [vmem:[%s394_s27 + $0x8] sm:$0xff] %v2878_v59 }
 0x4f3   : > { %v2797_v20 = vpop.f32.mrf.mxu1  ;;  %v2823_v52 = vpop.f32.mrf.mxu0 }
 0x4fb   : > { %v2847_v62 = vpop.f32.mrf.mxu3  ;;  %v2873_v21 = vpop.f32.mrf.mxu2 }
 0x503   : > { %v2849_v42 = vpop.f32.mrf.mxu3  ;;  %v2875_v40 = vpop.f32.mrf.mxu2 }
 0x50b   : > { %v2834_v38 = vpop.f32.mrf.mxu1  ;;  %v2860_v9 = vpop.f32.mrf.mxu0 }
 0x50c   : > { %v2835_v56 = vadd.f32 %v2834_v38, %v2480_v44  ;;  %v2861_v54 = vadd.f32 %v2860_v9, %v2480_v44 }
 0x50e   : > { %v2848_v14 = vadd.f32 %v2847_v62, %v2835_v56  ;;  %v2874_v41 = vadd.f32 %v2873_v21, %v2861_v54 }
 0x510   : > { %v2879_v0 = vadd.f32 %v3614_v17, %v2848_v14  ;;  %v2880_v5 = vadd.f32 %v3615_v25, %v2874_v41 }
 0x512   : > { %2883 = vst [vmem:[%s394_s27 + $0x10] sm:$0xff] %v2879_v0 }
 0x513   : > { %2884 = vst [vmem:[%s394_s27 + $0x18] sm:$0xff] %v2880_v5  ;;  %v2836_v8 = vpop.f32.mrf.mxu1  ;;  %v2862_v12 = vpop.f32.mrf.mxu0 }
 0x514   : > { %3703 = shalt.err (!%p3700_p9)
}
 0x515   : > { %3534 = dma.vmem_to_hbm [thread:$0]  (%p3884_p13), %s2900_s11, 512, %s2902_s28, %s2886_s20  }
 0x516 PF: > { %s2913_s17 = sand.u32 1, %s3734_s13   ;;  %p5244_p10 = scmp.ge.s32.totalorder %s3746_s16, 2 }
 0x517   : > { %s2914_s27 = scalar_lea.sflag [#allocation5], %s2913_s17 }
 0x518   : > { %p3545_p11 = pnand %p5244_p10, %p3889_p4 }
 0x51a   : > { %p3546_p0 = pneg %p3545_p11 }
 0x51c   : > { %3729 = dma.done.wait (%p3546_p0), %s2914_s27, 512  }
 0x51d   : > { %3731 = vsyncadd (%p3546_p0), %s2914_s27, 4294966784  ;;  %s5245_s16 = sld [smem:[#allocation13_spill]]  ;;  %s5248_s13 = smov %s3738_s14 }
 0x51e   : > { %s5246_s30 = sld [smem:[#allocation12_spill]] }
 0x51f   : > { %s5247_s15 = sld [smem:[#allocation14_spill]] }
 0x523   : > { %p24_p2 = scmp.ge.s32.totalorder %s5245_s16, 4  }
 0x524   : > { %s5249_s14 = smov %s5246_s30 }
 0x525   :  { %26 = sbr.rel (!%p24_p2) target bundleno = 8 (0x8), region = 135 }
 0x52a   :  { %2920 = vsyncpa [#allocation4], 1 }
 0x52b   :  { %2922 = vsyncpa [#allocation4 + $0x1], 1 }
 0x52c   :  { %2923 = vsyncpa [#allocation7], 1 }
 0x52d   :  { %2924 = vsyncpa [#allocation5], 1 }
 0x52e   :  { %2926 = vsyncpa [#allocation5 + $0x1], 1 }

</bundles_post_ra>
